<compile_context>
chip_gen: v7x
topology: tpu7x:2x2x1
jax: 0.10.0
libtpu: 0.0.40
codegen_flags: <defaults>
</compile_context>

<pallas_src>
import math
import functools

import jax
import jax.numpy as jnp
from jax.experimental import pallas as pl
from jax.experimental.pallas import tpu as pltpu

NEG_INF = -1e30                          # finite mask fill (NaN-safe)
SEQ_ALIGN = 16                           # bf16 packs 2 rows / sublane -> pad seq dims to 16
ROW_TILES = (512, 256, 128, 64, 32, 16)  # M tiles for row-blocked kernels
N_TILES = (512, 256, 128)                # Dout lane tiles
K_TILES = (1024, 512, 256, 128)          # contraction tiles
Q_TILES = (256, 128, 64, 32, 16)         # flash-attention query tiles
KV_TILES = (512, 256, 128)               # flash-attention key tiles


def _round_up(n, m):
    return ((n + m - 1) // m) * m


def _pick_tile(dim, candidates):
    """Largest candidate that evenly divides `dim`, else the full dim."""
    for c in candidates:
        if dim % c == 0:
            return c
    return dim


def _vmem_limit_bytes():
    # v5e/v6e: 128 MiB physical -> budget ~100 MiB (perf review);
    # fallback assumes v7x-like 64 MiB -> 56 MiB budget.
    try:
        cap = int(pltpu.get_tpu_info().vmem_capacity_bytes)
    except Exception:
        cap = 64 * 1024 * 1024
    return min(100 * 1024 * 1024, (cap * 7) // 8)


VMEM_LIMIT_BYTES = _vmem_limit_bytes()


def _compiler_params(sem):
    return pltpu.CompilerParams(dimension_semantics=sem,
                                vmem_limit_bytes=VMEM_LIMIT_BYTES)


# ----------------------------- Pallas kernels -------------------------------

def _matmul_bias_kernel(x_ref, wt_ref, b_ref, o_ref, acc_ref, *, relu):
    """Tiled y = x @ wt + b (optionally relu). K axis is grid axis 2."""
    k = pl.program_id(2)

    @pl.when(k == 0)
    def _():
        acc_ref[...] = jnp.zeros_like(acc_ref)

    acc_ref[...] += jnp.dot(x_ref[...].astype(jnp.bfloat16), wt_ref[...],
                            preferred_element_type=jnp.float32)

    @pl.when(k == pl.num_programs(2) - 1)
    def _():
        y = acc_ref[...] + b_ref[...]
        if relu:
            y = jnp.maximum(y, 0.0)
        o_ref[...] = y.astype(o_ref.dtype)


def matmul_bias_pallas(x, wt, b2, relu=False, out_dtype=jnp.float32):
    """y = x @ wt + b; wt pre-transposed (Din, Dout) bf16, b2 (1, Dout) f32.
    Requires N divisible by a ROW_TILES entry (guaranteed by top-level seq padding)."""
    N, Din = x.shape
    Dout = wt.shape[1]
    rm = _pick_tile(N, ROW_TILES)
    nt = _pick_tile(Dout, N_TILES)   # falls back to full Dout (lane-masked) for tiny configs
    kt = _pick_tile(Din, K_TILES)
    grid = (N // rm, Dout // nt, Din // kt)
    return pl.pallas_call(
        functools.partial(_matmul_bias_kernel, relu=relu),
        out_shape=jax.ShapeDtypeStruct((N, Dout), out_dtype),
        grid=grid,
        in_specs=[
            pl.BlockSpec((rm, kt), lambda i, j, k: (i, k)),
            pl.BlockSpec((kt, nt), lambda i, j, k: (k, j)),
            pl.BlockSpec((1, nt), lambda i, j, k: (0, j)),
        ],
        out_specs=pl.BlockSpec((rm, nt), lambda i, j, k: (i, j)),
        scratch_shapes=[pltpu.VMEM((rm, nt), jnp.float32)],
        compiler_params=_compiler_params(("parallel", "parallel", "arbitrary")),
    )(x, wt, b2)


def _linear_ln_res_kernel(x_ref, wt_ref, b_ref, res_ref, g_ref, bb_ref,
                          o_ref, acc_ref):
    """Fused: LayerNorm(res + (x @ wt + b)) with K-tiled f32 accumulation."""
    k = pl.program_id(1)

    @pl.when(k == 0)
    def _():
        acc_ref[...] = jnp.zeros_like(acc_ref)

    acc_ref[...] += jnp.dot(x_ref[...].astype(jnp.bfloat16), wt_ref[...],
                            preferred_element_type=jnp.float32)

    @pl.when(k == pl.num_programs(1) - 1)
    def _():
        y = acc_ref[...] + b_ref[...] + res_ref[...].astype(jnp.float32)
        mu = jnp.mean(y, axis=-1, keepdims=True)
        var = jnp.mean(jnp.square(y - mu), axis=-1, keepdims=True)
        yn = (y - mu) * jax.lax.rsqrt(var + 1e-5)
        o_ref[...] = (yn * g_ref[...] + bb_ref[...]).astype(o_ref.dtype)


def linear_ln_residual_pallas(x, wt, b2, res, gamma2, beta2):
    """LayerNorm(res + x @ wt + b), torch LN defaults (eps=1e-5, affine)."""
    N, Din = x.shape
    D = wt.shape[1]
    rm = _pick_tile(N, ROW_TILES)
    kt = _pick_tile(Din, K_TILES)
    grid = (N // rm, Din // kt)
    return pl.pallas_call(
        _linear_ln_res_kernel,
        out_shape=jax.ShapeDtypeStruct((N, D), jnp.float32),
        grid=grid,
        in_specs=[
            pl.BlockSpec((rm, kt), lambda i, k: (i, k)),
            pl.BlockSpec((kt, D), lambda i, k: (k, 0)),
            pl.BlockSpec((1, D), lambda i, k: (0, 0)),
            pl.BlockSpec((rm, D), lambda i, k: (i, 0)),
            pl.BlockSpec((1, D), lambda i, k: (0, 0)),
            pl.BlockSpec((1, D), lambda i, k: (0, 0)),
        ],
        out_specs=pl.BlockSpec((rm, D), lambda i, k: (i, 0)),
        scratch_shapes=[pltpu.VMEM((rm, D), jnp.float32)],
        compiler_params=_compiler_params(("parallel", "arbitrary")),
    )(x, wt, b2, res, gamma2, beta2)


def _flash_attn_kernel(q_ref, k_ref, v_ref, bias_ref, o_ref,
                       m_sc, l_sc, acc_sc, *, heads, head_dim):
    """Flash attention, lane-dense (B,T,D) layout. Grid = (B, Tq tiles, KV tiles).
    Heads handled with static lane slices; online softmax state per (head, row)."""
    kv = pl.program_id(2)

    @pl.when(kv == 0)
    def _():
        m_sc[...] = jnp.full_like(m_sc, NEG_INF)
        l_sc[...] = jnp.zeros_like(l_sc)
        acc_sc[...] = jnp.zeros_like(acc_sc)

    bias = bias_ref[0]                                        # (1, kvt) additive f32
    for h in range(heads):
        sl = slice(h * head_dim, (h + 1) * head_dim)
        q_h = q_ref[0, :, sl]                                 # (tq, d) bf16, pre-scaled
        k_h = k_ref[0, :, sl]                                 # (kvt, d) bf16
        v_h = v_ref[0, :, sl]                                 # (kvt, d) bf16
        s = jax.lax.dot_general(q_h, k_h, (((1,), (1,)), ((), ())),
                                preferred_element_type=jnp.float32)   # (tq, kvt)
        s = s + bias
        m_prev = m_sc[:, h:h + 1]
        m_new = jnp.maximum(m_prev, jnp.max(s, axis=-1, keepdims=True))
        alpha = jnp.exp(m_prev - m_new)
        p = jnp.exp(s - m_new)
        l_sc[:, h:h + 1] = alpha * l_sc[:, h:h + 1] + jnp.sum(p, axis=-1, keepdims=True)
        acc_sc[:, sl] = alpha * acc_sc[:, sl] + jnp.dot(
            p.astype(jnp.bfloat16), v_h, preferred_element_type=jnp.float32)
        m_sc[:, h:h + 1] = m_new

    @pl.when(kv == pl.num_programs(2) - 1)
    def _():
        # TODO(synk): a row whose keys are ALL masked yields the unweighted mean
        # of V (torch softmax would give NaN); harmless for padded rows.
        for h in range(heads):
            sl = slice(h * head_dim, (h + 1) * head_dim)
            o_ref[0, :, sl] = (acc_sc[:, sl] / l_sc[:, h:h + 1]).astype(o_ref.dtype)


def flash_attention_pallas(q_src, k_src, v_src, key_bias, heads, d_model,
                           q_idx, k_idx, v_idx):
    """q_src:(B,Tq,Wq) bf16, k_src/v_src:(B,Tk,Wk) bf16 (may be the same array),
    key_bias:(B,1,Tk) f32 additive (0 visible / -1e30 masked).
    q occupies lane block q_idx of width d_model in q_src (similarly k/v).
    Returns (B, Tq, d_model) bf16."""
    B, Tq, _ = q_src.shape
    Tk = k_src.shape[1]
    d = d_model // heads
    tq = _pick_tile(Tq, Q_TILES)
    kvt = _pick_tile(Tk, KV_TILES)     # falls back to full Tk for short sequences
    grid = (B, Tq // tq, Tk // kvt)
    kernel = functools.partial(_flash_attn_kernel, heads=heads, head_dim=d)
    return pl.pallas_call(
        kernel,
        out_shape=jax.ShapeDtypeStruct((B, Tq, d_model), jnp.bfloat16),
        grid=grid,
        in_specs=[
            pl.BlockSpec((1, tq, d_model), lambda b, qi, kv: (b, qi, q_idx)),
            pl.BlockSpec((1, kvt, d_model), lambda b, qi, kv: (b, kv, k_idx)),
            pl.BlockSpec((1, kvt, d_model), lambda b, qi, kv: (b, kv, v_idx)),
            pl.BlockSpec((1, 1, kvt), lambda b, qi, kv: (b, 0, kv)),
        ],
        out_specs=pl.BlockSpec((1, tq, d_model), lambda b, qi, kv: (b, qi, 0)),
        scratch_shapes=[
            pltpu.VMEM((tq, heads), jnp.float32),    # running max (per head column)
            pltpu.VMEM((tq, heads), jnp.float32),    # running sum
            pltpu.VMEM((tq, d_model), jnp.float32),  # lane-dense output accumulator
        ],
        compiler_params=_compiler_params(("parallel", "parallel", "arbitrary")),
    )(q_src, k_src, v_src, key_bias)


# ------------------------------- model glue ---------------------------------

def multihead_attention(x, kv_src, key_bias, kp, heads, self_attn):
    """flowseq MultiHeadAttention: proj -> flash attention -> out-proj fused with LN(out+res)."""
    B, Tq, D = x.shape
    x2 = x.reshape(B * Tq, D)
    lane_ok = (D % 128 == 0)
    if self_attn:
        qkv = matmul_bias_pallas(x2, kp['qkv_wt'], kp['qkv_b'],
                                 out_dtype=jnp.bfloat16)          # (B*Tq, 3D), q pre-scaled
        qkv = qkv.reshape(B, Tq, 3 * D)                           # free reshape (leading dim split)
        if lane_ok:
            attn = flash_attention_pallas(qkv, qkv, qkv, key_bias, heads, D, 0, 1, 2)
        else:
            # TODO(synk): D not a multiple of 128 -> XLA lane split fallback (toy configs only)
            q, k, v = qkv[..., :D], qkv[..., D:2 * D], qkv[..., 2 * D:]
            attn = flash_attention_pallas(q, k, v, key_bias, heads, D, 0, 0, 0)
    else:
        S = kv_src.shape[1]
        q = matmul_bias_pallas(x2, kp['q_wt'], kp['q_b'],
                               out_dtype=jnp.bfloat16).reshape(B, Tq, D)
        kv = matmul_bias_pallas(kv_src.reshape(B * S, D), kp['kv_wt'], kp['kv_b'],
                                out_dtype=jnp.bfloat16).reshape(B, S, 2 * D)
        if lane_ok:
            attn = flash_attention_pallas(q, kv, kv, key_bias, heads, D, 0, 0, 1)
        else:
            k, v = kv[..., :D], kv[..., D:]
            attn = flash_attention_pallas(q, k, v, key_bias, heads, D, 0, 0, 0)
    attn2 = attn.reshape(B * Tq, D)                               # free reshape, no transpose
    y = linear_ln_residual_pallas(attn2, kp['out_wt'], kp['out_b'], x2,
                                  kp['ln_g'], kp['ln_b'])
    return y.reshape(B, Tq, D)


def ffn_block(x, kp):
    """PositionwiseFeedForward: LN(residual + W2(relu(W1 x))), W2 + LN fused."""
    B, T, D = x.shape
    x2 = x.reshape(B * T, D)
    h = matmul_bias_pallas(x2, kp['w1t'], kp['b1'], relu=True, out_dtype=jnp.bfloat16)
    y = linear_ln_residual_pallas(h, kp['w2t'], kp['b2'], x2, kp['ln_g'], kp['ln_b'])
    return y.reshape(B, T, D)


def sinusoidal_table(num, dim, padding_idx):
    half = dim // 2
    emb = math.log(10000.0) / (half - 1)
    freqs = jnp.exp(jnp.arange(half, dtype=jnp.float32) * -emb)
    pos = jnp.arange(num, dtype=jnp.float32)[:, None] * freqs[None, :]
    table = jnp.concatenate([jnp.sin(pos), jnp.cos(pos)], axis=1)
    if dim % 2 == 1:
        table = jnp.concatenate([table, jnp.zeros((num, 1), jnp.float32)], axis=1)
    table = table.at[padding_idx].set(0.0)
    return table


def weightnorm_weight(v, g):
    """nn.utils.weight_norm(Linear), dim=0: w = g * v / ||v||_row."""
    norm = jnp.sqrt(jnp.sum(v * v, axis=1, keepdims=True))
    return g.reshape(-1, 1) * v / norm


def init_params(key, *, vocab, D, hidden, num_layers, padding_idx, max_length):
    ks = jax.random.split(key, 4 + num_layers)

    def nrm(k, shape, std=0.05):
        return std * jax.random.normal(k, shape, dtype=jnp.float32)

    embed = nrm(ks[0], (vocab, D), 0.1).at[padding_idx].set(0.0)

    def attn_params(k):
        k1, k2, k3, k4 = jax.random.split(k, 4)
        return dict(in_w=nrm(k1, (3 * D, D)), in_b=nrm(k2, (3 * D,)),
                    out_w=nrm(k3, (D, D)), out_b=nrm(k4, (D,)),
                    ln_g=jnp.ones((D,), jnp.float32), ln_b=jnp.zeros((D,), jnp.float32))

    def ffn_params(k):
        k1, k2, k3, k4 = jax.random.split(k, 4)
        return dict(w1=nrm(k1, (hidden, D)), b1=nrm(k2, (hidden,)),
                    w2=nrm(k3, (D, hidden)), b2=nrm(k4, (D,)),
                    ln_g=jnp.ones((D,), jnp.float32), ln_b=jnp.zeros((D,), jnp.float32))

    layers = []
    for l in range(num_layers):
        ka, kb, kc = jax.random.split(ks[4 + l], 3)
        layers.append(dict(slf=attn_params(ka), enc=attn_params(kb), ffn=ffn_params(kc)))

    def wn(k):
        k1, _ = jax.random.split(k)
        return dict(v=nrm(k1, (D, D)), g=jnp.ones((D,), jnp.float32),
                    b=jnp.zeros((D,), jnp.float32))

    return dict(embed=embed,
                pos_table=sinusoidal_table(max_length + 1, D, padding_idx),
                layers=layers, mu=wn(ks[1]), logvar=wn(ks[2]))


def prepare_kernel_params(params, heads):
    """One-time conversion: pre-transposed bf16 weights, q-scaling folded into
    the Q projection, weight-norm resolved, (1, Dout) f32 biases."""
    D = params['embed'].shape[1]
    d = D // heads
    scaling = d ** -0.5

    def t(w):  # torch (out, in) -> (in, out), bf16 for the MXU
        return jnp.transpose(w).astype(jnp.bfloat16)

    def prep_attn(p, self_attn):
        scale_vec = jnp.concatenate([
            jnp.full((D,), scaling, dtype=jnp.float32),
            jnp.ones((2 * D,), dtype=jnp.float32)])
        in_w_s = p['in_w'] * scale_vec[:, None]
        in_b_s = p['in_b'] * scale_vec
        out = dict(out_wt=t(p['out_w']), out_b=p['out_b'].reshape(1, -1),
                   ln_g=p['ln_g'].reshape(1, -1), ln_b=p['ln_b'].reshape(1, -1))
        if self_attn:
            out['qkv_wt'] = t(in_w_s)
            out['qkv_b'] = in_b_s.reshape(1, -1)
        else:
            out['q_wt'] = t(in_w_s[:D])
            out['q_b'] = in_b_s[:D].reshape(1, -1)
            out['kv_wt'] = t(in_w_s[D:])
            out['kv_b'] = in_b_s[D:].reshape(1, -1)
        return out

    def prep_ffn(p):
        return dict(w1t=t(p['w1']), b1=p['b1'].reshape(1, -1),
                    w2t=t(p['w2']), b2=p['b2'].reshape(1, -1),
                    ln_g=p['ln_g'].reshape(1, -1), ln_b=p['ln_b'].reshape(1, -1))

    def prep_wn(p):
        w = weightnorm_weight(p['v'], p['g'])
        return dict(wt=t(w), b=p['b'].reshape(1, -1))

    layers = [dict(slf=prep_attn(lp['slf'], True),
                   enc=prep_attn(lp['enc'], False),
                   ffn=prep_ffn(lp['ffn'])) for lp in params['layers']]
    return dict(embed=params['embed'], pos_table=params['pos_table'],
                layers=layers, mu=prep_wn(params['mu']),
                logvar=prep_wn(params['logvar']))


def transformer_core_forward(kparams, tgt_sents, tgt_masks, src_enc, src_masks,
                             *, heads, padding_idx):
    embed = kparams['embed']
    D = embed.shape[1]
    B, T = tgt_sents.shape
    S = src_enc.shape[1]

    # Pad sequence dims ONCE (review): every downstream pallas_call gets static,
    # tile-divisible shapes; padded tokens are masked everywhere and sliced off.
    Tp = _round_up(T, SEQ_ALIGN)
    Sp = _round_up(S, SEQ_ALIGN)
    tgt_masks_p = tgt_masks
    src_masks_p = src_masks
    if Tp != T:
        tgt_sents = jnp.pad(tgt_sents, ((0, 0), (0, Tp - T)), constant_values=padding_idx)
        tgt_masks_p = jnp.pad(tgt_masks, ((0, 0), (0, Tp - T)))
    if Sp != S:
        src_enc = jnp.pad(src_enc, ((0, 0), (0, Sp - S), (0, 0)))
        src_masks_p = jnp.pad(src_masks, ((0, 0), (0, Sp - S)))

    embed_scale = math.sqrt(D)
    x = embed_scale * embed[tgt_sents]                        # (B,Tp,D) gather (XLA glue)
    # F.dropout1d / F.dropout: identity at inference (training=False)
    nonpad = (tgt_sents != padding_idx).astype(jnp.int32)
    positions = jnp.cumsum(nonpad, axis=1) * nonpad + padding_idx     # make_positions
    x = x + kparams['pos_table'][positions]

    # Precomputed additive key bias (review): 0 = visible, NEG_INF = masked.
    self_bias = jnp.where(tgt_masks_p > 0, 0.0, NEG_INF).astype(jnp.float32).reshape(B, 1, Tp)
    enc_bias = jnp.where(src_masks_p > 0, 0.0, NEG_INF).astype(jnp.float32).reshape(B, 1, Sp)

    for lp in kparams['layers']:
        x = multihead_attention(x, x, self_bias, lp['slf'], heads, self_attn=True)
        x = multihead_attention(x, src_enc, enc_bias, lp['enc'], heads, self_attn=False)
        x = ffn_block(x, lp['ffn'])

    x2 = x.reshape(B * Tp, D)
    mu = matmul_bias_pallas(x2, kparams['mu']['wt'], kparams['mu']['b'])
    logvar = matmul_bias_pallas(x2, kparams['logvar']['wt'], kparams['logvar']['b'])
    mu = mu.reshape(B, Tp, D)[:, :T] * tgt_masks[:, :, None]
    logvar = logvar.reshape(B, Tp, D)[:, :T] * tgt_masks[:, :, None]
    return mu, logvar


# --------------------------------- main --------------------------------------

if __name__ == "__main__":
    key = jax.random.PRNGKey(0)
    B, T, S = 2, 8, 16
    D, hidden, heads, num_layers = 128, 256, 4, 2
    vocab, padding_idx, max_length = 20, 0, 100

    kp, kt, ks = jax.random.split(key, 3)
    params = init_params(kp, vocab=vocab, D=D, hidden=hidden,
                         num_layers=num_layers, padding_idx=padding_idx,
                         max_length=max_length)
    kparams = prepare_kernel_params(params, heads)

    tgt_len = jnp.array([T, 5])
    src_len = jnp.array([S, 11])
    tgt_masks = (jnp.arange(T)[None, :] < tgt_len[:, None]).astype(jnp.float32)   # (B,T)
    src_masks = (jnp.arange(S)[None, :] < src_len[:, None]).astype(jnp.float32)   # (B,S)
    tgt_tokens = jax.random.randint(kt, (B, T), 1, vocab)
    tgt_sents = jnp.where(tgt_masks > 0, tgt_tokens, padding_idx).astype(jnp.int32)
    src_enc = 0.1 * jax.random.normal(ks, (B, S, D), dtype=jnp.float32)

    fwd = jax.jit(functools.partial(transformer_core_forward,
                                    heads=heads, padding_idx=padding_idx))
    mu, logvar = fwd(kparams, tgt_sents, tgt_masks, src_enc, src_masks)
    jax.block_until_ready((mu, logvar))

    assert mu.shape == (B, T, D) and logvar.shape == (B, T, D)
    assert bool(jnp.all(jnp.isfinite(mu))) and bool(jnp.all(jnp.isfinite(logvar)))
    print("KERNEL_OK")
</pallas_src>

<mosaic_0001>
module attributes {stable_mosaic.version = 11 : i64} {
  func.func @_matmul_bias_kernel(%arg0: i32, %arg1: i32, %arg2: i32, %arg3: memref<32x128xf32, #tpu.memory_space<vmem>>, %arg4: memref<128x128xbf16, #tpu.memory_space<vmem>>, %arg5: memref<1x128xf32, #tpu.memory_space<vmem>>, %arg6: memref<32x128xbf16, #tpu.memory_space<vmem>>, %arg7: memref<32x128xf32, #tpu.memory_space<vmem>>) attributes {dimension_semantics = [#tpu.dimension_semantics<parallel>, #tpu.dimension_semantics<parallel>, #tpu.dimension_semantics<arbitrary>], iteration_bounds = array<i64: 1, 3, 1>, scalar_prefetch = 0 : i64, scratch_operands = 1 : i64, tpu.core_type = #tpu.core_type<tc>, window_params = [{transform_indices = @transform_0, window_bounds = array<i64: 32, 128>}, {transform_indices = @transform_1, window_bounds = array<i64: 128, 128>}, {transform_indices = @transform_2, window_bounds = array<i64: 1, 128>}, {transform_indices = @transform_3, window_bounds = array<i64: 32, 128>}]} {
    %c0_i32 = arith.constant 0 : i32
    %0 = arith.cmpi eq, %arg2, %c0_i32 : i32
    %1 = arith.extui %0 : i1 to i32
    %c0_i32_0 = arith.constant 0 : i32
    %2 = arith.cmpi ne, %1, %c0_i32_0 : i32
    scf.if %2 {
      %cst_10 = arith.constant 0.000000e+00 : f32
      %13 = vector.broadcast %cst_10 : f32 to vector<32x128xf32>
      %c0_11 = arith.constant 0 : index
      %c0_12 = arith.constant 0 : index
      %14 = vector.load %arg7[%c0_11, %c0_12] : memref<32x128xf32, #tpu.memory_space<vmem>>, vector<32x128xf32>
      tpu.vector_store %arg7[%c0_11, %c0_12], %13 {strides = array<i32>} : memref<32x128xf32, #tpu.memory_space<vmem>>, vector<32x128xf32>,
    } else {
    }
    %c0 = arith.constant 0 : index
    %c0_1 = arith.constant 0 : index
    %3 = vector.load %arg7[%c0, %c0_1] : memref<32x128xf32, #tpu.memory_space<vmem>>, vector<32x128xf32>
    %c0_2 = arith.constant 0 : index
    %c0_3 = arith.constant 0 : index
    %4 = vector.load %arg3[%c0_2, %c0_3] : memref<32x128xf32, #tpu.memory_space<vmem>>, vector<32x128xf32>
    %5 = arith.truncf %4 : vector<32x128xf32> to vector<32x128xbf16>
    %c0_4 = arith.constant 0 : index
    %c0_5 = arith.constant 0 : index
    %6 = vector.load %arg4[%c0_4, %c0_5] : memref<128x128xbf16, #tpu.memory_space<vmem>>, vector<128x128xbf16>
    %cst = arith.constant dense<0.000000e+00> : vector<32x128xf32>
    %7 = tpu.matmul %5, %6, %cst {dimension_numbers = #tpu.dot_dimension_numbers<[1], [0], [0], [1], [0, 0, 1, 1], [], []>} : vector<32x128xbf16>, vector<128x128xbf16>, vector<32x128xf32> -> vector<32x128xf32>
    %8 = arith.addf %3, %7 : vector<32x128xf32>
    %c0_6 = arith.constant 0 : index
    %c0_7 = arith.constant 0 : index
    %9 = vector.load %arg7[%c0_6, %c0_7] : memref<32x128xf32, #tpu.memory_space<vmem>>, vector<32x128xf32>
    tpu.vector_store %arg7[%c0_6, %c0_7], %8 {strides = array<i32>} : memref<32x128xf32, #tpu.memory_space<vmem>>, vector<32x128xf32>,
    %c0_i32_8 = arith.constant 0 : i32
    %10 = arith.cmpi eq, %arg2, %c0_i32_8 : i32
    %11 = arith.extui %10 : i1 to i32
    %c0_i32_9 = arith.constant 0 : i32
    %12 = arith.cmpi ne, %11, %c0_i32_9 : i32
    scf.if %12 {
      %c0_10 = arith.constant 0 : index
      %c0_11 = arith.constant 0 : index
      %13 = vector.load %arg7[%c0_10, %c0_11] : memref<32x128xf32, #tpu.memory_space<vmem>>, vector<32x128xf32>
      %c0_12 = arith.constant 0 : index
      %c0_13 = arith.constant 0 : index
      %14 = vector.load %arg5[%c0_12, %c0_13] : memref<1x128xf32, #tpu.memory_space<vmem>>, vector<1x128xf32>
      %15 = vector.broadcast %14 : vector<1x128xf32> to vector<32x128xf32>
      %16 = arith.addf %13, %15 : vector<32x128xf32>
      %17 = arith.truncf %16 : vector<32x128xf32> to vector<32x128xbf16>
      %c0_14 = arith.constant 0 : index
      %c0_15 = arith.constant 0 : index
      %18 = vector.load %arg6[%c0_14, %c0_15] : memref<32x128xbf16, #tpu.memory_space<vmem>>, vector<32x128xbf16>
      tpu.vector_store %arg6[%c0_14, %c0_15], %17 {strides = array<i32>} : memref<32x128xbf16, #tpu.memory_space<vmem>>, vector<32x128xbf16>,
    } else {
    }
    return
  }
  func.func @transform_0(%arg0: i32, %arg1: i32, %arg2: i32) -> (i32, i32) {
    %c0_i32 = arith.constant 0 : i32
    return %arg0, %arg2 : i32, i32
  }
  func.func @transform_1(%arg0: i32, %arg1: i32, %arg2: i32) -> (i32, i32) {
    %c0_i32 = arith.constant 0 : i32
    return %arg2, %arg1 : i32, i32
  }
  func.func @transform_2(%arg0: i32, %arg1: i32, %arg2: i32) -> (i32, i32) {
    %c0_i32 = arith.constant 0 : i32
    %c0_i32_0 = arith.constant 0 : i32
    return %c0_i32, %arg1 : i32, i32
  }
  func.func @transform_3(%arg0: i32, %arg1: i32, %arg2: i32) -> (i32, i32) {
    %c0_i32 = arith.constant 0 : i32
    return %arg0, %arg1 : i32, i32
  }
}

module attributes {stable_mosaic.version = 11 : i64} {
  func.func @_linear_ln_res_kernel(%arg0: i32, %arg1: i32, %arg2: memref<32x128xbf16, #tpu.memory_space<vmem>>, %arg3: memref<128x128xbf16, #tpu.memory_space<vmem>>, %arg4: memref<1x128xf32, #tpu.memory_space<vmem>>, %arg5: memref<32x128xf32, #tpu.memory_space<vmem>>, %arg6: memref<1x128xf32, #tpu.memory_space<vmem>>, %arg7: memref<1x128xf32, #tpu.memory_space<vmem>>, %arg8: memref<32x128xf32, #tpu.memory_space<vmem>>, %arg9: memref<32x128xf32, #tpu.memory_space<vmem>>) attributes {dimension_semantics = [#tpu.dimension_semantics<parallel>, #tpu.dimension_semantics<arbitrary>], iteration_bounds = array<i64: 1, 1>, scalar_prefetch = 0 : i64, scratch_operands = 1 : i64, tpu.core_type = #tpu.core_type<tc>, window_params = [{transform_indices = @transform_0, window_bounds = array<i64: 32, 128>}, {transform_indices = @transform_1, window_bounds = array<i64: 128, 128>}, {pipeline_mode = #tpu.pipeline_mode<synchronous>, transform_indices = @transform_2, window_bounds = array<i64: 1, 128>}, {transform_indices = @transform_3, window_bounds = array<i64: 32, 128>}, {pipeline_mode = #tpu.pipeline_mode<synchronous>, transform_indices = @transform_4, window_bounds = array<i64: 1, 128>}, {pipeline_mode = #tpu.pipeline_mode<synchronous>, transform_indices = @transform_5, window_bounds = array<i64: 1, 128>}, {transform_indices = @transform_6, window_bounds = array<i64: 32, 128>}]} {
    %c0_i32 = arith.constant 0 : i32
    %0 = arith.cmpi eq, %arg1, %c0_i32 : i32
    %1 = arith.extui %0 : i1 to i32
    %c0_i32_0 = arith.constant 0 : i32
    %2 = arith.cmpi ne, %1, %c0_i32_0 : i32
    scf.if %2 {
      %cst_10 = arith.constant 0.000000e+00 : f32
      %12 = vector.broadcast %cst_10 : f32 to vector<32x128xf32>
      %c0_11 = arith.constant 0 : index
      %c0_12 = arith.constant 0 : index
      %13 = vector.load %arg9[%c0_11, %c0_12] : memref<32x128xf32, #tpu.memory_space<vmem>>, vector<32x128xf32>
      tpu.vector_store %arg9[%c0_11, %c0_12], %12 {strides = array<i32>} : memref<32x128xf32, #tpu.memory_space<vmem>>, vector<32x128xf32>,
    } else {
    }
    %c0 = arith.constant 0 : index
    %c0_1 = arith.constant 0 : index
    %3 = vector.load %arg9[%c0, %c0_1] : memref<32x128xf32, #tpu.memory_space<vmem>>, vector<32x128xf32>
    %c0_2 = arith.constant 0 : index
    %c0_3 = arith.constant 0 : index
    %4 = vector.load %arg2[%c0_2, %c0_3] : memref<32x128xbf16, #tpu.memory_space<vmem>>, vector<32x128xbf16>
    %c0_4 = arith.constant 0 : index
    %c0_5 = arith.constant 0 : index
    %5 = vector.load %arg3[%c0_4, %c0_5] : memref<128x128xbf16, #tpu.memory_space<vmem>>, vector<128x128xbf16>
    %cst = arith.constant dense<0.000000e+00> : vector<32x128xf32>
    %6 = tpu.matmul %4, %5, %cst {dimension_numbers = #tpu.dot_dimension_numbers<[1], [0], [0], [1], [0, 0, 1, 1], [], []>} : vector<32x128xbf16>, vector<128x128xbf16>, vector<32x128xf32> -> vector<32x128xf32>
    %7 = arith.addf %3, %6 : vector<32x128xf32>
    %c0_6 = arith.constant 0 : index
    %c0_7 = arith.constant 0 : index
    %8 = vector.load %arg9[%c0_6, %c0_7] : memref<32x128xf32, #tpu.memory_space<vmem>>, vector<32x128xf32>
    tpu.vector_store %arg9[%c0_6, %c0_7], %7 {strides = array<i32>} : memref<32x128xf32, #tpu.memory_space<vmem>>, vector<32x128xf32>,
    %c0_i32_8 = arith.constant 0 : i32
    %9 = arith.cmpi eq, %arg1, %c0_i32_8 : i32
    %10 = arith.extui %9 : i1 to i32
    %c0_i32_9 = arith.constant 0 : i32
    %11 = arith.cmpi ne, %10, %c0_i32_9 : i32
    scf.if %11 {
      %c0_10 = arith.constant 0 : index
      %c0_11 = arith.constant 0 : index
      %12 = vector.load %arg9[%c0_10, %c0_11] : memref<32x128xf32, #tpu.memory_space<vmem>>, vector<32x128xf32>
      %c0_12 = arith.constant 0 : index
      %c0_13 = arith.constant 0 : index
      %13 = vector.load %arg4[%c0_12, %c0_13] : memref<1x128xf32, #tpu.memory_space<vmem>>, vector<1x128xf32>
      %14 = vector.broadcast %13 : vector<1x128xf32> to vector<32x128xf32>
      %15 = arith.addf %12, %14 : vector<32x128xf32>
      %c0_14 = arith.constant 0 : index
      %c0_15 = arith.constant 0 : index
      %16 = vector.load %arg5[%c0_14, %c0_15] : memref<32x128xf32, #tpu.memory_space<vmem>>, vector<32x128xf32>
      %17 = arith.addf %15, %16 : vector<32x128xf32>
      %cst_16 = arith.constant dense<0.000000e+00> : vector<32xf32>
      %18 = vector.multi_reduction <add>, %17, %cst_16 [1] : vector<32x128xf32> to vector<32xf32>
      %19 = vector.shape_cast %18 : vector<32xf32> to vector<32x1xf32>
      %cst_17 = arith.constant 1.280000e+02 : f32
      %20 = vector.broadcast %cst_17 : f32 to vector<32x1xf32>
      %21 = arith.divf %19, %20 : vector<32x1xf32>
      %22 = vector.broadcast %21 : vector<32x1xf32> to vector<32x128xf32>
      %23 = arith.subf %17, %22 : vector<32x128xf32>
      %24 = arith.mulf %23, %23 : vector<32x128xf32>
      %cst_18 = arith.constant dense<0.000000e+00> : vector<32xf32>
      %25 = vector.multi_reduction <add>, %24, %cst_18 [1] : vector<32x128xf32> to vector<32xf32>
      %26 = vector.shape_cast %25 : vector<32xf32> to vector<32x1xf32>
      %cst_19 = arith.constant 1.280000e+02 : f32
      %27 = vector.broadcast %cst_19 : f32 to vector<32x1xf32>
      %28 = arith.divf %26, %27 : vector<32x1xf32>
      %29 = vector.broadcast %21 : vector<32x1xf32> to vector<32x128xf32>
      %30 = arith.subf %17, %29 : vector<32x128xf32>
      %cst_20 = arith.constant 9.99999974E-6 : f32
      %31 = vector.broadcast %cst_20 : f32 to vector<32x1xf32>
      %32 = arith.addf %28, %31 : vector<32x1xf32>
      %33 = math.rsqrt %32 : vector<32x1xf32>
      %34 = vector.broadcast %33 : vector<32x1xf32> to vector<32x128xf32>
      %35 = arith.mulf %30, %34 : vector<32x128xf32>
      %c0_21 = arith.constant 0 : index
      %c0_22 = arith.constant 0 : index
      %36 = vector.load %arg6[%c0_21, %c0_22] : memref<1x128xf32, #tpu.memory_space<vmem>>, vector<1x128xf32>
      %37 = vector.broadcast %36 : vector<1x128xf32> to vector<32x128xf32>
      %38 = arith.mulf %35, %37 : vector<32x128xf32>
      %c0_23 = arith.constant 0 : index
      %c0_24 = arith.constant 0 : index
      %39 = vector.load %arg7[%c0_23, %c0_24] : memref<1x128xf32, #tpu.memory_space<vmem>>, vector<1x128xf32>
      %40 = vector.broadcast %39 : vector<1x128xf32> to vector<32x128xf32>
      %41 = arith.addf %38, %40 : vector<32x128xf32>
      %c0_25 = arith.constant 0 : index
      %c0_26 = arith.constant 0 : index
      %42 = vector.load %arg8[%c0_25, %c0_26] : memref<32x128xf32, #tpu.memory_space<vmem>>, vector<32x128xf32>
      tpu.vector_store %arg8[%c0_25, %c0_26], %41 {strides = array<i32>} : memref<32x128xf32, #tpu.memory_space<vmem>>, vector<32x128xf32>,
    } else {
    }
    return
  }
  func.func @transform_0(%arg0: i32, %arg1: i32) -> (i32, i32) {
    %c0_i32 = arith.constant 0 : i32
    return %arg0, %arg1 : i32, i32
  }
  func.func @transform_1(%arg0: i32, %arg1: i32) -> (i32, i32) {
    %c0_i32 = arith.constant 0 : i32
    %c0_i32_0 = arith.constant 0 : i32
    return %arg1, %c0_i32 : i32, i32
  }
  func.func @transform_2(%arg0: i32, %arg1: i32) -> (i32, i32) {
    %c0_i32 = arith.constant 0 : i32
    %c0_i32_0 = arith.constant 0 : i32
    %c0_i32_1 = arith.constant 0 : i32
    return %c0_i32, %c0_i32_0 : i32, i32
  }
  func.func @transform_3(%arg0: i32, %arg1: i32) -> (i32, i32) {
    %c0_i32 = arith.constant 0 : i32
    %c0_i32_0 = arith.constant 0 : i32
    return %arg0, %c0_i32 : i32, i32
  }
  func.func @transform_4(%arg0: i32, %arg1: i32) -> (i32, i32) {
    %c0_i32 = arith.constant 0 : i32
    %c0_i32_0 = arith.constant 0 : i32
    %c0_i32_1 = arith.constant 0 : i32
    return %c0_i32, %c0_i32_0 : i32, i32
  }
  func.func @transform_5(%arg0: i32, %arg1: i32) -> (i32, i32) {
    %c0_i32 = arith.constant 0 : i32
    %c0_i32_0 = arith.constant 0 : i32
    %c0_i32_1 = arith.constant 0 : i32
    return %c0_i32, %c0_i32_0 : i32, i32
  }
  func.func @transform_6(%arg0: i32, %arg1: i32) -> (i32, i32) {
    %c0_i32 = arith.constant 0 : i32
    %c0_i32_0 = arith.constant 0 : i32
    return %arg0, %c0_i32 : i32, i32
  }
}

module attributes {stable_mosaic.version = 11 : i64} {
  func.func @_matmul_bias_kernel(%arg0: i32, %arg1: i32, %arg2: i32, %arg3: memref<32x128xf32, #tpu.memory_space<vmem>>, %arg4: memref<128x128xbf16, #tpu.memory_space<vmem>>, %arg5: memref<1x128xf32, #tpu.memory_space<vmem>>, %arg6: memref<32x128xbf16, #tpu.memory_space<vmem>>, %arg7: memref<32x128xf32, #tpu.memory_space<vmem>>) attributes {dimension_semantics = [#tpu.dimension_semantics<parallel>, #tpu.dimension_semantics<parallel>, #tpu.dimension_semantics<arbitrary>], iteration_bounds = array<i64: 1, 1, 1>, scalar_prefetch = 0 : i64, scratch_operands = 1 : i64, tpu.core_type = #tpu.core_type<tc>, window_params = [{transform_indices = @transform_0, window_bounds = array<i64: 32, 128>}, {transform_indices = @transform_1, window_bounds = array<i64: 128, 128>}, {transform_indices = @transform_2, window_bounds = array<i64: 1, 128>}, {transform_indices = @transform_3, window_bounds = array<i64: 32, 128>}]} {
    %c0_i32 = arith.constant 0 : i32
    %0 = arith.cmpi eq, %arg2, %c0_i32 : i32
    %1 = arith.extui %0 : i1 to i32
    %c0_i32_0 = arith.constant 0 : i32
    %2 = arith.cmpi ne, %1, %c0_i32_0 : i32
    scf.if %2 {
      %cst_10 = arith.constant 0.000000e+00 : f32
      %13 = vector.broadcast %cst_10 : f32 to vector<32x128xf32>
      %c0_11 = arith.constant 0 : index
      %c0_12 = arith.constant 0 : index
      %14 = vector.load %arg7[%c0_11, %c0_12] : memref<32x128xf32, #tpu.memory_space<vmem>>, vector<32x128xf32>
      tpu.vector_store %arg7[%c0_11, %c0_12], %13 {strides = array<i32>} : memref<32x128xf32, #tpu.memory_space<vmem>>, vector<32x128xf32>,
    } else {
    }
    %c0 = arith.constant 0 : index
    %c0_1 = arith.constant 0 : index
    %3 = vector.load %arg7[%c0, %c0_1] : memref<32x128xf32, #tpu.memory_space<vmem>>, vector<32x128xf32>
    %c0_2 = arith.constant 0 : index
    %c0_3 = arith.constant 0 : index
    %4 = vector.load %arg3[%c0_2, %c0_3] : memref<32x128xf32, #tpu.memory_space<vmem>>, vector<32x128xf32>
    %5 = arith.truncf %4 : vector<32x128xf32> to vector<32x128xbf16>
    %c0_4 = arith.constant 0 : index
    %c0_5 = arith.constant 0 : index
    %6 = vector.load %arg4[%c0_4, %c0_5] : memref<128x128xbf16, #tpu.memory_space<vmem>>, vector<128x128xbf16>
    %cst = arith.constant dense<0.000000e+00> : vector<32x128xf32>
    %7 = tpu.matmul %5, %6, %cst {dimension_numbers = #tpu.dot_dimension_numbers<[1], [0], [0], [1], [0, 0, 1, 1], [], []>} : vector<32x128xbf16>, vector<128x128xbf16>, vector<32x128xf32> -> vector<32x128xf32>
    %8 = arith.addf %3, %7 : vector<32x128xf32>
    %c0_6 = arith.constant 0 : index
    %c0_7 = arith.constant 0 : index
    %9 = vector.load %arg7[%c0_6, %c0_7] : memref<32x128xf32, #tpu.memory_space<vmem>>, vector<32x128xf32>
    tpu.vector_store %arg7[%c0_6, %c0_7], %8 {strides = array<i32>} : memref<32x128xf32, #tpu.memory_space<vmem>>, vector<32x128xf32>,
    %c0_i32_8 = arith.constant 0 : i32
    %10 = arith.cmpi eq, %arg2, %c0_i32_8 : i32
    %11 = arith.extui %10 : i1 to i32
    %c0_i32_9 = arith.constant 0 : i32
    %12 = arith.cmpi ne, %11, %c0_i32_9 : i32
    scf.if %12 {
      %c0_10 = arith.constant 0 : index
      %c0_11 = arith.constant 0 : index
      %13 = vector.load %arg7[%c0_10, %c0_11] : memref<32x128xf32, #tpu.memory_space<vmem>>, vector<32x128xf32>
      %c0_12 = arith.constant 0 : index
      %c0_13 = arith.constant 0 : index
      %14 = vector.load %arg5[%c0_12, %c0_13] : memref<1x128xf32, #tpu.memory_space<vmem>>, vector<1x128xf32>
      %15 = vector.broadcast %14 : vector<1x128xf32> to vector<32x128xf32>
      %16 = arith.addf %13, %15 : vector<32x128xf32>
      %17 = arith.truncf %16 : vector<32x128xf32> to vector<32x128xbf16>
      %c0_14 = arith.constant 0 : index
      %c0_15 = arith.constant 0 : index
      %18 = vector.load %arg6[%c0_14, %c0_15] : memref<32x128xbf16, #tpu.memory_space<vmem>>, vector<32x128xbf16>
      tpu.vector_store %arg6[%c0_14, %c0_15], %17 {strides = array<i32>} : memref<32x128xbf16, #tpu.memory_space<vmem>>, vector<32x128xbf16>,
    } else {
    }
    return
  }
  func.func @transform_0(%arg0: i32, %arg1: i32, %arg2: i32) -> (i32, i32) {
    %c0_i32 = arith.constant 0 : i32
    return %arg0, %arg2 : i32, i32
  }
  func.func @transform_1(%arg0: i32, %arg1: i32, %arg2: i32) -> (i32, i32) {
    %c0_i32 = arith.constant 0 : i32
    return %arg2, %arg1 : i32, i32
  }
  func.func @transform_2(%arg0: i32, %arg1: i32, %arg2: i32) -> (i32, i32) {
    %c0_i32 = arith.constant 0 : i32
    %c0_i32_0 = arith.constant 0 : i32
    return %c0_i32, %arg1 : i32, i32
  }
  func.func @transform_3(%arg0: i32, %arg1: i32, %arg2: i32) -> (i32, i32) {
    %c0_i32 = arith.constant 0 : i32
    return %arg0, %arg1 : i32, i32
  }
}

module attributes {stable_mosaic.version = 11 : i64} {
  func.func @_flash_attn_kernel(%arg0: i32, %arg1: i32, %arg2: i32, %arg3: memref<1x16x128xbf16, #tpu.memory_space<vmem>>, %arg4: memref<1x16x128xbf16, #tpu.memory_space<vmem>>, %arg5: memref<1x16x128xbf16, #tpu.memory_space<vmem>>, %arg6: memref<1x1x16xf32, #tpu.memory_space<vmem>>, %arg7: memref<1x16x128xbf16, #tpu.memory_space<vmem>>, %arg8: memref<16x4xf32, #tpu.memory_space<vmem>>, %arg9: memref<16x4xf32, #tpu.memory_space<vmem>>, %arg10: memref<16x128xf32, #tpu.memory_space<vmem>>) attributes {dimension_semantics = [#tpu.dimension_semantics<parallel>, #tpu.dimension_semantics<parallel>, #tpu.dimension_semantics<arbitrary>], iteration_bounds = array<i64: 2, 1, 1>, scalar_prefetch = 0 : i64, scratch_operands = 3 : i64, tpu.core_type = #tpu.core_type<tc>, window_params = [{transform_indices = @transform_0, window_bounds = array<i64: 1, 16, 128>}, {transform_indices = @transform_1, window_bounds = array<i64: 1, 16, 128>}, {transform_indices = @transform_2, window_bounds = array<i64: 1, 16, 128>}, {transform_indices = @transform_3, window_bounds = array<i64: 1, 1, 16>}, {transform_indices = @transform_4, window_bounds = array<i64: 1, 16, 128>}]} {
    %c0_i32 = arith.constant 0 : i32
    %0 = arith.cmpi eq, %arg2, %c0_i32 : i32
    %1 = arith.extui %0 : i1 to i32
    %c0_i32_0 = arith.constant 0 : i32
    %2 = arith.cmpi ne, %1, %c0_i32_0 : i32
    scf.if %2 {
      %cst_98 = arith.constant -1.000000e+30 : f32
      %136 = vector.broadcast %cst_98 : f32 to vector<16x4xf32>
      %c0_99 = arith.constant 0 : index
      %c0_100 = arith.constant 0 : index
      %137 = vector.load %arg8[%c0_99, %c0_100] : memref<16x4xf32, #tpu.memory_space<vmem>>, vector<16x4xf32>
      tpu.vector_store %arg8[%c0_99, %c0_100], %136 {strides = array<i32>} : memref<16x4xf32, #tpu.memory_space<vmem>>, vector<16x4xf32>,
      %cst_101 = arith.constant 0.000000e+00 : f32
      %138 = vector.broadcast %cst_101 : f32 to vector<16x4xf32>
      %c0_102 = arith.constant 0 : index
      %c0_103 = arith.constant 0 : index
      %139 = vector.load %arg9[%c0_102, %c0_103] : memref<16x4xf32, #tpu.memory_space<vmem>>, vector<16x4xf32>
      tpu.vector_store %arg9[%c0_102, %c0_103], %138 {strides = array<i32>} : memref<16x4xf32, #tpu.memory_space<vmem>>, vector<16x4xf32>,
      %cst_104 = arith.constant 0.000000e+00 : f32
      %140 = vector.broadcast %cst_104 : f32 to vector<16x128xf32>
      %c0_105 = arith.constant 0 : index
      %c0_106 = arith.constant 0 : index
      %141 = vector.load %arg10[%c0_105, %c0_106] : memref<16x128xf32, #tpu.memory_space<vmem>>, vector<16x128xf32>
      tpu.vector_store %arg10[%c0_105, %c0_106], %140 {strides = array<i32>} : memref<16x128xf32, #tpu.memory_space<vmem>>, vector<16x128xf32>,
    } else {
    }
    %c0 = arith.constant 0 : index
    %c0_1 = arith.constant 0 : index
    %c0_2 = arith.constant 0 : index
    %3 = vector.load %arg6[%c0, %c0_1, %c0_2] : memref<1x1x16xf32, #tpu.memory_space<vmem>>, vector<1x1x16xf32>
    %4 = vector.shape_cast %3 : vector<1x1x16xf32> to vector<1x16xf32>
    %c0_3 = arith.constant 0 : index
    %c0_4 = arith.constant 0 : index
    %c0_5 = arith.constant 0 : index
    %5 = vector.load %arg3[%c0_3, %c0_4, %c0_5] : memref<1x16x128xbf16, #tpu.memory_space<vmem>>, vector<1x16x32xbf16>
    %6 = vector.shape_cast %5 : vector<1x16x32xbf16> to vector<16x32xbf16>
    %c0_6 = arith.constant 0 : index
    %c0_7 = arith.constant 0 : index
    %c0_8 = arith.constant 0 : index
    %7 = vector.load %arg4[%c0_6, %c0_7, %c0_8] : memref<1x16x128xbf16, #tpu.memory_space<vmem>>, vector<1x16x32xbf16>
    %8 = vector.shape_cast %7 : vector<1x16x32xbf16> to vector<16x32xbf16>
    %c0_9 = arith.constant 0 : index
    %c0_10 = arith.constant 0 : index
    %c0_11 = arith.constant 0 : index
    %9 = vector.load %arg5[%c0_9, %c0_10, %c0_11] : memref<1x16x128xbf16, #tpu.memory_space<vmem>>, vector<1x16x32xbf16>
    %10 = vector.shape_cast %9 : vector<1x16x32xbf16> to vector<16x32xbf16>
    %cst = arith.constant dense<0.000000e+00> : vector<16x16xf32>
    %11 = tpu.matmul %6, %8, %cst {dimension_numbers = #tpu.dot_dimension_numbers<[1], [1], [0], [0], [0, 0, 1, 0], [], []>} : vector<16x32xbf16>, vector<16x32xbf16>, vector<16x16xf32> -> vector<16x16xf32>
    %12 = vector.broadcast %4 : vector<1x16xf32> to vector<16x16xf32>
    %13 = arith.addf %11, %12 : vector<16x16xf32>
    %c0_12 = arith.constant 0 : index
    %c0_13 = arith.constant 0 : index
    %14 = vector.load %arg8[%c0_12, %c0_13] : memref<16x4xf32, #tpu.memory_space<vmem>>, vector<16x1xf32>
    %cst_14 = arith.constant dense<0xFF800000> : vector<16xf32>
    %15 = vector.multi_reduction <maximumf>, %13, %cst_14 [1] : vector<16x16xf32> to vector<16xf32>
    %16 = vector.shape_cast %15 : vector<16xf32> to vector<16x1xf32>
    %17 = arith.maximumf %14, %16 : vector<16x1xf32>
    %18 = arith.subf %14, %17 : vector<16x1xf32>
    %19 = math.exp %18 : vector<16x1xf32>
    %20 = vector.broadcast %17 : vector<16x1xf32> to vector<16x16xf32>
    %21 = arith.subf %13, %20 : vector<16x16xf32>
    %22 = math.exp %21 : vector<16x16xf32>
    %c0_15 = arith.constant 0 : index
    %c0_16 = arith.constant 0 : index
    %23 = vector.load %arg9[%c0_15, %c0_16] : memref<16x4xf32, #tpu.memory_space<vmem>>, vector<16x1xf32>
    %24 = arith.mulf %19, %23 : vector<16x1xf32>
    %cst_17 = arith.constant dense<0.000000e+00> : vector<16xf32>
    %25 = vector.multi_reduction <add>, %22, %cst_17 [1] : vector<16x16xf32> to vector<16xf32>
    %26 = vector.shape_cast %25 : vector<16xf32> to vector<16x1xf32>
    %27 = arith.addf %24, %26 : vector<16x1xf32>
    %c0_18 = arith.constant 0 : index
    %c0_19 = arith.constant 0 : index
    %28 = vector.load %arg9[%c0_18, %c0_19] : memref<16x4xf32, #tpu.memory_space<vmem>>, vector<16x1xf32>
    tpu.vector_store %arg9[%c0_18, %c0_19], %27 {strides = array<i32>} : memref<16x4xf32, #tpu.memory_space<vmem>>, vector<16x1xf32>,
    %c0_20 = arith.constant 0 : index
    %c0_21 = arith.constant 0 : index
    %29 = vector.load %arg10[%c0_20, %c0_21] : memref<16x128xf32, #tpu.memory_space<vmem>>, vector<16x32xf32>
    %30 = vector.broadcast %19 : vector<16x1xf32> to vector<16x32xf32>
    %31 = arith.mulf %30, %29 : vector<16x32xf32>
    %32 = arith.truncf %22 : vector<16x16xf32> to vector<16x16xbf16>
    %cst_22 = arith.constant dense<0.000000e+00> : vector<16x32xf32>
    %33 = tpu.matmul %32, %10, %cst_22 {dimension_numbers = #tpu.dot_dimension_numbers<[1], [0], [0], [1], [0, 0, 1, 1], [], []>} : vector<16x16xbf16>, vector<16x32xbf16>, vector<16x32xf32> -> vector<16x32xf32>
    %34 = arith.addf %31, %33 : vector<16x32xf32>
    %c0_23 = arith.constant 0 : index
    %c0_24 = arith.constant 0 : index
    %35 = vector.load %arg10[%c0_23, %c0_24] : memref<16x128xf32, #tpu.memory_space<vmem>>, vector<16x32xf32>
    tpu.vector_store %arg10[%c0_23, %c0_24], %34 {strides = array<i32>} : memref<16x128xf32, #tpu.memory_space<vmem>>, vector<16x32xf32>,
    %c0_25 = arith.constant 0 : index
    %c0_26 = arith.constant 0 : index
    %36 = vector.load %arg8[%c0_25, %c0_26] : memref<16x4xf32, #tpu.memory_space<vmem>>, vector<16x1xf32>
    tpu.vector_store %arg8[%c0_25, %c0_26], %17 {strides = array<i32>} : memref<16x4xf32, #tpu.memory_space<vmem>>, vector<16x1xf32>,
    %c0_27 = arith.constant 0 : index
    %c0_28 = arith.constant 0 : index
    %c32 = arith.constant 32 : index
    %37 = vector.load %arg3[%c0_27, %c0_28, %c32] : memref<1x16x128xbf16, #tpu.memory_space<vmem>>, vector<1x16x32xbf16>
    %38 = vector.shape_cast %37 : vector<1x16x32xbf16> to vector<16x32xbf16>
    %c0_29 = arith.constant 0 : index
    %c0_30 = arith.constant 0 : index
    %c32_31 = arith.constant 32 : index
    %39 = vector.load %arg4[%c0_29, %c0_30, %c32_31] : memref<1x16x128xbf16, #tpu.memory_space<vmem>>, vector<1x16x32xbf16>
    %40 = vector.shape_cast %39 : vector<1x16x32xbf16> to vector<16x32xbf16>
    %c0_32 = arith.constant 0 : index
    %c0_33 = arith.constant 0 : index
    %c32_34 = arith.constant 32 : index
    %41 = vector.load %arg5[%c0_32, %c0_33, %c32_34] : memref<1x16x128xbf16, #tpu.memory_space<vmem>>, vector<1x16x32xbf16>
    %42 = vector.shape_cast %41 : vector<1x16x32xbf16> to vector<16x32xbf16>
    %cst_35 = arith.constant dense<0.000000e+00> : vector<16x16xf32>
    %43 = tpu.matmul %38, %40, %cst_35 {dimension_numbers = #tpu.dot_dimension_numbers<[1], [1], [0], [0], [0, 0, 1, 0], [], []>} : vector<16x32xbf16>, vector<16x32xbf16>, vector<16x16xf32> -> vector<16x16xf32>
    %44 = vector.broadcast %4 : vector<1x16xf32> to vector<16x16xf32>
    %45 = arith.addf %43, %44 : vector<16x16xf32>
    %c0_36 = arith.constant 0 : index
    %c1 = arith.constant 1 : index
    %46 = vector.load %arg8[%c0_36, %c1] : memref<16x4xf32, #tpu.memory_space<vmem>>, vector<16x1xf32>
    %cst_37 = arith.constant dense<0xFF800000> : vector<16xf32>
    %47 = vector.multi_reduction <maximumf>, %45, %cst_37 [1] : vector<16x16xf32> to vector<16xf32>
    %48 = vector.shape_cast %47 : vector<16xf32> to vector<16x1xf32>
    %49 = arith.maximumf %46, %48 : vector<16x1xf32>
    %50 = arith.subf %46, %49 : vector<16x1xf32>
    %51 = math.exp %50 : vector<16x1xf32>
    %52 = vector.broadcast %49 : vector<16x1xf32> to vector<16x16xf32>
    %53 = arith.subf %45, %52 : vector<16x16xf32>
    %54 = math.exp %53 : vector<16x16xf32>
    %c0_38 = arith.constant 0 : index
    %c1_39 = arith.constant 1 : index
    %55 = vector.load %arg9[%c0_38, %c1_39] : memref<16x4xf32, #tpu.memory_space<vmem>>, vector<16x1xf32>
    %56 = arith.mulf %51, %55 : vector<16x1xf32>
    %cst_40 = arith.constant dense<0.000000e+00> : vector<16xf32>
    %57 = vector.multi_reduction <add>, %54, %cst_40 [1] : vector<16x16xf32> to vector<16xf32>
    %58 = vector.shape_cast %57 : vector<16xf32> to vector<16x1xf32>
    %59 = arith.addf %56, %58 : vector<16x1xf32>
    %c0_41 = arith.constant 0 : index
    %c1_42 = arith.constant 1 : index
    %60 = vector.load %arg9[%c0_41, %c1_42] : memref<16x4xf32, #tpu.memory_space<vmem>>, vector<16x1xf32>
    tpu.vector_store %arg9[%c0_41, %c1_42], %59 {strides = array<i32>} : memref<16x4xf32, #tpu.memory_space<vmem>>, vector<16x1xf32>,
    %c0_43 = arith.constant 0 : index
    %c32_44 = arith.constant 32 : index
    %61 = vector.load %arg10[%c0_43, %c32_44] : memref<16x128xf32, #tpu.memory_space<vmem>>, vector<16x32xf32>
    %62 = vector.broadcast %51 : vector<16x1xf32> to vector<16x32xf32>
    %63 = arith.mulf %62, %61 : vector<16x32xf32>
    %64 = arith.truncf %54 : vector<16x16xf32> to vector<16x16xbf16>
    %cst_45 = arith.constant dense<0.000000e+00> : vector<16x32xf32>
    %65 = tpu.matmul %64, %42, %cst_45 {dimension_numbers = #tpu.dot_dimension_numbers<[1], [0], [0], [1], [0, 0, 1, 1], [], []>} : vector<16x16xbf16>, vector<16x32xbf16>, vector<16x32xf32> -> vector<16x32xf32>
    %66 = arith.addf %63, %65 : vector<16x32xf32>
    %c0_46 = arith.constant 0 : index
    %c32_47 = arith.constant 32 : index
    %67 = vector.load %arg10[%c0_46, %c32_47] : memref<16x128xf32, #tpu.memory_space<vmem>>, vector<16x32xf32>
    tpu.vector_store %arg10[%c0_46, %c32_47], %66 {strides = array<i32>} : memref<16x128xf32, #tpu.memory_space<vmem>>, vector<16x32xf32>,
    %c0_48 = arith.constant 0 : index
    %c1_49 = arith.constant 1 : index
    %68 = vector.load %arg8[%c0_48, %c1_49] : memref<16x4xf32, #tpu.memory_space<vmem>>, vector<16x1xf32>
    tpu.vector_store %arg8[%c0_48, %c1_49], %49 {strides = array<i32>} : memref<16x4xf32, #tpu.memory_space<vmem>>, vector<16x1xf32>,
    %c0_50 = arith.constant 0 : index
    %c0_51 = arith.constant 0 : index
    %c64 = arith.constant 64 : index
    %69 = vector.load %arg3[%c0_50, %c0_51, %c64] : memref<1x16x128xbf16, #tpu.memory_space<vmem>>, vector<1x16x32xbf16>
    %70 = vector.shape_cast %69 : vector<1x16x32xbf16> to vector<16x32xbf16>
    %c0_52 = arith.constant 0 : index
    %c0_53 = arith.constant 0 : index
    %c64_54 = arith.constant 64 : index
    %71 = vector.load %arg4[%c0_52, %c0_53, %c64_54] : memref<1x16x128xbf16, #tpu.memory_space<vmem>>, vector<1x16x32xbf16>
    %72 = vector.shape_cast %71 : vector<1x16x32xbf16> to vector<16x32xbf16>
    %c0_55 = arith.constant 0 : index
    %c0_56 = arith.constant 0 : index
    %c64_57 = arith.constant 64 : index
    %73 = vector.load %arg5[%c0_55, %c0_56, %c64_57] : memref<1x16x128xbf16, #tpu.memory_space<vmem>>, vector<1x16x32xbf16>
    %74 = vector.shape_cast %73 : vector<1x16x32xbf16> to vector<16x32xbf16>
    %cst_58 = arith.constant dense<0.000000e+00> : vector<16x16xf32>
    %75 = tpu.matmul %70, %72, %cst_58 {dimension_numbers = #tpu.dot_dimension_numbers<[1], [1], [0], [0], [0, 0, 1, 0], [], []>} : vector<16x32xbf16>, vector<16x32xbf16>, vector<16x16xf32> -> vector<16x16xf32>
    %76 = vector.broadcast %4 : vector<1x16xf32> to vector<16x16xf32>
    %77 = arith.addf %75, %76 : vector<16x16xf32>
    %c0_59 = arith.constant 0 : index
    %c2 = arith.constant 2 : index
    %78 = vector.load %arg8[%c0_59, %c2] : memref<16x4xf32, #tpu.memory_space<vmem>>, vector<16x1xf32>
    %cst_60 = arith.constant dense<0xFF800000> : vector<16xf32>
    %79 = vector.multi_reduction <maximumf>, %77, %cst_60 [1] : vector<16x16xf32> to vector<16xf32>
    %80 = vector.shape_cast %79 : vector<16xf32> to vector<16x1xf32>
    %81 = arith.maximumf %78, %80 : vector<16x1xf32>
    %82 = arith.subf %78, %81 : vector<16x1xf32>
    %83 = math.exp %82 : vector<16x1xf32>
    %84 = vector.broadcast %81 : vector<16x1xf32> to vector<16x16xf32>
    %85 = arith.subf %77, %84 : vector<16x16xf32>
    %86 = math.exp %85 : vector<16x16xf32>
    %c0_61 = arith.constant 0 : index
    %c2_62 = arith.constant 2 : index
    %87 = vector.load %arg9[%c0_61, %c2_62] : memref<16x4xf32, #tpu.memory_space<vmem>>, vector<16x1xf32>
    %88 = arith.mulf %83, %87 : vector<16x1xf32>
    %cst_63 = arith.constant dense<0.000000e+00> : vector<16xf32>
    %89 = vector.multi_reduction <add>, %86, %cst_63 [1] : vector<16x16xf32> to vector<16xf32>
    %90 = vector.shape_cast %89 : vector<16xf32> to vector<16x1xf32>
    %91 = arith.addf %88, %90 : vector<16x1xf32>
    %c0_64 = arith.constant 0 : index
    %c2_65 = arith.constant 2 : index
    %92 = vector.load %arg9[%c0_64, %c2_65] : memref<16x4xf32, #tpu.memory_space<vmem>>, vector<16x1xf32>
    tpu.vector_store %arg9[%c0_64, %c2_65], %91 {strides = array<i32>} : memref<16x4xf32, #tpu.memory_space<vmem>>, vector<16x1xf32>,
    %c0_66 = arith.constant 0 : index
    %c64_67 = arith.constant 64 : index
    %93 = vector.load %arg10[%c0_66, %c64_67] : memref<16x128xf32, #tpu.memory_space<vmem>>, vector<16x32xf32>
    %94 = vector.broadcast %83 : vector<16x1xf32> to vector<16x32xf32>
    %95 = arith.mulf %94, %93 : vector<16x32xf32>
    %96 = arith.truncf %86 : vector<16x16xf32> to vector<16x16xbf16>
    %cst_68 = arith.constant dense<0.000000e+00> : vector<16x32xf32>
    %97 = tpu.matmul %96, %74, %cst_68 {dimension_numbers = #tpu.dot_dimension_numbers<[1], [0], [0], [1], [0, 0, 1, 1], [], []>} : vector<16x16xbf16>, vector<16x32xbf16>, vector<16x32xf32> -> vector<16x32xf32>
    %98 = arith.addf %95, %97 : vector<16x32xf32>
    %c0_69 = arith.constant 0 : index
    %c64_70 = arith.constant 64 : index
    %99 = vector.load %arg10[%c0_69, %c64_70] : memref<16x128xf32, #tpu.memory_space<vmem>>, vector<16x32xf32>
    tpu.vector_store %arg10[%c0_69, %c64_70], %98 {strides = array<i32>} : memref<16x128xf32, #tpu.memory_space<vmem>>, vector<16x32xf32>,
    %c0_71 = arith.constant 0 : index
    %c2_72 = arith.constant 2 : index
    %100 = vector.load %arg8[%c0_71, %c2_72] : memref<16x4xf32, #tpu.memory_space<vmem>>, vector<16x1xf32>
    tpu.vector_store %arg8[%c0_71, %c2_72], %81 {strides = array<i32>} : memref<16x4xf32, #tpu.memory_space<vmem>>, vector<16x1xf32>,
    %c0_73 = arith.constant 0 : index
    %c0_74 = arith.constant 0 : index
    %c96 = arith.constant 96 : index
    %101 = vector.load %arg3[%c0_73, %c0_74, %c96] : memref<1x16x128xbf16, #tpu.memory_space<vmem>>, vector<1x16x32xbf16>
    %102 = vector.shape_cast %101 : vector<1x16x32xbf16> to vector<16x32xbf16>
    %c0_75 = arith.constant 0 : index
    %c0_76 = arith.constant 0 : index
    %c96_77 = arith.constant 96 : index
    %103 = vector.load %arg4[%c0_75, %c0_76, %c96_77] : memref<1x16x128xbf16, #tpu.memory_space<vmem>>, vector<1x16x32xbf16>
    %104 = vector.shape_cast %103 : vector<1x16x32xbf16> to vector<16x32xbf16>
    %c0_78 = arith.constant 0 : index
    %c0_79 = arith.constant 0 : index
    %c96_80 = arith.constant 96 : index
    %105 = vector.load %arg5[%c0_78, %c0_79, %c96_80] : memref<1x16x128xbf16, #tpu.memory_space<vmem>>, vector<1x16x32xbf16>
    %106 = vector.shape_cast %105 : vector<1x16x32xbf16> to vector<16x32xbf16>
    %cst_81 = arith.constant dense<0.000000e+00> : vector<16x16xf32>
    %107 = tpu.matmul %102, %104, %cst_81 {dimension_numbers = #tpu.dot_dimension_numbers<[1], [1], [0], [0], [0, 0, 1, 0], [], []>} : vector<16x32xbf16>, vector<16x32xbf16>, vector<16x16xf32> -> vector<16x16xf32>
    %108 = vector.broadcast %4 : vector<1x16xf32> to vector<16x16xf32>
    %109 = arith.addf %107, %108 : vector<16x16xf32>
    %c0_82 = arith.constant 0 : index
    %c3 = arith.constant 3 : index
    %110 = vector.load %arg8[%c0_82, %c3] : memref<16x4xf32, #tpu.memory_space<vmem>>, vector<16x1xf32>
    %cst_83 = arith.constant dense<0xFF800000> : vector<16xf32>
    %111 = vector.multi_reduction <maximumf>, %109, %cst_83 [1] : vector<16x16xf32> to vector<16xf32>
    %112 = vector.shape_cast %111 : vector<16xf32> to vector<16x1xf32>
    %113 = arith.maximumf %110, %112 : vector<16x1xf32>
    %114 = arith.subf %110, %113 : vector<16x1xf32>
    %115 = math.exp %114 : vector<16x1xf32>
    %116 = vector.broadcast %113 : vector<16x1xf32> to vector<16x16xf32>
    %117 = arith.subf %109, %116 : vector<16x16xf32>
    %118 = math.exp %117 : vector<16x16xf32>
    %c0_84 = arith.constant 0 : index
    %c3_85 = arith.constant 3 : index
    %119 = vector.load %arg9[%c0_84, %c3_85] : memref<16x4xf32, #tpu.memory_space<vmem>>, vector<16x1xf32>
    %120 = arith.mulf %115, %119 : vector<16x1xf32>
    %cst_86 = arith.constant dense<0.000000e+00> : vector<16xf32>
    %121 = vector.multi_reduction <add>, %118, %cst_86 [1] : vector<16x16xf32> to vector<16xf32>
    %122 = vector.shape_cast %121 : vector<16xf32> to vector<16x1xf32>
    %123 = arith.addf %120, %122 : vector<16x1xf32>
    %c0_87 = arith.constant 0 : index
    %c3_88 = arith.constant 3 : index
    %124 = vector.load %arg9[%c0_87, %c3_88] : memref<16x4xf32, #tpu.memory_space<vmem>>, vector<16x1xf32>
    tpu.vector_store %arg9[%c0_87, %c3_88], %123 {strides = array<i32>} : memref<16x4xf32, #tpu.memory_space<vmem>>, vector<16x1xf32>,
    %c0_89 = arith.constant 0 : index
    %c96_90 = arith.constant 96 : index
    %125 = vector.load %arg10[%c0_89, %c96_90] : memref<16x128xf32, #tpu.memory_space<vmem>>, vector<16x32xf32>
    %126 = vector.broadcast %115 : vector<16x1xf32> to vector<16x32xf32>
    %127 = arith.mulf %126, %125 : vector<16x32xf32>
    %128 = arith.truncf %118 : vector<16x16xf32> to vector<16x16xbf16>
    %cst_91 = arith.constant dense<0.000000e+00> : vector<16x32xf32>
    %129 = tpu.matmul %128, %106, %cst_91 {dimension_numbers = #tpu.dot_dimension_numbers<[1], [0], [0], [1], [0, 0, 1, 1], [], []>} : vector<16x16xbf16>, vector<16x32xbf16>, vector<16x32xf32> -> vector<16x32xf32>
    %130 = arith.addf %127, %129 : vector<16x32xf32>
    %c0_92 = arith.constant 0 : index
    %c96_93 = arith.constant 96 : index
    %131 = vector.load %arg10[%c0_92, %c96_93] : memref<16x128xf32, #tpu.memory_space<vmem>>, vector<16x32xf32>
    tpu.vector_store %arg10[%c0_92, %c96_93], %130 {strides = array<i32>} : memref<16x128xf32, #tpu.memory_space<vmem>>, vector<16x32xf32>,
    %c0_94 = arith.constant 0 : index
    %c3_95 = arith.constant 3 : index
    %132 = vector.load %arg8[%c0_94, %c3_95] : memref<16x4xf32, #tpu.memory_space<vmem>>, vector<16x1xf32>
    tpu.vector_store %arg8[%c0_94, %c3_95], %113 {strides = array<i32>} : memref<16x4xf32, #tpu.memory_space<vmem>>, vector<16x1xf32>,
    %c0_i32_96 = arith.constant 0 : i32
    %133 = arith.cmpi eq, %arg2, %c0_i32_96 : i32
    %134 = arith.extui %133 : i1 to i32
    %c0_i32_97 = arith.constant 0 : i32
    %135 = arith.cmpi ne, %134, %c0_i32_97 : i32
    scf.if %135 {
      %c0_98 = arith.constant 0 : index
      %c0_99 = arith.constant 0 : index
      %136 = vector.load %arg10[%c0_98, %c0_99] : memref<16x128xf32, #tpu.memory_space<vmem>>, vector<16x32xf32>
      %c0_100 = arith.constant 0 : index
      %c0_101 = arith.constant 0 : index
      %137 = vector.load %arg9[%c0_100, %c0_101] : memref<16x4xf32, #tpu.memory_space<vmem>>, vector<16x1xf32>
      %138 = vector.broadcast %137 : vector<16x1xf32> to vector<16x32xf32>
      %139 = arith.divf %136, %138 : vector<16x32xf32>
      %140 = arith.truncf %139 : vector<16x32xf32> to vector<16x32xbf16>
      %c0_102 = arith.constant 0 : index
      %c0_103 = arith.constant 0 : index
      %c0_104 = arith.constant 0 : index
      %141 = vector.load %arg7[%c0_102, %c0_103, %c0_104] : memref<1x16x128xbf16, #tpu.memory_space<vmem>>, vector<1x16x32xbf16>
      %142 = vector.shape_cast %141 : vector<1x16x32xbf16> to vector<16x32xbf16>
      %143 = vector.shape_cast %140 : vector<16x32xbf16> to vector<1x16x32xbf16>
      tpu.vector_store %arg7[%c0_102, %c0_103, %c0_104], %143 {strides = array<i32>} : memref<1x16x128xbf16, #tpu.memory_space<vmem>>, vector<1x16x32xbf16>,
      %c0_105 = arith.constant 0 : index
      %c32_106 = arith.constant 32 : index
      %144 = vector.load %arg10[%c0_105, %c32_106] : memref<16x128xf32, #tpu.memory_space<vmem>>, vector<16x32xf32>
      %c0_107 = arith.constant 0 : index
      %c1_108 = arith.constant 1 : index
      %145 = vector.load %arg9[%c0_107, %c1_108] : memref<16x4xf32, #tpu.memory_space<vmem>>, vector<16x1xf32>
      %146 = vector.broadcast %145 : vector<16x1xf32> to vector<16x32xf32>
      %147 = arith.divf %144, %146 : vector<16x32xf32>
      %148 = arith.truncf %147 : vector<16x32xf32> to vector<16x32xbf16>
      %c0_109 = arith.constant 0 : index
      %c0_110 = arith.constant 0 : index
      %c32_111 = arith.constant 32 : index
      %149 = vector.load %arg7[%c0_109, %c0_110, %c32_111] : memref<1x16x128xbf16, #tpu.memory_space<vmem>>, vector<1x16x32xbf16>
      %150 = vector.shape_cast %149 : vector<1x16x32xbf16> to vector<16x32xbf16>
      %151 = vector.shape_cast %148 : vector<16x32xbf16> to vector<1x16x32xbf16>
      tpu.vector_store %arg7[%c0_109, %c0_110, %c32_111], %151 {strides = array<i32>} : memref<1x16x128xbf16, #tpu.memory_space<vmem>>, vector<1x16x32xbf16>,
      %c0_112 = arith.constant 0 : index
      %c64_113 = arith.constant 64 : index
      %152 = vector.load %arg10[%c0_112, %c64_113] : memref<16x128xf32, #tpu.memory_space<vmem>>, vector<16x32xf32>
      %c0_114 = arith.constant 0 : index
      %c2_115 = arith.constant 2 : index
      %153 = vector.load %arg9[%c0_114, %c2_115] : memref<16x4xf32, #tpu.memory_space<vmem>>, vector<16x1xf32>
      %154 = vector.broadcast %153 : vector<16x1xf32> to vector<16x32xf32>
      %155 = arith.divf %152, %154 : vector<16x32xf32>
      %156 = arith.truncf %155 : vector<16x32xf32> to vector<16x32xbf16>
      %c0_116 = arith.constant 0 : index
      %c0_117 = arith.constant 0 : index
      %c64_118 = arith.constant 64 : index
      %157 = vector.load %arg7[%c0_116, %c0_117, %c64_118] : memref<1x16x128xbf16, #tpu.memory_space<vmem>>, vector<1x16x32xbf16>
      %158 = vector.shape_cast %157 : vector<1x16x32xbf16> to vector<16x32xbf16>
      %159 = vector.shape_cast %156 : vector<16x32xbf16> to vector<1x16x32xbf16>
      tpu.vector_store %arg7[%c0_116, %c0_117, %c64_118], %159 {strides = array<i32>} : memref<1x16x128xbf16, #tpu.memory_space<vmem>>, vector<1x16x32xbf16>,
      %c0_119 = arith.constant 0 : index
      %c96_120 = arith.constant 96 : index
      %160 = vector.load %arg10[%c0_119, %c96_120] : memref<16x128xf32, #tpu.memory_space<vmem>>, vector<16x32xf32>
      %c0_121 = arith.constant 0 : index
      %c3_122 = arith.constant 3 : index
      %161 = vector.load %arg9[%c0_121, %c3_122] : memref<16x4xf32, #tpu.memory_space<vmem>>, vector<16x1xf32>
      %162 = vector.broadcast %161 : vector<16x1xf32> to vector<16x32xf32>
      %163 = arith.divf %160, %162 : vector<16x32xf32>
      %164 = arith.truncf %163 : vector<16x32xf32> to vector<16x32xbf16>
      %c0_123 = arith.constant 0 : index
      %c0_124 = arith.constant 0 : index
      %c96_125 = arith.constant 96 : index
      %165 = vector.load %arg7[%c0_123, %c0_124, %c96_125] : memref<1x16x128xbf16, #tpu.memory_space<vmem>>, vector<1x16x32xbf16>
      %166 = vector.shape_cast %165 : vector<1x16x32xbf16> to vector<16x32xbf16>
      %167 = vector.shape_cast %164 : vector<16x32xbf16> to vector<1x16x32xbf16>
      tpu.vector_store %arg7[%c0_123, %c0_124, %c96_125], %167 {strides = array<i32>} : memref<1x16x128xbf16, #tpu.memory_space<vmem>>, vector<1x16x32xbf16>,
    } else {
    }
    return
  }
  func.func @transform_0(%arg0: i32, %arg1: i32, %arg2: i32) -> (i32, i32, i32) {
    %c0_i32 = arith.constant 0 : i32
    %c0_i32_0 = arith.constant 0 : i32
    return %arg0, %arg1, %c0_i32 : i32, i32, i32
  }
  func.func @transform_1(%arg0: i32, %arg1: i32, %arg2: i32) -> (i32, i32, i32) {
    %c1_i32 = arith.constant 1 : i32
    %c0_i32 = arith.constant 0 : i32
    return %arg0, %arg2, %c1_i32 : i32, i32, i32
  }
  func.func @transform_2(%arg0: i32, %arg1: i32, %arg2: i32) -> (i32, i32, i32) {
    %c2_i32 = arith.constant 2 : i32
    %c0_i32 = arith.constant 0 : i32
    return %arg0, %arg2, %c2_i32 : i32, i32, i32
  }
  func.func @transform_3(%arg0: i32, %arg1: i32, %arg2: i32) -> (i32, i32, i32) {
    %c0_i32 = arith.constant 0 : i32
    %c0_i32_0 = arith.constant 0 : i32
    return %arg0, %c0_i32, %arg2 : i32, i32, i32
  }
  func.func @transform_4(%arg0: i32, %arg1: i32, %arg2: i32) -> (i32, i32, i32) {
    %c0_i32 = arith.constant 0 : i32
    %c0_i32_0 = arith.constant 0 : i32
    return %arg0, %arg1, %c0_i32 : i32, i32, i32
  }
}

module attributes {stable_mosaic.version = 11 : i64} {
  func.func @_matmul_bias_kernel(%arg0: i32, %arg1: i32, %arg2: i32, %arg3: memref<32x128xf32, #tpu.memory_space<vmem>>, %arg4: memref<128x256xbf16, #tpu.memory_space<vmem>>, %arg5: memref<1x256xf32, #tpu.memory_space<vmem>>, %arg6: memref<32x256xbf16, #tpu.memory_space<vmem>>, %arg7: memref<32x256xf32, #tpu.memory_space<vmem>>) attributes {dimension_semantics = [#tpu.dimension_semantics<parallel>, #tpu.dimension_semantics<parallel>, #tpu.dimension_semantics<arbitrary>], iteration_bounds = array<i64: 1, 1, 1>, scalar_prefetch = 0 : i64, scratch_operands = 1 : i64, tpu.core_type = #tpu.core_type<tc>, window_params = [{transform_indices = @transform_0, window_bounds = array<i64: 32, 128>}, {transform_indices = @transform_1, window_bounds = array<i64: 128, 256>}, {transform_indices = @transform_2, window_bounds = array<i64: 1, 256>}, {transform_indices = @transform_3, window_bounds = array<i64: 32, 256>}]} {
    %c0_i32 = arith.constant 0 : i32
    %0 = arith.cmpi eq, %arg2, %c0_i32 : i32
    %1 = arith.extui %0 : i1 to i32
    %c0_i32_0 = arith.constant 0 : i32
    %2 = arith.cmpi ne, %1, %c0_i32_0 : i32
    scf.if %2 {
      %cst_10 = arith.constant 0.000000e+00 : f32
      %13 = vector.broadcast %cst_10 : f32 to vector<32x256xf32>
      %c0_11 = arith.constant 0 : index
      %c0_12 = arith.constant 0 : index
      %14 = vector.load %arg7[%c0_11, %c0_12] : memref<32x256xf32, #tpu.memory_space<vmem>>, vector<32x256xf32>
      tpu.vector_store %arg7[%c0_11, %c0_12], %13 {strides = array<i32>} : memref<32x256xf32, #tpu.memory_space<vmem>>, vector<32x256xf32>,
    } else {
    }
    %c0 = arith.constant 0 : index
    %c0_1 = arith.constant 0 : index
    %3 = vector.load %arg7[%c0, %c0_1] : memref<32x256xf32, #tpu.memory_space<vmem>>, vector<32x256xf32>
    %c0_2 = arith.constant 0 : index
    %c0_3 = arith.constant 0 : index
    %4 = vector.load %arg3[%c0_2, %c0_3] : memref<32x128xf32, #tpu.memory_space<vmem>>, vector<32x128xf32>
    %5 = arith.truncf %4 : vector<32x128xf32> to vector<32x128xbf16>
    %c0_4 = arith.constant 0 : index
    %c0_5 = arith.constant 0 : index
    %6 = vector.load %arg4[%c0_4, %c0_5] : memref<128x256xbf16, #tpu.memory_space<vmem>>, vector<128x256xbf16>
    %cst = arith.constant dense<0.000000e+00> : vector<32x256xf32>
    %7 = tpu.matmul %5, %6, %cst {dimension_numbers = #tpu.dot_dimension_numbers<[1], [0], [0], [1], [0, 0, 1, 1], [], []>} : vector<32x128xbf16>, vector<128x256xbf16>, vector<32x256xf32> -> vector<32x256xf32>
    %8 = arith.addf %3, %7 : vector<32x256xf32>
    %c0_6 = arith.constant 0 : index
    %c0_7 = arith.constant 0 : index
    %9 = vector.load %arg7[%c0_6, %c0_7] : memref<32x256xf32, #tpu.memory_space<vmem>>, vector<32x256xf32>
    tpu.vector_store %arg7[%c0_6, %c0_7], %8 {strides = array<i32>} : memref<32x256xf32, #tpu.memory_space<vmem>>, vector<32x256xf32>,
    %c0_i32_8 = arith.constant 0 : i32
    %10 = arith.cmpi eq, %arg2, %c0_i32_8 : i32
    %11 = arith.extui %10 : i1 to i32
    %c0_i32_9 = arith.constant 0 : i32
    %12 = arith.cmpi ne, %11, %c0_i32_9 : i32
    scf.if %12 {
      %c0_10 = arith.constant 0 : index
      %c0_11 = arith.constant 0 : index
      %13 = vector.load %arg7[%c0_10, %c0_11] : memref<32x256xf32, #tpu.memory_space<vmem>>, vector<32x256xf32>
      %c0_12 = arith.constant 0 : index
      %c0_13 = arith.constant 0 : index
      %14 = vector.load %arg5[%c0_12, %c0_13] : memref<1x256xf32, #tpu.memory_space<vmem>>, vector<1x256xf32>
      %15 = vector.broadcast %14 : vector<1x256xf32> to vector<32x256xf32>
      %16 = arith.addf %13, %15 : vector<32x256xf32>
      %17 = arith.truncf %16 : vector<32x256xf32> to vector<32x256xbf16>
      %c0_14 = arith.constant 0 : index
      %c0_15 = arith.constant 0 : index
      %18 = vector.load %arg6[%c0_14, %c0_15] : memref<32x256xbf16, #tpu.memory_space<vmem>>, vector<32x256xbf16>
      tpu.vector_store %arg6[%c0_14, %c0_15], %17 {strides = array<i32>} : memref<32x256xbf16, #tpu.memory_space<vmem>>, vector<32x256xbf16>,
    } else {
    }
    return
  }
  func.func @transform_0(%arg0: i32, %arg1: i32, %arg2: i32) -> (i32, i32) {
    %c0_i32 = arith.constant 0 : i32
    return %arg0, %arg2 : i32, i32
  }
  func.func @transform_1(%arg0: i32, %arg1: i32, %arg2: i32) -> (i32, i32) {
    %c0_i32 = arith.constant 0 : i32
    return %arg2, %arg1 : i32, i32
  }
  func.func @transform_2(%arg0: i32, %arg1: i32, %arg2: i32) -> (i32, i32) {
    %c0_i32 = arith.constant 0 : i32
    %c0_i32_0 = arith.constant 0 : i32
    return %c0_i32, %arg1 : i32, i32
  }
  func.func @transform_3(%arg0: i32, %arg1: i32, %arg2: i32) -> (i32, i32) {
    %c0_i32 = arith.constant 0 : i32
    return %arg0, %arg1 : i32, i32
  }
}

module attributes {stable_mosaic.version = 11 : i64} {
  func.func @_matmul_bias_kernel(%arg0: i32, %arg1: i32, %arg2: i32, %arg3: memref<32x128xf32, #tpu.memory_space<vmem>>, %arg4: memref<128x256xbf16, #tpu.memory_space<vmem>>, %arg5: memref<1x256xf32, #tpu.memory_space<vmem>>, %arg6: memref<32x256xbf16, #tpu.memory_space<vmem>>, %arg7: memref<32x256xf32, #tpu.memory_space<vmem>>) attributes {dimension_semantics = [#tpu.dimension_semantics<parallel>, #tpu.dimension_semantics<parallel>, #tpu.dimension_semantics<arbitrary>], iteration_bounds = array<i64: 1, 1, 1>, scalar_prefetch = 0 : i64, scratch_operands = 1 : i64, tpu.core_type = #tpu.core_type<tc>, window_params = [{transform_indices = @transform_0, window_bounds = array<i64: 32, 128>}, {transform_indices = @transform_1, window_bounds = array<i64: 128, 256>}, {transform_indices = @transform_2, window_bounds = array<i64: 1, 256>}, {transform_indices = @transform_3, window_bounds = array<i64: 32, 256>}]} {
    %c0_i32 = arith.constant 0 : i32
    %0 = arith.cmpi eq, %arg2, %c0_i32 : i32
    %1 = arith.extui %0 : i1 to i32
    %c0_i32_0 = arith.constant 0 : i32
    %2 = arith.cmpi ne, %1, %c0_i32_0 : i32
    scf.if %2 {
      %cst_10 = arith.constant 0.000000e+00 : f32
      %13 = vector.broadcast %cst_10 : f32 to vector<32x256xf32>
      %c0_11 = arith.constant 0 : index
      %c0_12 = arith.constant 0 : index
      %14 = vector.load %arg7[%c0_11, %c0_12] : memref<32x256xf32, #tpu.memory_space<vmem>>, vector<32x256xf32>
      tpu.vector_store %arg7[%c0_11, %c0_12], %13 {strides = array<i32>} : memref<32x256xf32, #tpu.memory_space<vmem>>, vector<32x256xf32>,
    } else {
    }
    %c0 = arith.constant 0 : index
    %c0_1 = arith.constant 0 : index
    %3 = vector.load %arg7[%c0, %c0_1] : memref<32x256xf32, #tpu.memory_space<vmem>>, vector<32x256xf32>
    %c0_2 = arith.constant 0 : index
    %c0_3 = arith.constant 0 : index
    %4 = vector.load %arg3[%c0_2, %c0_3] : memref<32x128xf32, #tpu.memory_space<vmem>>, vector<32x128xf32>
    %5 = arith.truncf %4 : vector<32x128xf32> to vector<32x128xbf16>
    %c0_4 = arith.constant 0 : index
    %c0_5 = arith.constant 0 : index
    %6 = vector.load %arg4[%c0_4, %c0_5] : memref<128x256xbf16, #tpu.memory_space<vmem>>, vector<128x256xbf16>
    %cst = arith.constant dense<0.000000e+00> : vector<32x256xf32>
    %7 = tpu.matmul %5, %6, %cst {dimension_numbers = #tpu.dot_dimension_numbers<[1], [0], [0], [1], [0, 0, 1, 1], [], []>} : vector<32x128xbf16>, vector<128x256xbf16>, vector<32x256xf32> -> vector<32x256xf32>
    %8 = arith.addf %3, %7 : vector<32x256xf32>
    %c0_6 = arith.constant 0 : index
    %c0_7 = arith.constant 0 : index
    %9 = vector.load %arg7[%c0_6, %c0_7] : memref<32x256xf32, #tpu.memory_space<vmem>>, vector<32x256xf32>
    tpu.vector_store %arg7[%c0_6, %c0_7], %8 {strides = array<i32>} : memref<32x256xf32, #tpu.memory_space<vmem>>, vector<32x256xf32>,
    %c0_i32_8 = arith.constant 0 : i32
    %10 = arith.cmpi eq, %arg2, %c0_i32_8 : i32
    %11 = arith.extui %10 : i1 to i32
    %c0_i32_9 = arith.constant 0 : i32
    %12 = arith.cmpi ne, %11, %c0_i32_9 : i32
    scf.if %12 {
      %c0_10 = arith.constant 0 : index
      %c0_11 = arith.constant 0 : index
      %13 = vector.load %arg7[%c0_10, %c0_11] : memref<32x256xf32, #tpu.memory_space<vmem>>, vector<32x256xf32>
      %c0_12 = arith.constant 0 : index
      %c0_13 = arith.constant 0 : index
      %14 = vector.load %arg5[%c0_12, %c0_13] : memref<1x256xf32, #tpu.memory_space<vmem>>, vector<1x256xf32>
      %15 = vector.broadcast %14 : vector<1x256xf32> to vector<32x256xf32>
      %16 = arith.addf %13, %15 : vector<32x256xf32>
      %cst_14 = arith.constant 0.000000e+00 : f32
      %17 = vector.broadcast %cst_14 : f32 to vector<32x256xf32>
      %18 = arith.maximumf %16, %17 : vector<32x256xf32>
      %19 = arith.truncf %18 : vector<32x256xf32> to vector<32x256xbf16>
      %c0_15 = arith.constant 0 : index
      %c0_16 = arith.constant 0 : index
      %20 = vector.load %arg6[%c0_15, %c0_16] : memref<32x256xbf16, #tpu.memory_space<vmem>>, vector<32x256xbf16>
      tpu.vector_store %arg6[%c0_15, %c0_16], %19 {strides = array<i32>} : memref<32x256xbf16, #tpu.memory_space<vmem>>, vector<32x256xbf16>,
    } else {
    }
    return
  }
  func.func @transform_0(%arg0: i32, %arg1: i32, %arg2: i32) -> (i32, i32) {
    %c0_i32 = arith.constant 0 : i32
    return %arg0, %arg2 : i32, i32
  }
  func.func @transform_1(%arg0: i32, %arg1: i32, %arg2: i32) -> (i32, i32) {
    %c0_i32 = arith.constant 0 : i32
    return %arg2, %arg1 : i32, i32
  }
  func.func @transform_2(%arg0: i32, %arg1: i32, %arg2: i32) -> (i32, i32) {
    %c0_i32 = arith.constant 0 : i32
    %c0_i32_0 = arith.constant 0 : i32
    return %c0_i32, %arg1 : i32, i32
  }
  func.func @transform_3(%arg0: i32, %arg1: i32, %arg2: i32) -> (i32, i32) {
    %c0_i32 = arith.constant 0 : i32
    return %arg0, %arg1 : i32, i32
  }
}

module attributes {stable_mosaic.version = 11 : i64} {
  func.func @_flash_attn_kernel(%arg0: i32, %arg1: i32, %arg2: i32, %arg3: memref<1x16x128xbf16, #tpu.memory_space<vmem>>, %arg4: memref<1x16x128xbf16, #tpu.memory_space<vmem>>, %arg5: memref<1x16x128xbf16, #tpu.memory_space<vmem>>, %arg6: memref<1x1x16xf32, #tpu.memory_space<vmem>>, %arg7: memref<1x16x128xbf16, #tpu.memory_space<vmem>>, %arg8: memref<16x4xf32, #tpu.memory_space<vmem>>, %arg9: memref<16x4xf32, #tpu.memory_space<vmem>>, %arg10: memref<16x128xf32, #tpu.memory_space<vmem>>) attributes {dimension_semantics = [#tpu.dimension_semantics<parallel>, #tpu.dimension_semantics<parallel>, #tpu.dimension_semantics<arbitrary>], iteration_bounds = array<i64: 2, 1, 1>, scalar_prefetch = 0 : i64, scratch_operands = 3 : i64, tpu.core_type = #tpu.core_type<tc>, window_params = [{transform_indices = @transform_0, window_bounds = array<i64: 1, 16, 128>}, {transform_indices = @transform_1, window_bounds = array<i64: 1, 16, 128>}, {transform_indices = @transform_2, window_bounds = array<i64: 1, 16, 128>}, {transform_indices = @transform_3, window_bounds = array<i64: 1, 1, 16>}, {transform_indices = @transform_4, window_bounds = array<i64: 1, 16, 128>}]} {
    %c0_i32 = arith.constant 0 : i32
    %0 = arith.cmpi eq, %arg2, %c0_i32 : i32
    %1 = arith.extui %0 : i1 to i32
    %c0_i32_0 = arith.constant 0 : i32
    %2 = arith.cmpi ne, %1, %c0_i32_0 : i32
    scf.if %2 {
      %cst_98 = arith.constant -1.000000e+30 : f32
      %136 = vector.broadcast %cst_98 : f32 to vector<16x4xf32>
      %c0_99 = arith.constant 0 : index
      %c0_100 = arith.constant 0 : index
      %137 = vector.load %arg8[%c0_99, %c0_100] : memref<16x4xf32, #tpu.memory_space<vmem>>, vector<16x4xf32>
      tpu.vector_store %arg8[%c0_99, %c0_100], %136 {strides = array<i32>} : memref<16x4xf32, #tpu.memory_space<vmem>>, vector<16x4xf32>,
      %cst_101 = arith.constant 0.000000e+00 : f32
      %138 = vector.broadcast %cst_101 : f32 to vector<16x4xf32>
      %c0_102 = arith.constant 0 : index
      %c0_103 = arith.constant 0 : index
      %139 = vector.load %arg9[%c0_102, %c0_103] : memref<16x4xf32, #tpu.memory_space<vmem>>, vector<16x4xf32>
      tpu.vector_store %arg9[%c0_102, %c0_103], %138 {strides = array<i32>} : memref<16x4xf32, #tpu.memory_space<vmem>>, vector<16x4xf32>,
      %cst_104 = arith.constant 0.000000e+00 : f32
      %140 = vector.broadcast %cst_104 : f32 to vector<16x128xf32>
      %c0_105 = arith.constant 0 : index
      %c0_106 = arith.constant 0 : index
      %141 = vector.load %arg10[%c0_105, %c0_106] : memref<16x128xf32, #tpu.memory_space<vmem>>, vector<16x128xf32>
      tpu.vector_store %arg10[%c0_105, %c0_106], %140 {strides = array<i32>} : memref<16x128xf32, #tpu.memory_space<vmem>>, vector<16x128xf32>,
    } else {
    }
    %c0 = arith.constant 0 : index
    %c0_1 = arith.constant 0 : index
    %c0_2 = arith.constant 0 : index
    %3 = vector.load %arg6[%c0, %c0_1, %c0_2] : memref<1x1x16xf32, #tpu.memory_space<vmem>>, vector<1x1x16xf32>
    %4 = vector.shape_cast %3 : vector<1x1x16xf32> to vector<1x16xf32>
    %c0_3 = arith.constant 0 : index
    %c0_4 = arith.constant 0 : index
    %c0_5 = arith.constant 0 : index
    %5 = vector.load %arg3[%c0_3, %c0_4, %c0_5] : memref<1x16x128xbf16, #tpu.memory_space<vmem>>, vector<1x16x32xbf16>
    %6 = vector.shape_cast %5 : vector<1x16x32xbf16> to vector<16x32xbf16>
    %c0_6 = arith.constant 0 : index
    %c0_7 = arith.constant 0 : index
    %c0_8 = arith.constant 0 : index
    %7 = vector.load %arg4[%c0_6, %c0_7, %c0_8] : memref<1x16x128xbf16, #tpu.memory_space<vmem>>, vector<1x16x32xbf16>
    %8 = vector.shape_cast %7 : vector<1x16x32xbf16> to vector<16x32xbf16>
    %c0_9 = arith.constant 0 : index
    %c0_10 = arith.constant 0 : index
    %c0_11 = arith.constant 0 : index
    %9 = vector.load %arg5[%c0_9, %c0_10, %c0_11] : memref<1x16x128xbf16, #tpu.memory_space<vmem>>, vector<1x16x32xbf16>
    %10 = vector.shape_cast %9 : vector<1x16x32xbf16> to vector<16x32xbf16>
    %cst = arith.constant dense<0.000000e+00> : vector<16x16xf32>
    %11 = tpu.matmul %6, %8, %cst {dimension_numbers = #tpu.dot_dimension_numbers<[1], [1], [0], [0], [0, 0, 1, 0], [], []>} : vector<16x32xbf16>, vector<16x32xbf16>, vector<16x16xf32> -> vector<16x16xf32>
    %12 = vector.broadcast %4 : vector<1x16xf32> to vector<16x16xf32>
    %13 = arith.addf %11, %12 : vector<16x16xf32>
    %c0_12 = arith.constant 0 : index
    %c0_13 = arith.constant 0 : index
    %14 = vector.load %arg8[%c0_12, %c0_13] : memref<16x4xf32, #tpu.memory_space<vmem>>, vector<16x1xf32>
    %cst_14 = arith.constant dense<0xFF800000> : vector<16xf32>
    %15 = vector.multi_reduction <maximumf>, %13, %cst_14 [1] : vector<16x16xf32> to vector<16xf32>
    %16 = vector.shape_cast %15 : vector<16xf32> to vector<16x1xf32>
    %17 = arith.maximumf %14, %16 : vector<16x1xf32>
    %18 = arith.subf %14, %17 : vector<16x1xf32>
    %19 = math.exp %18 : vector<16x1xf32>
    %20 = vector.broadcast %17 : vector<16x1xf32> to vector<16x16xf32>
    %21 = arith.subf %13, %20 : vector<16x16xf32>
    %22 = math.exp %21 : vector<16x16xf32>
    %c0_15 = arith.constant 0 : index
    %c0_16 = arith.constant 0 : index
    %23 = vector.load %arg9[%c0_15, %c0_16] : memref<16x4xf32, #tpu.memory_space<vmem>>, vector<16x1xf32>
    %24 = arith.mulf %19, %23 : vector<16x1xf32>
    %cst_17 = arith.constant dense<0.000000e+00> : vector<16xf32>
    %25 = vector.multi_reduction <add>, %22, %cst_17 [1] : vector<16x16xf32> to vector<16xf32>
    %26 = vector.shape_cast %25 : vector<16xf32> to vector<16x1xf32>
    %27 = arith.addf %24, %26 : vector<16x1xf32>
    %c0_18 = arith.constant 0 : index
    %c0_19 = arith.constant 0 : index
    %28 = vector.load %arg9[%c0_18, %c0_19] : memref<16x4xf32, #tpu.memory_space<vmem>>, vector<16x1xf32>
    tpu.vector_store %arg9[%c0_18, %c0_19], %27 {strides = array<i32>} : memref<16x4xf32, #tpu.memory_space<vmem>>, vector<16x1xf32>,
    %c0_20 = arith.constant 0 : index
    %c0_21 = arith.constant 0 : index
    %29 = vector.load %arg10[%c0_20, %c0_21] : memref<16x128xf32, #tpu.memory_space<vmem>>, vector<16x32xf32>
    %30 = vector.broadcast %19 : vector<16x1xf32> to vector<16x32xf32>
    %31 = arith.mulf %30, %29 : vector<16x32xf32>
    %32 = arith.truncf %22 : vector<16x16xf32> to vector<16x16xbf16>
    %cst_22 = arith.constant dense<0.000000e+00> : vector<16x32xf32>
    %33 = tpu.matmul %32, %10, %cst_22 {dimension_numbers = #tpu.dot_dimension_numbers<[1], [0], [0], [1], [0, 0, 1, 1], [], []>} : vector<16x16xbf16>, vector<16x32xbf16>, vector<16x32xf32> -> vector<16x32xf32>
    %34 = arith.addf %31, %33 : vector<16x32xf32>
    %c0_23 = arith.constant 0 : index
    %c0_24 = arith.constant 0 : index
    %35 = vector.load %arg10[%c0_23, %c0_24] : memref<16x128xf32, #tpu.memory_space<vmem>>, vector<16x32xf32>
    tpu.vector_store %arg10[%c0_23, %c0_24], %34 {strides = array<i32>} : memref<16x128xf32, #tpu.memory_space<vmem>>, vector<16x32xf32>,
    %c0_25 = arith.constant 0 : index
    %c0_26 = arith.constant 0 : index
    %36 = vector.load %arg8[%c0_25, %c0_26] : memref<16x4xf32, #tpu.memory_space<vmem>>, vector<16x1xf32>
    tpu.vector_store %arg8[%c0_25, %c0_26], %17 {strides = array<i32>} : memref<16x4xf32, #tpu.memory_space<vmem>>, vector<16x1xf32>,
    %c0_27 = arith.constant 0 : index
    %c0_28 = arith.constant 0 : index
    %c32 = arith.constant 32 : index
    %37 = vector.load %arg3[%c0_27, %c0_28, %c32] : memref<1x16x128xbf16, #tpu.memory_space<vmem>>, vector<1x16x32xbf16>
    %38 = vector.shape_cast %37 : vector<1x16x32xbf16> to vector<16x32xbf16>
    %c0_29 = arith.constant 0 : index
    %c0_30 = arith.constant 0 : index
    %c32_31 = arith.constant 32 : index
    %39 = vector.load %arg4[%c0_29, %c0_30, %c32_31] : memref<1x16x128xbf16, #tpu.memory_space<vmem>>, vector<1x16x32xbf16>
    %40 = vector.shape_cast %39 : vector<1x16x32xbf16> to vector<16x32xbf16>
    %c0_32 = arith.constant 0 : index
    %c0_33 = arith.constant 0 : index
    %c32_34 = arith.constant 32 : index
    %41 = vector.load %arg5[%c0_32, %c0_33, %c32_34] : memref<1x16x128xbf16, #tpu.memory_space<vmem>>, vector<1x16x32xbf16>
    %42 = vector.shape_cast %41 : vector<1x16x32xbf16> to vector<16x32xbf16>
    %cst_35 = arith.constant dense<0.000000e+00> : vector<16x16xf32>
    %43 = tpu.matmul %38, %40, %cst_35 {dimension_numbers = #tpu.dot_dimension_numbers<[1], [1], [0], [0], [0, 0, 1, 0], [], []>} : vector<16x32xbf16>, vector<16x32xbf16>, vector<16x16xf32> -> vector<16x16xf32>
    %44 = vector.broadcast %4 : vector<1x16xf32> to vector<16x16xf32>
    %45 = arith.addf %43, %44 : vector<16x16xf32>
    %c0_36 = arith.constant 0 : index
    %c1 = arith.constant 1 : index
    %46 = vector.load %arg8[%c0_36, %c1] : memref<16x4xf32, #tpu.memory_space<vmem>>, vector<16x1xf32>
    %cst_37 = arith.constant dense<0xFF800000> : vector<16xf32>
    %47 = vector.multi_reduction <maximumf>, %45, %cst_37 [1] : vector<16x16xf32> to vector<16xf32>
    %48 = vector.shape_cast %47 : vector<16xf32> to vector<16x1xf32>
    %49 = arith.maximumf %46, %48 : vector<16x1xf32>
    %50 = arith.subf %46, %49 : vector<16x1xf32>
    %51 = math.exp %50 : vector<16x1xf32>
    %52 = vector.broadcast %49 : vector<16x1xf32> to vector<16x16xf32>
    %53 = arith.subf %45, %52 : vector<16x16xf32>
    %54 = math.exp %53 : vector<16x16xf32>
    %c0_38 = arith.constant 0 : index
    %c1_39 = arith.constant 1 : index
    %55 = vector.load %arg9[%c0_38, %c1_39] : memref<16x4xf32, #tpu.memory_space<vmem>>, vector<16x1xf32>
    %56 = arith.mulf %51, %55 : vector<16x1xf32>
    %cst_40 = arith.constant dense<0.000000e+00> : vector<16xf32>
    %57 = vector.multi_reduction <add>, %54, %cst_40 [1] : vector<16x16xf32> to vector<16xf32>
    %58 = vector.shape_cast %57 : vector<16xf32> to vector<16x1xf32>
    %59 = arith.addf %56, %58 : vector<16x1xf32>
    %c0_41 = arith.constant 0 : index
    %c1_42 = arith.constant 1 : index
    %60 = vector.load %arg9[%c0_41, %c1_42] : memref<16x4xf32, #tpu.memory_space<vmem>>, vector<16x1xf32>
    tpu.vector_store %arg9[%c0_41, %c1_42], %59 {strides = array<i32>} : memref<16x4xf32, #tpu.memory_space<vmem>>, vector<16x1xf32>,
    %c0_43 = arith.constant 0 : index
    %c32_44 = arith.constant 32 : index
    %61 = vector.load %arg10[%c0_43, %c32_44] : memref<16x128xf32, #tpu.memory_space<vmem>>, vector<16x32xf32>
    %62 = vector.broadcast %51 : vector<16x1xf32> to vector<16x32xf32>
    %63 = arith.mulf %62, %61 : vector<16x32xf32>
    %64 = arith.truncf %54 : vector<16x16xf32> to vector<16x16xbf16>
    %cst_45 = arith.constant dense<0.000000e+00> : vector<16x32xf32>
    %65 = tpu.matmul %64, %42, %cst_45 {dimension_numbers = #tpu.dot_dimension_numbers<[1], [0], [0], [1], [0, 0, 1, 1], [], []>} : vector<16x16xbf16>, vector<16x32xbf16>, vector<16x32xf32> -> vector<16x32xf32>
    %66 = arith.addf %63, %65 : vector<16x32xf32>
    %c0_46 = arith.constant 0 : index
    %c32_47 = arith.constant 32 : index
    %67 = vector.load %arg10[%c0_46, %c32_47] : memref<16x128xf32, #tpu.memory_space<vmem>>, vector<16x32xf32>
    tpu.vector_store %arg10[%c0_46, %c32_47], %66 {strides = array<i32>} : memref<16x128xf32, #tpu.memory_space<vmem>>, vector<16x32xf32>,
    %c0_48 = arith.constant 0 : index
    %c1_49 = arith.constant 1 : index
    %68 = vector.load %arg8[%c0_48, %c1_49] : memref<16x4xf32, #tpu.memory_space<vmem>>, vector<16x1xf32>
    tpu.vector_store %arg8[%c0_48, %c1_49], %49 {strides = array<i32>} : memref<16x4xf32, #tpu.memory_space<vmem>>, vector<16x1xf32>,
    %c0_50 = arith.constant 0 : index
    %c0_51 = arith.constant 0 : index
    %c64 = arith.constant 64 : index
    %69 = vector.load %arg3[%c0_50, %c0_51, %c64] : memref<1x16x128xbf16, #tpu.memory_space<vmem>>, vector<1x16x32xbf16>
    %70 = vector.shape_cast %69 : vector<1x16x32xbf16> to vector<16x32xbf16>
    %c0_52 = arith.constant 0 : index
    %c0_53 = arith.constant 0 : index
    %c64_54 = arith.constant 64 : index
    %71 = vector.load %arg4[%c0_52, %c0_53, %c64_54] : memref<1x16x128xbf16, #tpu.memory_space<vmem>>, vector<1x16x32xbf16>
    %72 = vector.shape_cast %71 : vector<1x16x32xbf16> to vector<16x32xbf16>
    %c0_55 = arith.constant 0 : index
    %c0_56 = arith.constant 0 : index
    %c64_57 = arith.constant 64 : index
    %73 = vector.load %arg5[%c0_55, %c0_56, %c64_57] : memref<1x16x128xbf16, #tpu.memory_space<vmem>>, vector<1x16x32xbf16>
    %74 = vector.shape_cast %73 : vector<1x16x32xbf16> to vector<16x32xbf16>
    %cst_58 = arith.constant dense<0.000000e+00> : vector<16x16xf32>
    %75 = tpu.matmul %70, %72, %cst_58 {dimension_numbers = #tpu.dot_dimension_numbers<[1], [1], [0], [0], [0, 0, 1, 0], [], []>} : vector<16x32xbf16>, vector<16x32xbf16>, vector<16x16xf32> -> vector<16x16xf32>
    %76 = vector.broadcast %4 : vector<1x16xf32> to vector<16x16xf32>
    %77 = arith.addf %75, %76 : vector<16x16xf32>
    %c0_59 = arith.constant 0 : index
    %c2 = arith.constant 2 : index
    %78 = vector.load %arg8[%c0_59, %c2] : memref<16x4xf32, #tpu.memory_space<vmem>>, vector<16x1xf32>
    %cst_60 = arith.constant dense<0xFF800000> : vector<16xf32>
    %79 = vector.multi_reduction <maximumf>, %77, %cst_60 [1] : vector<16x16xf32> to vector<16xf32>
    %80 = vector.shape_cast %79 : vector<16xf32> to vector<16x1xf32>
    %81 = arith.maximumf %78, %80 : vector<16x1xf32>
    %82 = arith.subf %78, %81 : vector<16x1xf32>
    %83 = math.exp %82 : vector<16x1xf32>
    %84 = vector.broadcast %81 : vector<16x1xf32> to vector<16x16xf32>
    %85 = arith.subf %77, %84 : vector<16x16xf32>
    %86 = math.exp %85 : vector<16x16xf32>
    %c0_61 = arith.constant 0 : index
    %c2_62 = arith.constant 2 : index
    %87 = vector.load %arg9[%c0_61, %c2_62] : memref<16x4xf32, #tpu.memory_space<vmem>>, vector<16x1xf32>
    %88 = arith.mulf %83, %87 : vector<16x1xf32>
    %cst_63 = arith.constant dense<0.000000e+00> : vector<16xf32>
    %89 = vector.multi_reduction <add>, %86, %cst_63 [1] : vector<16x16xf32> to vector<16xf32>
    %90 = vector.shape_cast %89 : vector<16xf32> to vector<16x1xf32>
    %91 = arith.addf %88, %90 : vector<16x1xf32>
    %c0_64 = arith.constant 0 : index
    %c2_65 = arith.constant 2 : index
    %92 = vector.load %arg9[%c0_64, %c2_65] : memref<16x4xf32, #tpu.memory_space<vmem>>, vector<16x1xf32>
    tpu.vector_store %arg9[%c0_64, %c2_65], %91 {strides = array<i32>} : memref<16x4xf32, #tpu.memory_space<vmem>>, vector<16x1xf32>,
    %c0_66 = arith.constant 0 : index
    %c64_67 = arith.constant 64 : index
    %93 = vector.load %arg10[%c0_66, %c64_67] : memref<16x128xf32, #tpu.memory_space<vmem>>, vector<16x32xf32>
    %94 = vector.broadcast %83 : vector<16x1xf32> to vector<16x32xf32>
    %95 = arith.mulf %94, %93 : vector<16x32xf32>
    %96 = arith.truncf %86 : vector<16x16xf32> to vector<16x16xbf16>
    %cst_68 = arith.constant dense<0.000000e+00> : vector<16x32xf32>
    %97 = tpu.matmul %96, %74, %cst_68 {dimension_numbers = #tpu.dot_dimension_numbers<[1], [0], [0], [1], [0, 0, 1, 1], [], []>} : vector<16x16xbf16>, vector<16x32xbf16>, vector<16x32xf32> -> vector<16x32xf32>
    %98 = arith.addf %95, %97 : vector<16x32xf32>
    %c0_69 = arith.constant 0 : index
    %c64_70 = arith.constant 64 : index
    %99 = vector.load %arg10[%c0_69, %c64_70] : memref<16x128xf32, #tpu.memory_space<vmem>>, vector<16x32xf32>
    tpu.vector_store %arg10[%c0_69, %c64_70], %98 {strides = array<i32>} : memref<16x128xf32, #tpu.memory_space<vmem>>, vector<16x32xf32>,
    %c0_71 = arith.constant 0 : index
    %c2_72 = arith.constant 2 : index
    %100 = vector.load %arg8[%c0_71, %c2_72] : memref<16x4xf32, #tpu.memory_space<vmem>>, vector<16x1xf32>
    tpu.vector_store %arg8[%c0_71, %c2_72], %81 {strides = array<i32>} : memref<16x4xf32, #tpu.memory_space<vmem>>, vector<16x1xf32>,
    %c0_73 = arith.constant 0 : index
    %c0_74 = arith.constant 0 : index
    %c96 = arith.constant 96 : index
    %101 = vector.load %arg3[%c0_73, %c0_74, %c96] : memref<1x16x128xbf16, #tpu.memory_space<vmem>>, vector<1x16x32xbf16>
    %102 = vector.shape_cast %101 : vector<1x16x32xbf16> to vector<16x32xbf16>
    %c0_75 = arith.constant 0 : index
    %c0_76 = arith.constant 0 : index
    %c96_77 = arith.constant 96 : index
    %103 = vector.load %arg4[%c0_75, %c0_76, %c96_77] : memref<1x16x128xbf16, #tpu.memory_space<vmem>>, vector<1x16x32xbf16>
    %104 = vector.shape_cast %103 : vector<1x16x32xbf16> to vector<16x32xbf16>
    %c0_78 = arith.constant 0 : index
    %c0_79 = arith.constant 0 : index
    %c96_80 = arith.constant 96 : index
    %105 = vector.load %arg5[%c0_78, %c0_79, %c96_80] : memref<1x16x128xbf16, #tpu.memory_space<vmem>>, vector<1x16x32xbf16>
    %106 = vector.shape_cast %105 : vector<1x16x32xbf16> to vector<16x32xbf16>
    %cst_81 = arith.constant dense<0.000000e+00> : vector<16x16xf32>
    %107 = tpu.matmul %102, %104, %cst_81 {dimension_numbers = #tpu.dot_dimension_numbers<[1], [1], [0], [0], [0, 0, 1, 0], [], []>} : vector<16x32xbf16>, vector<16x32xbf16>, vector<16x16xf32> -> vector<16x16xf32>
    %108 = vector.broadcast %4 : vector<1x16xf32> to vector<16x16xf32>
    %109 = arith.addf %107, %108 : vector<16x16xf32>
    %c0_82 = arith.constant 0 : index
    %c3 = arith.constant 3 : index
    %110 = vector.load %arg8[%c0_82, %c3] : memref<16x4xf32, #tpu.memory_space<vmem>>, vector<16x1xf32>
    %cst_83 = arith.constant dense<0xFF800000> : vector<16xf32>
    %111 = vector.multi_reduction <maximumf>, %109, %cst_83 [1] : vector<16x16xf32> to vector<16xf32>
    %112 = vector.shape_cast %111 : vector<16xf32> to vector<16x1xf32>
    %113 = arith.maximumf %110, %112 : vector<16x1xf32>
    %114 = arith.subf %110, %113 : vector<16x1xf32>
    %115 = math.exp %114 : vector<16x1xf32>
    %116 = vector.broadcast %113 : vector<16x1xf32> to vector<16x16xf32>
    %117 = arith.subf %109, %116 : vector<16x16xf32>
    %118 = math.exp %117 : vector<16x16xf32>
    %c0_84 = arith.constant 0 : index
    %c3_85 = arith.constant 3 : index
    %119 = vector.load %arg9[%c0_84, %c3_85] : memref<16x4xf32, #tpu.memory_space<vmem>>, vector<16x1xf32>
    %120 = arith.mulf %115, %119 : vector<16x1xf32>
    %cst_86 = arith.constant dense<0.000000e+00> : vector<16xf32>
    %121 = vector.multi_reduction <add>, %118, %cst_86 [1] : vector<16x16xf32> to vector<16xf32>
    %122 = vector.shape_cast %121 : vector<16xf32> to vector<16x1xf32>
    %123 = arith.addf %120, %122 : vector<16x1xf32>
    %c0_87 = arith.constant 0 : index
    %c3_88 = arith.constant 3 : index
    %124 = vector.load %arg9[%c0_87, %c3_88] : memref<16x4xf32, #tpu.memory_space<vmem>>, vector<16x1xf32>
    tpu.vector_store %arg9[%c0_87, %c3_88], %123 {strides = array<i32>} : memref<16x4xf32, #tpu.memory_space<vmem>>, vector<16x1xf32>,
    %c0_89 = arith.constant 0 : index
    %c96_90 = arith.constant 96 : index
    %125 = vector.load %arg10[%c0_89, %c96_90] : memref<16x128xf32, #tpu.memory_space<vmem>>, vector<16x32xf32>
    %126 = vector.broadcast %115 : vector<16x1xf32> to vector<16x32xf32>
    %127 = arith.mulf %126, %125 : vector<16x32xf32>
    %128 = arith.truncf %118 : vector<16x16xf32> to vector<16x16xbf16>
    %cst_91 = arith.constant dense<0.000000e+00> : vector<16x32xf32>
    %129 = tpu.matmul %128, %106, %cst_91 {dimension_numbers = #tpu.dot_dimension_numbers<[1], [0], [0], [1], [0, 0, 1, 1], [], []>} : vector<16x16xbf16>, vector<16x32xbf16>, vector<16x32xf32> -> vector<16x32xf32>
    %130 = arith.addf %127, %129 : vector<16x32xf32>
    %c0_92 = arith.constant 0 : index
    %c96_93 = arith.constant 96 : index
    %131 = vector.load %arg10[%c0_92, %c96_93] : memref<16x128xf32, #tpu.memory_space<vmem>>, vector<16x32xf32>
    tpu.vector_store %arg10[%c0_92, %c96_93], %130 {strides = array<i32>} : memref<16x128xf32, #tpu.memory_space<vmem>>, vector<16x32xf32>,
    %c0_94 = arith.constant 0 : index
    %c3_95 = arith.constant 3 : index
    %132 = vector.load %arg8[%c0_94, %c3_95] : memref<16x4xf32, #tpu.memory_space<vmem>>, vector<16x1xf32>
    tpu.vector_store %arg8[%c0_94, %c3_95], %113 {strides = array<i32>} : memref<16x4xf32, #tpu.memory_space<vmem>>, vector<16x1xf32>,
    %c0_i32_96 = arith.constant 0 : i32
    %133 = arith.cmpi eq, %arg2, %c0_i32_96 : i32
    %134 = arith.extui %133 : i1 to i32
    %c0_i32_97 = arith.constant 0 : i32
    %135 = arith.cmpi ne, %134, %c0_i32_97 : i32
    scf.if %135 {
      %c0_98 = arith.constant 0 : index
      %c0_99 = arith.constant 0 : index
      %136 = vector.load %arg10[%c0_98, %c0_99] : memref<16x128xf32, #tpu.memory_space<vmem>>, vector<16x32xf32>
      %c0_100 = arith.constant 0 : index
      %c0_101 = arith.constant 0 : index
      %137 = vector.load %arg9[%c0_100, %c0_101] : memref<16x4xf32, #tpu.memory_space<vmem>>, vector<16x1xf32>
      %138 = vector.broadcast %137 : vector<16x1xf32> to vector<16x32xf32>
      %139 = arith.divf %136, %138 : vector<16x32xf32>
      %140 = arith.truncf %139 : vector<16x32xf32> to vector<16x32xbf16>
      %c0_102 = arith.constant 0 : index
      %c0_103 = arith.constant 0 : index
      %c0_104 = arith.constant 0 : index
      %141 = vector.load %arg7[%c0_102, %c0_103, %c0_104] : memref<1x16x128xbf16, #tpu.memory_space<vmem>>, vector<1x16x32xbf16>
      %142 = vector.shape_cast %141 : vector<1x16x32xbf16> to vector<16x32xbf16>
      %143 = vector.shape_cast %140 : vector<16x32xbf16> to vector<1x16x32xbf16>
      tpu.vector_store %arg7[%c0_102, %c0_103, %c0_104], %143 {strides = array<i32>} : memref<1x16x128xbf16, #tpu.memory_space<vmem>>, vector<1x16x32xbf16>,
      %c0_105 = arith.constant 0 : index
      %c32_106 = arith.constant 32 : index
      %144 = vector.load %arg10[%c0_105, %c32_106] : memref<16x128xf32, #tpu.memory_space<vmem>>, vector<16x32xf32>
      %c0_107 = arith.constant 0 : index
      %c1_108 = arith.constant 1 : index
      %145 = vector.load %arg9[%c0_107, %c1_108] : memref<16x4xf32, #tpu.memory_space<vmem>>, vector<16x1xf32>
      %146 = vector.broadcast %145 : vector<16x1xf32> to vector<16x32xf32>
      %147 = arith.divf %144, %146 : vector<16x32xf32>
      %148 = arith.truncf %147 : vector<16x32xf32> to vector<16x32xbf16>
      %c0_109 = arith.constant 0 : index
      %c0_110 = arith.constant 0 : index
      %c32_111 = arith.constant 32 : index
      %149 = vector.load %arg7[%c0_109, %c0_110, %c32_111] : memref<1x16x128xbf16, #tpu.memory_space<vmem>>, vector<1x16x32xbf16>
      %150 = vector.shape_cast %149 : vector<1x16x32xbf16> to vector<16x32xbf16>
      %151 = vector.shape_cast %148 : vector<16x32xbf16> to vector<1x16x32xbf16>
      tpu.vector_store %arg7[%c0_109, %c0_110, %c32_111], %151 {strides = array<i32>} : memref<1x16x128xbf16, #tpu.memory_space<vmem>>, vector<1x16x32xbf16>,
      %c0_112 = arith.constant 0 : index
      %c64_113 = arith.constant 64 : index
      %152 = vector.load %arg10[%c0_112, %c64_113] : memref<16x128xf32, #tpu.memory_space<vmem>>, vector<16x32xf32>
      %c0_114 = arith.constant 0 : index
      %c2_115 = arith.constant 2 : index
      %153 = vector.load %arg9[%c0_114, %c2_115] : memref<16x4xf32, #tpu.memory_space<vmem>>, vector<16x1xf32>
      %154 = vector.broadcast %153 : vector<16x1xf32> to vector<16x32xf32>
      %155 = arith.divf %152, %154 : vector<16x32xf32>
      %156 = arith.truncf %155 : vector<16x32xf32> to vector<16x32xbf16>
      %c0_116 = arith.constant 0 : index
      %c0_117 = arith.constant 0 : index
      %c64_118 = arith.constant 64 : index
      %157 = vector.load %arg7[%c0_116, %c0_117, %c64_118] : memref<1x16x128xbf16, #tpu.memory_space<vmem>>, vector<1x16x32xbf16>
      %158 = vector.shape_cast %157 : vector<1x16x32xbf16> to vector<16x32xbf16>
      %159 = vector.shape_cast %156 : vector<16x32xbf16> to vector<1x16x32xbf16>
      tpu.vector_store %arg7[%c0_116, %c0_117, %c64_118], %159 {strides = array<i32>} : memref<1x16x128xbf16, #tpu.memory_space<vmem>>, vector<1x16x32xbf16>,
      %c0_119 = arith.constant 0 : index
      %c96_120 = arith.constant 96 : index
      %160 = vector.load %arg10[%c0_119, %c96_120] : memref<16x128xf32, #tpu.memory_space<vmem>>, vector<16x32xf32>
      %c0_121 = arith.constant 0 : index
      %c3_122 = arith.constant 3 : index
      %161 = vector.load %arg9[%c0_121, %c3_122] : memref<16x4xf32, #tpu.memory_space<vmem>>, vector<16x1xf32>
      %162 = vector.broadcast %161 : vector<16x1xf32> to vector<16x32xf32>
      %163 = arith.divf %160, %162 : vector<16x32xf32>
      %164 = arith.truncf %163 : vector<16x32xf32> to vector<16x32xbf16>
      %c0_123 = arith.constant 0 : index
      %c0_124 = arith.constant 0 : index
      %c96_125 = arith.constant 96 : index
      %165 = vector.load %arg7[%c0_123, %c0_124, %c96_125] : memref<1x16x128xbf16, #tpu.memory_space<vmem>>, vector<1x16x32xbf16>
      %166 = vector.shape_cast %165 : vector<1x16x32xbf16> to vector<16x32xbf16>
      %167 = vector.shape_cast %164 : vector<16x32xbf16> to vector<1x16x32xbf16>
      tpu.vector_store %arg7[%c0_123, %c0_124, %c96_125], %167 {strides = array<i32>} : memref<1x16x128xbf16, #tpu.memory_space<vmem>>, vector<1x16x32xbf16>,
    } else {
    }
    return
  }
  func.func @transform_0(%arg0: i32, %arg1: i32, %arg2: i32) -> (i32, i32, i32) {
    %c0_i32 = arith.constant 0 : i32
    %c0_i32_0 = arith.constant 0 : i32
    return %arg0, %arg1, %c0_i32 : i32, i32, i32
  }
  func.func @transform_1(%arg0: i32, %arg1: i32, %arg2: i32) -> (i32, i32, i32) {
    %c0_i32 = arith.constant 0 : i32
    %c0_i32_0 = arith.constant 0 : i32
    return %arg0, %arg2, %c0_i32 : i32, i32, i32
  }
  func.func @transform_2(%arg0: i32, %arg1: i32, %arg2: i32) -> (i32, i32, i32) {
    %c1_i32 = arith.constant 1 : i32
    %c0_i32 = arith.constant 0 : i32
    return %arg0, %arg2, %c1_i32 : i32, i32, i32
  }
  func.func @transform_3(%arg0: i32, %arg1: i32, %arg2: i32) -> (i32, i32, i32) {
    %c0_i32 = arith.constant 0 : i32
    %c0_i32_0 = arith.constant 0 : i32
    return %arg0, %c0_i32, %arg2 : i32, i32, i32
  }
  func.func @transform_4(%arg0: i32, %arg1: i32, %arg2: i32) -> (i32, i32, i32) {
    %c0_i32 = arith.constant 0 : i32
    %c0_i32_0 = arith.constant 0 : i32
    return %arg0, %arg1, %c0_i32 : i32, i32, i32
  }
}

module attributes {stable_mosaic.version = 11 : i64} {
  func.func @_linear_ln_res_kernel(%arg0: i32, %arg1: i32, %arg2: memref<32x256xbf16, #tpu.memory_space<vmem>>, %arg3: memref<256x128xbf16, #tpu.memory_space<vmem>>, %arg4: memref<1x128xf32, #tpu.memory_space<vmem>>, %arg5: memref<32x128xf32, #tpu.memory_space<vmem>>, %arg6: memref<1x128xf32, #tpu.memory_space<vmem>>, %arg7: memref<1x128xf32, #tpu.memory_space<vmem>>, %arg8: memref<32x128xf32, #tpu.memory_space<vmem>>, %arg9: memref<32x128xf32, #tpu.memory_space<vmem>>) attributes {dimension_semantics = [#tpu.dimension_semantics<parallel>, #tpu.dimension_semantics<arbitrary>], iteration_bounds = array<i64: 1, 1>, scalar_prefetch = 0 : i64, scratch_operands = 1 : i64, tpu.core_type = #tpu.core_type<tc>, window_params = [{transform_indices = @transform_0, window_bounds = array<i64: 32, 256>}, {transform_indices = @transform_1, window_bounds = array<i64: 256, 128>}, {pipeline_mode = #tpu.pipeline_mode<synchronous>, transform_indices = @transform_2, window_bounds = array<i64: 1, 128>}, {transform_indices = @transform_3, window_bounds = array<i64: 32, 128>}, {pipeline_mode = #tpu.pipeline_mode<synchronous>, transform_indices = @transform_4, window_bounds = array<i64: 1, 128>}, {pipeline_mode = #tpu.pipeline_mode<synchronous>, transform_indices = @transform_5, window_bounds = array<i64: 1, 128>}, {transform_indices = @transform_6, window_bounds = array<i64: 32, 128>}]} {
    %c0_i32 = arith.constant 0 : i32
    %0 = arith.cmpi eq, %arg1, %c0_i32 : i32
    %1 = arith.extui %0 : i1 to i32
    %c0_i32_0 = arith.constant 0 : i32
    %2 = arith.cmpi ne, %1, %c0_i32_0 : i32
    scf.if %2 {
      %cst_10 = arith.constant 0.000000e+00 : f32
      %12 = vector.broadcast %cst_10 : f32 to vector<32x128xf32>
      %c0_11 = arith.constant 0 : index
      %c0_12 = arith.constant 0 : index
      %13 = vector.load %arg9[%c0_11, %c0_12] : memref<32x128xf32, #tpu.memory_space<vmem>>, vector<32x128xf32>
      tpu.vector_store %arg9[%c0_11, %c0_12], %12 {strides = array<i32>} : memref<32x128xf32, #tpu.memory_space<vmem>>, vector<32x128xf32>,
    } else {
    }
    %c0 = arith.constant 0 : index
    %c0_1 = arith.constant 0 : index
    %3 = vector.load %arg9[%c0, %c0_1] : memref<32x128xf32, #tpu.memory_space<vmem>>, vector<32x128xf32>
    %c0_2 = arith.constant 0 : index
    %c0_3 = arith.constant 0 : index
    %4 = vector.load %arg2[%c0_2, %c0_3] : memref<32x256xbf16, #tpu.memory_space<vmem>>, vector<32x256xbf16>
    %c0_4 = arith.constant 0 : index
    %c0_5 = arith.constant 0 : index
    %5 = vector.load %arg3[%c0_4, %c0_5] : memref<256x128xbf16, #tpu.memory_space<vmem>>, vector<256x128xbf16>
    %cst = arith.constant dense<0.000000e+00> : vector<32x128xf32>
    %6 = tpu.matmul %4, %5, %cst {dimension_numbers = #tpu.dot_dimension_numbers<[1], [0], [0], [1], [0, 0, 1, 1], [], []>} : vector<32x256xbf16>, vector<256x128xbf16>, vector<32x128xf32> -> vector<32x128xf32>
    %7 = arith.addf %3, %6 : vector<32x128xf32>
    %c0_6 = arith.constant 0 : index
    %c0_7 = arith.constant 0 : index
    %8 = vector.load %arg9[%c0_6, %c0_7] : memref<32x128xf32, #tpu.memory_space<vmem>>, vector<32x128xf32>
    tpu.vector_store %arg9[%c0_6, %c0_7], %7 {strides = array<i32>} : memref<32x128xf32, #tpu.memory_space<vmem>>, vector<32x128xf32>,
    %c0_i32_8 = arith.constant 0 : i32
    %9 = arith.cmpi eq, %arg1, %c0_i32_8 : i32
    %10 = arith.extui %9 : i1 to i32
    %c0_i32_9 = arith.constant 0 : i32
    %11 = arith.cmpi ne, %10, %c0_i32_9 : i32
    scf.if %11 {
      %c0_10 = arith.constant 0 : index
      %c0_11 = arith.constant 0 : index
      %12 = vector.load %arg9[%c0_10, %c0_11] : memref<32x128xf32, #tpu.memory_space<vmem>>, vector<32x128xf32>
      %c0_12 = arith.constant 0 : index
      %c0_13 = arith.constant 0 : index
      %13 = vector.load %arg4[%c0_12, %c0_13] : memref<1x128xf32, #tpu.memory_space<vmem>>, vector<1x128xf32>
      %14 = vector.broadcast %13 : vector<1x128xf32> to vector<32x128xf32>
      %15 = arith.addf %12, %14 : vector<32x128xf32>
      %c0_14 = arith.constant 0 : index
      %c0_15 = arith.constant 0 : index
      %16 = vector.load %arg5[%c0_14, %c0_15] : memref<32x128xf32, #tpu.memory_space<vmem>>, vector<32x128xf32>
      %17 = arith.addf %15, %16 : vector<32x128xf32>
      %cst_16 = arith.constant dense<0.000000e+00> : vector<32xf32>
      %18 = vector.multi_reduction <add>, %17, %cst_16 [1] : vector<32x128xf32> to vector<32xf32>
      %19 = vector.shape_cast %18 : vector<32xf32> to vector<32x1xf32>
      %cst_17 = arith.constant 1.280000e+02 : f32
      %20 = vector.broadcast %cst_17 : f32 to vector<32x1xf32>
      %21 = arith.divf %19, %20 : vector<32x1xf32>
      %22 = vector.broadcast %21 : vector<32x1xf32> to vector<32x128xf32>
      %23 = arith.subf %17, %22 : vector<32x128xf32>
      %24 = arith.mulf %23, %23 : vector<32x128xf32>
      %cst_18 = arith.constant dense<0.000000e+00> : vector<32xf32>
      %25 = vector.multi_reduction <add>, %24, %cst_18 [1] : vector<32x128xf32> to vector<32xf32>
      %26 = vector.shape_cast %25 : vector<32xf32> to vector<32x1xf32>
      %cst_19 = arith.constant 1.280000e+02 : f32
      %27 = vector.broadcast %cst_19 : f32 to vector<32x1xf32>
      %28 = arith.divf %26, %27 : vector<32x1xf32>
      %29 = vector.broadcast %21 : vector<32x1xf32> to vector<32x128xf32>
      %30 = arith.subf %17, %29 : vector<32x128xf32>
      %cst_20 = arith.constant 9.99999974E-6 : f32
      %31 = vector.broadcast %cst_20 : f32 to vector<32x1xf32>
      %32 = arith.addf %28, %31 : vector<32x1xf32>
      %33 = math.rsqrt %32 : vector<32x1xf32>
      %34 = vector.broadcast %33 : vector<32x1xf32> to vector<32x128xf32>
      %35 = arith.mulf %30, %34 : vector<32x128xf32>
      %c0_21 = arith.constant 0 : index
      %c0_22 = arith.constant 0 : index
      %36 = vector.load %arg6[%c0_21, %c0_22] : memref<1x128xf32, #tpu.memory_space<vmem>>, vector<1x128xf32>
      %37 = vector.broadcast %36 : vector<1x128xf32> to vector<32x128xf32>
      %38 = arith.mulf %35, %37 : vector<32x128xf32>
      %c0_23 = arith.constant 0 : index
      %c0_24 = arith.constant 0 : index
      %39 = vector.load %arg7[%c0_23, %c0_24] : memref<1x128xf32, #tpu.memory_space<vmem>>, vector<1x128xf32>
      %40 = vector.broadcast %39 : vector<1x128xf32> to vector<32x128xf32>
      %41 = arith.addf %38, %40 : vector<32x128xf32>
      %c0_25 = arith.constant 0 : index
      %c0_26 = arith.constant 0 : index
      %42 = vector.load %arg8[%c0_25, %c0_26] : memref<32x128xf32, #tpu.memory_space<vmem>>, vector<32x128xf32>
      tpu.vector_store %arg8[%c0_25, %c0_26], %41 {strides = array<i32>} : memref<32x128xf32, #tpu.memory_space<vmem>>, vector<32x128xf32>,
    } else {
    }
    return
  }
  func.func @transform_0(%arg0: i32, %arg1: i32) -> (i32, i32) {
    %c0_i32 = arith.constant 0 : i32
    return %arg0, %arg1 : i32, i32
  }
  func.func @transform_1(%arg0: i32, %arg1: i32) -> (i32, i32) {
    %c0_i32 = arith.constant 0 : i32
    %c0_i32_0 = arith.constant 0 : i32
    return %arg1, %c0_i32 : i32, i32
  }
  func.func @transform_2(%arg0: i32, %arg1: i32) -> (i32, i32) {
    %c0_i32 = arith.constant 0 : i32
    %c0_i32_0 = arith.constant 0 : i32
    %c0_i32_1 = arith.constant 0 : i32
    return %c0_i32, %c0_i32_0 : i32, i32
  }
  func.func @transform_3(%arg0: i32, %arg1: i32) -> (i32, i32) {
    %c0_i32 = arith.constant 0 : i32
    %c0_i32_0 = arith.constant 0 : i32
    return %arg0, %c0_i32 : i32, i32
  }
  func.func @transform_4(%arg0: i32, %arg1: i32) -> (i32, i32) {
    %c0_i32 = arith.constant 0 : i32
    %c0_i32_0 = arith.constant 0 : i32
    %c0_i32_1 = arith.constant 0 : i32
    return %c0_i32, %c0_i32_0 : i32, i32
  }
  func.func @transform_5(%arg0: i32, %arg1: i32) -> (i32, i32) {
    %c0_i32 = arith.constant 0 : i32
    %c0_i32_0 = arith.constant 0 : i32
    %c0_i32_1 = arith.constant 0 : i32
    return %c0_i32, %c0_i32_0 : i32, i32
  }
  func.func @transform_6(%arg0: i32, %arg1: i32) -> (i32, i32) {
    %c0_i32 = arith.constant 0 : i32
    %c0_i32_0 = arith.constant 0 : i32
    return %arg0, %c0_i32 : i32, i32
  }
}

module attributes {stable_mosaic.version = 11 : i64} {
  func.func @_matmul_bias_kernel(%arg0: i32, %arg1: i32, %arg2: i32, %arg3: memref<32x128xf32, #tpu.memory_space<vmem>>, %arg4: memref<128x128xbf16, #tpu.memory_space<vmem>>, %arg5: memref<1x128xf32, #tpu.memory_space<vmem>>, %arg6: memref<32x128xf32, #tpu.memory_space<vmem>>, %arg7: memref<32x128xf32, #tpu.memory_space<vmem>>) attributes {dimension_semantics = [#tpu.dimension_semantics<parallel>, #tpu.dimension_semantics<parallel>, #tpu.dimension_semantics<arbitrary>], iteration_bounds = array<i64: 1, 1, 1>, scalar_prefetch = 0 : i64, scratch_operands = 1 : i64, tpu.core_type = #tpu.core_type<tc>, window_params = [{transform_indices = @transform_0, window_bounds = array<i64: 32, 128>}, {transform_indices = @transform_1, window_bounds = array<i64: 128, 128>}, {transform_indices = @transform_2, window_bounds = array<i64: 1, 128>}, {transform_indices = @transform_3, window_bounds = array<i64: 32, 128>}]} {
    %c0_i32 = arith.constant 0 : i32
    %0 = arith.cmpi eq, %arg2, %c0_i32 : i32
    %1 = arith.extui %0 : i1 to i32
    %c0_i32_0 = arith.constant 0 : i32
    %2 = arith.cmpi ne, %1, %c0_i32_0 : i32
    scf.if %2 {
      %cst_10 = arith.constant 0.000000e+00 : f32
      %13 = vector.broadcast %cst_10 : f32 to vector<32x128xf32>
      %c0_11 = arith.constant 0 : index
      %c0_12 = arith.constant 0 : index
      %14 = vector.load %arg7[%c0_11, %c0_12] : memref<32x128xf32, #tpu.memory_space<vmem>>, vector<32x128xf32>
      tpu.vector_store %arg7[%c0_11, %c0_12], %13 {strides = array<i32>} : memref<32x128xf32, #tpu.memory_space<vmem>>, vector<32x128xf32>,
    } else {
    }
    %c0 = arith.constant 0 : index
    %c0_1 = arith.constant 0 : index
    %3 = vector.load %arg7[%c0, %c0_1] : memref<32x128xf32, #tpu.memory_space<vmem>>, vector<32x128xf32>
    %c0_2 = arith.constant 0 : index
    %c0_3 = arith.constant 0 : index
    %4 = vector.load %arg3[%c0_2, %c0_3] : memref<32x128xf32, #tpu.memory_space<vmem>>, vector<32x128xf32>
    %5 = arith.truncf %4 : vector<32x128xf32> to vector<32x128xbf16>
    %c0_4 = arith.constant 0 : index
    %c0_5 = arith.constant 0 : index
    %6 = vector.load %arg4[%c0_4, %c0_5] : memref<128x128xbf16, #tpu.memory_space<vmem>>, vector<128x128xbf16>
    %cst = arith.constant dense<0.000000e+00> : vector<32x128xf32>
    %7 = tpu.matmul %5, %6, %cst {dimension_numbers = #tpu.dot_dimension_numbers<[1], [0], [0], [1], [0, 0, 1, 1], [], []>} : vector<32x128xbf16>, vector<128x128xbf16>, vector<32x128xf32> -> vector<32x128xf32>
    %8 = arith.addf %3, %7 : vector<32x128xf32>
    %c0_6 = arith.constant 0 : index
    %c0_7 = arith.constant 0 : index
    %9 = vector.load %arg7[%c0_6, %c0_7] : memref<32x128xf32, #tpu.memory_space<vmem>>, vector<32x128xf32>
    tpu.vector_store %arg7[%c0_6, %c0_7], %8 {strides = array<i32>} : memref<32x128xf32, #tpu.memory_space<vmem>>, vector<32x128xf32>,
    %c0_i32_8 = arith.constant 0 : i32
    %10 = arith.cmpi eq, %arg2, %c0_i32_8 : i32
    %11 = arith.extui %10 : i1 to i32
    %c0_i32_9 = arith.constant 0 : i32
    %12 = arith.cmpi ne, %11, %c0_i32_9 : i32
    scf.if %12 {
      %c0_10 = arith.constant 0 : index
      %c0_11 = arith.constant 0 : index
      %13 = vector.load %arg7[%c0_10, %c0_11] : memref<32x128xf32, #tpu.memory_space<vmem>>, vector<32x128xf32>
      %c0_12 = arith.constant 0 : index
      %c0_13 = arith.constant 0 : index
      %14 = vector.load %arg5[%c0_12, %c0_13] : memref<1x128xf32, #tpu.memory_space<vmem>>, vector<1x128xf32>
      %15 = vector.broadcast %14 : vector<1x128xf32> to vector<32x128xf32>
      %16 = arith.addf %13, %15 : vector<32x128xf32>
      %c0_14 = arith.constant 0 : index
      %c0_15 = arith.constant 0 : index
      %17 = vector.load %arg6[%c0_14, %c0_15] : memref<32x128xf32, #tpu.memory_space<vmem>>, vector<32x128xf32>
      tpu.vector_store %arg6[%c0_14, %c0_15], %16 {strides = array<i32>} : memref<32x128xf32, #tpu.memory_space<vmem>>, vector<32x128xf32>,
    } else {
    }
    return
  }
  func.func @transform_0(%arg0: i32, %arg1: i32, %arg2: i32) -> (i32, i32) {
    %c0_i32 = arith.constant 0 : i32
    return %arg0, %arg2 : i32, i32
  }
  func.func @transform_1(%arg0: i32, %arg1: i32, %arg2: i32) -> (i32, i32) {
    %c0_i32 = arith.constant 0 : i32
    return %arg2, %arg1 : i32, i32
  }
  func.func @transform_2(%arg0: i32, %arg1: i32, %arg2: i32) -> (i32, i32) {
    %c0_i32 = arith.constant 0 : i32
    %c0_i32_0 = arith.constant 0 : i32
    return %c0_i32, %arg1 : i32, i32
  }
  func.func @transform_3(%arg0: i32, %arg1: i32, %arg2: i32) -> (i32, i32) {
    %c0_i32 = arith.constant 0 : i32
    return %arg0, %arg1 : i32, i32
  }
}

</mosaic_0001>

<bundles_post_ra>
// kernel: transformer_core_forward.22
= control target key start
LH: loop header
LB: loop body
LE: loop exit
PB: predicated region body
PF: predicated region fallthrough
CT: control target
= control target key end

     0   :  { %s433_s1 = inlined_call_operand.vmem [shape: bf16[128,128], index: 1, kind: input, shape index: {}]   ;;  %s434_s0 = inlined_call_operand.vmem [shape: bf16[32,128], index: 0, kind: input, shape index: {}]   ;;  %s435_s2 = inlined_call_operand.vmem [shape: f32[1,128], index: 2, kind: input, shape index: {}]   ;;  %s436_s3 = inlined_call_operand.vmem [shape: f32[32,128], index: 3, kind: input, shape index: {}]   ;;  %s437_s4 = inlined_call_operand.vmem [shape: f32[1,128], index: 4, kind: input, shape index: {}]   ;;  %s438_s5 = inlined_call_operand.vmem [shape: f32[1,128], index: 5, kind: input, shape index: {}]   ;;  %s439_s6 = inlined_call_operand.vmem [shape: f32[32,128], index: 6, kind: output, shape index: {}]  }
   0x1   :  { %v317_v0 = vld [vmem:[%s433_s1] sm:$0xff]   ;;  %v318_v1 = vld [vmem:[%s433_s1 + $0x8] sm:$0xff]   ;;  %v319_v2 = vld [vmem:[%s433_s1 + $0x10] sm:$0xff]  }
   0x2   :  { %297 = vmatprep.subr.bf16.mxu0 %v317_v0  ;;  %v320_v3 = vld [vmem:[%s433_s1 + $0x18] sm:$0xff]   ;;  %v325_v4 = vld [vmem:[%s434_s0] sm:$0xff]   ;;  %v322_v6 = vld [vmem:[%s433_s1 + $0x28] sm:$0xff]  }
   0x3   :  { %298 = vmatpush3.bf16.msra.mxu0 %v317_v0  ;;  %313 = vmatprep.mubr.bf16.mxu0 %v325_v4  ;;  %v321_v5 = vld [vmem:[%s433_s1 + $0x20] sm:$0xff]   ;;  %v323_v7 = vld [vmem:[%s433_s1 + $0x30] sm:$0xff]   ;;  %v324_v8 = vld [vmem:[%s433_s1 + $0x38] sm:$0xff]  }
   0x4   :  { %299 = vmatprep.subr.bf16.mxu0 %v318_v1  ;;  %v326_v9 = vld [vmem:[%s434_s0 + $0x8] sm:$0xff]   ;;  %v284_v10 = vld [vmem:[%s435_s2] ss:$0 sm:$0xff]  ;;  %v193_v12 = vld [vmem:[%s436_s3 + $0x10] sm:$0xff] }
   0x5   :  { %v191_v15 = vld [vmem:[%s436_s3] sm:$0xff]  ;;  %v194_v23 = vld [vmem:[%s436_s3 + $0x18] sm:$0xff]  ;;  %v192_v24 = vld [vmem:[%s436_s3 + $0x8] sm:$0xff] }
   0x6   :  { %v285_v56 = vld [vmem:[%s437_s4] ss:$0 sm:$0xff] }
   0x7   :  { %300 = vmatpush3.bf16.msra.mxu0 %v318_v1  ;;  %v286_v58 = vld [vmem:[%s438_s5] ss:$0 sm:$0xff] }
   0x8   :  { %301 = vmatprep.subr.bf16.mxu0 %v319_v2 }
   0xb   :  { %302 = vmatpush3.bf16.msra.mxu0 %v319_v2 }
   0xc   :  { %303 = vmatprep.subr.bf16.mxu0 %v320_v3 }
   0xf   :  { %304 = vmatpush3.bf16.msra.mxu0 %v320_v3 }
  0x10   :  { %305 = vmatprep.subr.bf16.mxu0 %v321_v5 }
  0x13   :  { %306 = vmatpush3.bf16.msra.mxu0 %v321_v5 }
  0x14   :  { %307 = vmatprep.subr.bf16.mxu0 %v322_v6 }
  0x17   :  { %308 = vmatpush3.bf16.msra.mxu0 %v322_v6 }
  0x18   :  { %309 = vmatprep.subr.bf16.mxu0 %v323_v7 }
  0x1b   :  { %310 = vmatpush3.bf16.msra.mxu0 %v323_v7 }
  0x1c   :  { %311 = vmatprep.subr.bf16.mxu0 %v324_v8 }
  0x1f   :  { %312 = vmatpush3.bf16.msra.mxu0 %v324_v8 }
  0x22   :  { %314 = vmatmul.mubr.bf16.vlgmr.msra.gmra.mrb[0].mxu0 %v326_v9 }
  0xf5   :  { %v315_v11 = vpop.f32.mrb[0].mxu0 }
  0xf6   :  { %v189_v13 = vadd.f32 %v315_v11, %v284_v10  ;;  %v150_v14 = vpop.f32.mrb[1].mxu0 }
  0xf7   :  { %v187_v16 = vadd.f32 %v284_v10, %v150_v14  ;;  %v316_v17 = vpop.f32.mrb[2].mxu0 }
  0xf8   :  { %v190_v18 = vadd.f32 %v316_v17, %v284_v10  ;;  %v153_v19 = vpop.f32.mrb[3].mxu0  ;;  %v197_v20 = vadd.f32 %v193_v12, %v189_v13 }
  0xf9   :  { %v188_v21 = vadd.f32 %v284_v10, %v153_v19  ;;  %v195_v22 = vadd.f32 %v191_v15, %v187_v16 }
  0xfa   :  { %203 = vadd.xlane.f32.xlu1 %v197_v20  ;;  %v198_v25 = vadd.f32 %v194_v23, %v190_v18 }
  0xfb   :  { %199 = vadd.xlane.f32.xlu0 %v195_v22  ;;  %v196_v26 = vadd.f32 %v192_v24, %v188_v21 }
  0xfe   :  { %205 = vadd.xlane.f32.xlu1 %v198_v25 }
  0xff   :  { %201 = vadd.xlane.f32.xlu0 %v196_v26 }
 0x187   :  { %v204_v27 = vpop.xlane.xlu1 %203 }
 0x188   :  { %v200_v28 = vpop.xlane.xlu0 %199  ;;  %v210_v29 = vmul.f32 0.0078125, %v204_v27 }
 0x189   :  { %v208_v30 = vmul.f32 0.0078125, %v200_v28 }
 0x18a   :  { %v214_v34 = vsub.f32 %v197_v20, %v210_v29 }
 0x18b   :  { %v212_v31 = vsub.f32 %v195_v22, %v208_v30  ;;  %v206_v32 = vpop.xlane.xlu1 %205 }
 0x18c   :  { %v202_v33 = vpop.xlane.xlu0 %201  ;;  %v211_v35 = vmul.f32 0.0078125, %v206_v32  ;;  %v218_v40 = vmul.f32 %v214_v34, %v214_v34 }
 0x18d   :  { %v209_v36 = vmul.f32 0.0078125, %v202_v33  ;;  %v216_v37 = vmul.f32 %v212_v31, %v212_v31 }
 0x18e   :  { %v215_v39 = vsub.f32 %v198_v25, %v211_v35 }
 0x18f   :  { %v213_v38 = vsub.f32 %v196_v26, %v209_v36  ;;  %220 = vadd.xlane.f32.xlu0 %v216_v37 }
 0x190   :  { %v219_v42 = vmul.f32 %v215_v39, %v215_v39 }
 0x191   :  { %v217_v41 = vmul.f32 %v213_v38, %v213_v38 }
 0x193   :  { %224 = vadd.xlane.f32.xlu0 %v218_v40  ;;  %222 = vadd.xlane.f32.xlu1 %v217_v41 }
 0x197   :  { %226 = vadd.xlane.f32.xlu1 %v219_v42 }
 0x21c   :  { %v221_v43 = vpop.xlane.xlu0 %220 }
 0x21d   :  { %v228_v44 = vmul.f32 0.0078125, %v221_v43 }
 0x21f   :  { %v232_v45 = vadd.f32 1e-05, %v228_v44 }
 0x220   :  { %v223_v46 = vpop.xlane.xlu1 %222  ;;  %v225_v47 = vpop.xlane.xlu0 %224 }
 0x221   :  { %327 = vrsqrt.f32 %v232_v45  ;;  %v229_v48 = vmul.f32 0.0078125, %v223_v46  ;;  %v230_v49 = vmul.f32 0.0078125, %v225_v47 }
 0x223   :  { %v233_v50 = vadd.f32 1e-05, %v229_v48  ;;  %v234_v51 = vadd.f32 1e-05, %v230_v49 }
 0x224   :  { %v227_v52 = vpop.xlane.xlu1 %226 }
 0x225   :  { %329 = vrsqrt.f32 %v233_v50  ;;  %v231_v53 = vmul.f32 0.0078125, %v227_v52 }
 0x226   :  { %331 = vrsqrt.f32 %v234_v51 }
 0x227   :  { %v235_v54 = vadd.f32 1e-05, %v231_v53 }
 0x229   :  { %333 = vrsqrt.f32 %v235_v54 }
 0x22b   :  { %v328_v55 = vpop.eup %327 }
 0x22c   :  { %v240_v57 = vmul.f32 %v328_v55, %v212_v31 }
 0x22e   :  { %v251_v59 = vmul.f32 %v285_v56, %v240_v57 }
 0x22f   :  { %v330_v60 = vpop.eup %329 }
 0x230   :  { %v332_v61 = vpop.eup %331  ;;  %v262_v62 = vadd.f32 %v286_v58, %v251_v59  ;;  %v241_v63 = vmul.f32 %v330_v60, %v213_v38 }
 0x231   :  { %v242_v0 = vmul.f32 %v332_v61, %v214_v34 }
 0x232   :  { %266 = vst [vmem:[%s439_s6] sm:$0xff] %v262_v62  ;;  %v252_v1 = vmul.f32 %v285_v56, %v241_v63 }
 0x233   :  { %v334_v2 = vpop.eup %333  ;;  %v253_v3 = vmul.f32 %v285_v56, %v242_v0 }
 0x234   :  { %v263_v4 = vadd.f32 %v286_v58, %v252_v1  ;;  %v243_v5 = vmul.f32 %v334_v2, %v215_v39 }
 0x235   :  { %v264_v6 = vadd.f32 %v286_v58, %v253_v3 }
 0x236   :  { %267 = vst [vmem:[%s439_s6 + $0x8] sm:$0xff] %v263_v4  ;;  %v254_v7 = vmul.f32 %v285_v56, %v243_v5 }
 0x237   :  { %268 = vst [vmem:[%s439_s6 + $0x10] sm:$0xff] %v264_v6 }
 0x238   :  { %v265_v8 = vadd.f32 %v286_v58, %v254_v7 }
 0x23a   :  { %269 = vst [vmem:[%s439_s6 + $0x18] sm:$0xff] %v265_v8 }

// kernel: transformer_core_forward.23
= control target key start
LH: loop header
LB: loop body
LE: loop exit
PB: predicated region body
PF: predicated region fallthrough
CT: control target
= control target key end

     0   :  { %s327_s1 = inlined_call_operand.vmem [shape: bf16[128,128], index: 1, kind: input, shape index: {}]   ;;  %s328_s0 = inlined_call_operand.vmem [shape: f32[32,128], index: 0, kind: input, shape index: {}]   ;;  %s329_s2 = inlined_call_operand.vmem [shape: f32[1,128], index: 2, kind: input, shape index: {}]   ;;  %s330_s3 = inlined_call_operand.vmem [shape: bf16[32,128], index: 3, kind: output, shape index: {}]  }
   0x1   :  { %v254_v0 = vld [vmem:[%s327_s1] sm:$0xff]   ;;  %v255_v1 = vld [vmem:[%s327_s1 + $0x8] sm:$0xff]   ;;  %v256_v2 = vld [vmem:[%s327_s1 + $0x10] sm:$0xff]  }
   0x2   :  { %234 = vmatprep.subr.bf16.mxu0 %v254_v0  ;;  %v257_v3 = vld [vmem:[%s327_s1 + $0x18] sm:$0xff]   ;;  %v27_v4 = vld [vmem:[%s328_s0] sm:$0xff]  ;;  %v28_v5 = vld [vmem:[%s328_s0 + $0x8] sm:$0xff] }
   0x3   :  { %235 = vmatpush3.bf16.msra.mxu0 %v254_v0  ;;  %v31_v6 = vpack.c.bf16 %v28_v5, %v27_v4  ;;  %v258_v7 = vld [vmem:[%s327_s1 + $0x20] sm:$0xff]   ;;  %v259_v8 = vld [vmem:[%s327_s1 + $0x28] sm:$0xff]   ;;  %v260_v9 = vld [vmem:[%s327_s1 + $0x30] sm:$0xff]  }
   0x4   :  { %236 = vmatprep.subr.bf16.mxu0 %v255_v1  ;;  %v261_v10 = vld [vmem:[%s327_s1 + $0x38] sm:$0xff]   ;;  %v29_v11 = vld [vmem:[%s328_s0 + $0x10] sm:$0xff]  ;;  %v204_v15 = vld [vmem:[%s329_s2] ss:$0 sm:$0xff] }
   0x5   :  { %250 = vmatprep.mubr.bf16.mxu0 %v31_v6  ;;  %v30_v12 = vld [vmem:[%s328_s0 + $0x18] sm:$0xff] }
   0x6   :  { %v32_v13 = vpack.c.bf16 %v30_v12, %v29_v11 }
   0x7   :  { %237 = vmatpush3.bf16.msra.mxu0 %v255_v1 }
   0x8   :  { %238 = vmatprep.subr.bf16.mxu0 %v256_v2 }
   0xb   :  { %239 = vmatpush3.bf16.msra.mxu0 %v256_v2 }
   0xc   :  { %240 = vmatprep.subr.bf16.mxu0 %v257_v3 }
   0xf   :  { %241 = vmatpush3.bf16.msra.mxu0 %v257_v3 }
  0x10   :  { %242 = vmatprep.subr.bf16.mxu0 %v258_v7 }
  0x13   :  { %243 = vmatpush3.bf16.msra.mxu0 %v258_v7 }
  0x14   :  { %244 = vmatprep.subr.bf16.mxu0 %v259_v8 }
  0x17   :  { %245 = vmatpush3.bf16.msra.mxu0 %v259_v8 }
  0x18   :  { %246 = vmatprep.subr.bf16.mxu0 %v260_v9 }
  0x1b   :  { %247 = vmatpush3.bf16.msra.mxu0 %v260_v9 }
  0x1c   :  { %248 = vmatprep.subr.bf16.mxu0 %v261_v10 }
  0x1f   :  { %249 = vmatpush3.bf16.msra.mxu0 %v261_v10 }
  0x22   :  { %251 = vmatmul.mubr.bf16.vlgmr.msra.gmra.mrb[0].mxu0 %v32_v13 }
  0xf5   :  { %v252_v14 = vpop.f32.mrb[0].mxu0 }
  0xf6   :  { %v131_v16 = vpop.f32.mrb[1].mxu0  ;;  %v170_v18 = vadd.f32 %v252_v14, %v204_v15 }
  0xf7   :  { %v253_v17 = vpop.f32.mrb[2].mxu0  ;;  %v168_v21 = vadd.f32 %v204_v15, %v131_v16 }
  0xf8   :  { %v171_v19 = vadd.f32 %v253_v17, %v204_v15  ;;  %v134_v20 = vpop.f32.mrb[3].mxu0 }
  0xf9   :  { %v169_v22 = vadd.f32 %v204_v15, %v134_v20 }
  0xfa   :  { %v221_v23 = vpack.c.bf16 %v171_v19, %v170_v18 }
  0xfb   :  { %v216_v24 = vpack.c.bf16 %v169_v22, %v168_v21 }
  0xfc   :  { %223 = vst [vmem:[%s330_s3 + $0x8] sm:$0xff] %v221_v23  }
  0xfd   :  { %217 = vst [vmem:[%s330_s3] sm:$0xff] %v216_v24  }

// kernel: transformer_core_forward.20
= control target key start
LH: loop header
LB: loop body
LE: loop exit
PB: predicated region body
PF: predicated region fallthrough
CT: control target
= control target key end

     0   :  { %s861_s12 = smov 0   ;;  %s863_s13 = smov 0   ;;  %s972_s0 = inlined_call_operand.vmem [shape: f32[32,128], index: 0, kind: input, shape index: {}]   ;;  %s973_s1 = inlined_call_operand.vmem [shape: bf16[128,384], index: 1, kind: input, shape index: {}]   ;;  %s974_s2 = inlined_call_operand.vmem [shape: f32[1,384], index: 2, kind: input, shape index: {}]   ;;  %s975_s3 = inlined_call_operand.vmem [shape: bf16[32,384], index: 3, kind: output, shape index: {}]  }
   0x1   :  { %s865_s14 = smov 0   ;;  %s867_s15 = smov 0  }
   0x2   :  { %s869_s16 = smov 0  }
   0x3 LB: > { %s28_s17 = sadd.s32 1, %s835_s15  ;;  %s681_s18 = sadd.s32 4294967295, %s839_s16   ;;  %s839_s16 = sphi %s869_s16, %s13_s16   ;;  %s835_s15 = sphi %s867_s15, %s980_s15   ;;  %s831_s14 = sphi %s865_s14, %s979_s14   ;;  %s827_s13 = sphi %s863_s13, %s978_s13   ;;  %s823_s12 = sphi %s861_s12, %s977_s12  }
   0x4   : > { %p30_p0 = scmp.ge.s32.totalorder %s28_s17, 3  ;;  %p76_p1 = scmp.ne.s32.totalorder %s827_s13, %s823_s12 }
   0x5   : > { %p77_p2 = scmp.eq.s32.totalorder %s839_s16, 0  ;;  %p134_p4 = scmp.eq.s32.totalorder %s681_s18, 2 }
   0x6   : > { %s982_s17 = smov (%p30_p0, %s28_s17), 0  ;;  %s69_s20 = sadd.s32 1, %s827_s13 }
   0x7   : > { %p78_p3 = por %p77_p2, %p76_p1  ;;  %s65_s19 = ssub.s32 %s835_s15, %s982_s17 }
   0x8   : > { %p67_p5 = scmp.eq.s32.totalorder %s65_s19, 0  ;;  %p896_p6 = por %p134_p4, %p76_p1 }
   0x9   : > { %p685_p7 = scmp.ge.s32.totalorder %s839_s16, 3 }
   0xa   : > { %s901_s22 = scalar_select %p67_p5, %s827_s13, %s69_s20  }
   0xb   : > { %168 = sbr.rel (%p685_p7) target bundleno = 32 (0x20), region = 20 }
  0x12   : > { %171 = sbr.rel (!%p78_p3) target bundleno = 32 (0x20), region = 24  ;;  %s173_s23 = sand.u32 (%p78_p3), 1, %s827_s13  }
  0x13   : > { %s687_s24 = sshll.u32 (%p78_p3), %s835_s15, 2  ;;  %s686_s25 = sshll.u32 (%p78_p3), %s173_s23, 6 }
  0x14   : > { %s909_s28 = scalar_lea.vmem (%p78_p3), %s973_s1, %s687_s24  ;;  %s175_s29 = scalar_lea.vmem (%p78_p3), [#allocation3], %s686_s25 }
  0x15   : > { %v196_v0 = vld [vmem:[%s909_s28] sm:$0xf] (%p78_p3)  ;;  %v198_v1 = vld [vmem:[%s909_s28 + $0xc] sm:$0xf] (%p78_p3)  ;;  %v200_v2 = vld [vmem:[%s909_s28 + $0x18] sm:$0xf] (%p78_p3) }
  0x16   : > { %197 = vst [vmem:[%s175_s29] sm:$0xf] (%p78_p3), %v196_v0  ;;  %199 = vst [vmem:[%s175_s29 + $0x4] sm:$0xf] (%p78_p3), %v198_v1  ;;  %v202_v3 = vld [vmem:[%s909_s28 + $0x24] sm:$0xf] (%p78_p3) }
  0x17   : > { %v204_v4 = vld [vmem:[%s909_s28 + $0x30] sm:$0xf] (%p78_p3)  ;;  %201 = vst [vmem:[%s175_s29 + $0x8] sm:$0xf] (%p78_p3), %v200_v2  ;;  %203 = vst [vmem:[%s175_s29 + $0xc] sm:$0xf] (%p78_p3), %v202_v3 }
  0x18   : > { %205 = vst [vmem:[%s175_s29 + $0x10] sm:$0xf] (%p78_p3), %v204_v4  ;;  %v206_v5 = vld [vmem:[%s909_s28 + $0x3c] sm:$0xf] (%p78_p3)  ;;  %v208_v6 = vld [vmem:[%s909_s28 + $0x48] sm:$0xf] (%p78_p3) }
  0x19   : > { %v210_v7 = vld [vmem:[%s909_s28 + $0x54] sm:$0xf]  ;;  %207 = vst [vmem:[%s175_s29 + $0x14] sm:$0xf] %v206_v5  ;;  %209 = vst [vmem:[%s175_s29 + $0x18] sm:$0xf] %v208_v6 }
  0x1a   : > { %211 = vst [vmem:[%s175_s29 + $0x1c] sm:$0xf] %v210_v7  ;;  %v212_v8 = vld [vmem:[%s909_s28 + $0x60] sm:$0xf]  ;;  %v214_v9 = vld [vmem:[%s909_s28 + $0x6c] sm:$0xf] }
  0x1b   : > { %v216_v10 = vld [vmem:[%s909_s28 + $0x78] sm:$0xf]  ;;  %213 = vst [vmem:[%s175_s29 + $0x20] sm:$0xf] %v212_v8  ;;  %215 = vst [vmem:[%s175_s29 + $0x24] sm:$0xf] %v214_v9 }
  0x1c   : > { %217 = vst [vmem:[%s175_s29 + $0x28] sm:$0xf] %v216_v10  ;;  %v218_v11 = vld [vmem:[%s909_s28 + $0x84] sm:$0xf]  ;;  %v220_v12 = vld [vmem:[%s909_s28 + $0x90] sm:$0xf] }
  0x1d   : > { %v222_v13 = vld [vmem:[%s909_s28 + $0x9c] sm:$0xf]  ;;  %219 = vst [vmem:[%s175_s29 + $0x2c] sm:$0xf] %v218_v11  ;;  %221 = vst [vmem:[%s175_s29 + $0x30] sm:$0xf] %v220_v12 }
  0x1e   : > { %223 = vst [vmem:[%s175_s29 + $0x34] sm:$0xf] %v222_v13  ;;  %v224_v14 = vld [vmem:[%s909_s28 + $0xa8] sm:$0xf]  ;;  %v226_v15 = vld [vmem:[%s909_s28 + $0xb4] sm:$0xf] }
  0x1f   : > { %225 = vst [vmem:[%s175_s29 + $0x38] sm:$0xf] %v224_v14  ;;  %227 = vst [vmem:[%s175_s29 + $0x3c] sm:$0xf] %v226_v15 }
  0x20 PF: > { %p688_p8 = scmp.ge.s32.totalorder %s839_s16, 1  ;;  %p287_p9 = scmp.lt.s32.totalorder %s839_s16, 4 }
  0x22   : > { %p288_p10 = pnand %p688_p8, %p287_p9 }
  0x23   : > { %s294_s30 = sand.u32 (!%p288_p10), 1, %s823_s12   ;;  %v354_v16 = vld [vmem:[%s972_s0] sm:$0xff] (!%p288_p10)  ;;  %v355_v17 = vld [vmem:[%s972_s0 + $0x8] sm:$0xff] (!%p288_p10)  ;;  %v356_v27 = vld [vmem:[%s972_s0 + $0x10] sm:$0xff] (!%p288_p10)  ;;  %p337_p11 = scmp.lt.s32.totalorder (!%p288_p10), %s831_s14, 2 }
  0x24   : > { %291 = sbr.rel (%p288_p10) target bundleno = 300 (0x12c), region = 69  ;;  %s689_s8 = sshll.u32 (!%p288_p10), %s294_s30, 6  ;;  %v358_v18 = vpack.c.bf16 (!%p288_p10), %v355_v17, %v354_v16  ;;  %v357_v28 = vld [vmem:[%s972_s0 + $0x18] sm:$0xff] (!%p288_p10) }
  0x25   : > { %s296_s9 = scalar_lea.vmem (!%p288_p10), [#allocation3], %s689_s8  ;;  %v359_v29 = vpack.c.bf16 (!%p288_p10), %v357_v28, %v356_v27  ;;  %s690_s26 = sshll.u32 (!%p288_p10), %s294_s30, 4 }
  0x26   : > { %v793_v19 = vld [vmem:[%s296_s9] sm:$0xff] (!%p288_p10)   ;;  %749 = vmatprep.mubr.bf16.mxu0 (!%p288_p10), %v358_v18  ;;  %v794_v20 = vld [vmem:[%s296_s9 + $0x8] sm:$0xff] (!%p288_p10)   ;;  %v795_v21 = vld [vmem:[%s296_s9 + $0x10] sm:$0xff] (!%p288_p10)   ;;  %s326_s27 = scalar_lea.vmem (!%p288_p10), [#allocation4], %s690_s26 }
  0x27   : > { %733 = vmatprep.subr.bf16.mxu0 (!%p288_p10), %v793_v19  ;;  %v796_v22 = vld [vmem:[%s296_s9 + $0x18] sm:$0xff] (!%p288_p10)   ;;  %v797_v23 = vld [vmem:[%s296_s9 + $0x20] sm:$0xff] (!%p288_p10)   ;;  %v798_v24 = vld [vmem:[%s296_s9 + $0x28] sm:$0xff] (!%p288_p10)  }
  0x28   : > { %734 = vmatpush3.bf16.msra.mxu0 (!%p288_p10), %v793_v19  ;;  %v799_v25 = vld [vmem:[%s296_s9 + $0x30] sm:$0xff] (!%p288_p10)   ;;  %v800_v26 = vld [vmem:[%s296_s9 + $0x38] sm:$0xff] (!%p288_p10)  }
  0x29   : > { %735 = vmatprep.subr.bf16.mxu0 (!%p288_p10), %v794_v20 }
  0x2b   : > { %s338_s20 = scalar_select %p337_p11, %s831_s14, 2 }
  0x2c   : > { %736 = vmatpush3.bf16.msra.mxu0 %v794_v20  ;;  %s705_s28 = sshll.u32 (%p896_p6), %s831_s14, 2 }
  0x2d   : > { %737 = vmatprep.subr.bf16.mxu0 %v795_v21  ;;  %s339_s25 = scalar_lea.vmem %s974_s2, %s338_s20  ;;  %s530_s30 = scalar_lea.vmem (%p896_p6), %s975_s3, %s705_s28 }
  0x2e   : > { %v699_v31 = vld [vmem:[%s339_s25] ss:$0 sm:$0xff] }
  0x30   : > { %738 = vmatpush3.bf16.msra.mxu0 %v795_v21 }
  0x31   : > { %739 = vmatprep.subr.bf16.mxu0 %v796_v22 }
  0x34   : > { %740 = vmatpush3.bf16.msra.mxu0 %v796_v22 }
  0x35   : > { %741 = vmatprep.subr.bf16.mxu0 %v797_v23 }
  0x38   : > { %742 = vmatpush3.bf16.msra.mxu0 %v797_v23 }
  0x39   : > { %743 = vmatprep.subr.bf16.mxu0 %v798_v24 }
  0x3c   : > { %744 = vmatpush3.bf16.msra.mxu0 %v798_v24 }
  0x3d   : > { %745 = vmatprep.subr.bf16.mxu0 %v799_v25 }
  0x40   : > { %746 = vmatpush3.bf16.msra.mxu0 %v799_v25 }
  0x41   : > { %747 = vmatprep.subr.bf16.mxu0 %v800_v26 }
  0x44   : > { %748 = vmatpush3.bf16.msra.mxu0 %v800_v26 }
  0x47   : > { %750 = vmatmul.mubr.bf16.vlgmr.msra.gmra.mrb[0].mxu0 %v359_v29 }
 0x11a   : > { %v751_v30 = vpop.f32.mrb[0].mxu0 }
 0x11b   : > { %v458_v32 = vpop.f32.mrb[1].mxu0  ;;  %v497_v34 = vadd.f32 %v751_v30, %v699_v31 }
 0x11c   : > { %v752_v33 = vpop.f32.mrb[2].mxu0  ;;  %v495_v37 = vadd.f32 %v699_v31, %v458_v32  ;;  %525 = sbr.rel (!%p896_p6) target bundleno = 300 (0x12c), region = 85 }
 0x11d   : > { %v498_v35 = vadd.f32 %v752_v33, %v699_v31  ;;  %v461_v36 = vpop.f32.mrb[3].mxu0 }
 0x11e   : > { %v496_v38 = vadd.f32 %v699_v31, %v461_v36 }
 0x11f   : > { %v720_v39 = vpack.c.bf16 %v498_v35, %v497_v34 }
 0x120   : > { %v715_v40 = vpack.c.bf16 %v496_v38, %v495_v37 }
 0x121   : > { %722 = vst [vmem:[%s326_s27 + $0x8] sm:$0xff] %v720_v39  }
 0x122   : > { %716 = vst [vmem:[%s326_s27] sm:$0xff] %v715_v40  }
 0x128   : > { %v550_v43 = vld [vmem:[%s326_s27 + $0x8] sm:$0xf]  ;;  %v552_v44 = vld [vmem:[%s326_s27 + $0xc] sm:$0xf] }
 0x129   : > { %v546_v41 = vld [vmem:[%s326_s27] sm:$0xf]  ;;  %v548_v42 = vld [vmem:[%s326_s27 + $0x4] sm:$0xf]  ;;  %551 = vst [vmem:[%s530_s30 + $0x18] sm:$0xf] %v550_v43 }
 0x12a   : > { %547 = vst [vmem:[%s530_s30] sm:$0xf] %v546_v41  ;;  %549 = vst [vmem:[%s530_s30 + $0xc] sm:$0xf] %v548_v42 }
 0x12b   : > { %553 = vst [vmem:[%s530_s30 + $0x24] sm:$0xf] %v552_v44 }
 0x12c PF: > { %s13_s16 = sadd.s32 1, %s839_s16   ;;  %s977_s12 = smov %s827_s13 }
 0x12d   : > { %p10_p12 = scmp.ge.s32.totalorder %s13_s16, 5   ;;  %s978_s13 = smov %s901_s22 }
 0x12e   : > { %s979_s14 = smov %s835_s15  ;;  %s980_s15 = smov %s982_s17 }
 0x12f   :  { %12 = sbr.rel (!%p10_p12) target bundleno = 3 (0x3), region = 163 }

// kernel: transformer_core_forward.21
= control target key start
LH: loop header
LB: loop body
LE: loop exit
PB: predicated region body
PF: predicated region fallthrough
CT: control target
= control target key end

     0   :  { %s1835_s15 = smov 0   ;;  %s1837_s16 = smov 0   ;;  %s2225_s0 = inlined_call_operand.vmem [shape: bf16[2,16,384], index: 0, kind: input, shape index: {}, may-alias: {0,1,2}]   ;;  %s2226_s1 = inlined_call_operand.vmem [shape: bf16[2,16,384], index: 1, kind: input, shape index: {}, may-alias: {0,1,2}]   ;;  %s2227_s2 = inlined_call_operand.vmem [shape: bf16[2,16,384], index: 2, kind: input, shape index: {}, may-alias: {0,1,2}]   ;;  %s2228_s3 = inlined_call_operand.vmem [shape: f32[2,1,16], index: 3, kind: input, shape index: {}]   ;;  %s2229_s4 = inlined_call_operand.vmem [shape: bf16[2,16,128], index: 4, kind: output, shape index: {}]  }
   0x1   :  { %s1839_s17 = smov 0   ;;  %s1841_s18 = smov 0  }
   0x2   :  { %s1843_s19 = smov 0  }
   0x3 LB: > { %s33_s20 = sadd.s32 1, %s1794_s18  ;;  %p49_p1 = scmp.ne.s32.totalorder %s1786_s16, %s1782_s15  ;;  %s1798_s19 = sphi %s1843_s19, %s14_s19   ;;  %s1794_s18 = sphi %s1841_s18, %s2234_s18   ;;  %s1790_s17 = sphi %s1839_s17, %s2233_s17   ;;  %s1786_s16 = sphi %s1837_s16, %s2232_s16   ;;  %s1782_s15 = sphi %s1835_s15, %s2231_s15  }
   0x4   : > { %p35_p0 = scmp.ge.s32.totalorder %s33_s20, 2  ;;  %p50_p2 = scmp.eq.s32.totalorder %s1798_s19, 0 }
   0x5   : > { %s42_s23 = sadd.s32 1, %s1786_s16  ;;  %p1512_p5 = scmp.ge.s32.totalorder %s1798_s19, 2 }
   0x6   : > { %s2236_s20 = smov (%p35_p0, %s33_s20), 0  ;;  %p1866_p3 = por %p50_p2, %p49_p1 }
   0x7   : > { %s37_s22 = ssub.s32 %s1794_s18, %s2236_s20  ;;  %187 = sbr.rel (%p1512_p5) target bundleno = 35 (0x23), region = 16 }
   0x8   : > { %p40_p4 = scmp.eq.s32.totalorder %s37_s22, 0 }
   0xa   : > { %s1874_s24 = scalar_select %p40_p4, %s1786_s16, %s42_s23  }
   0xe   : > { %190 = sbr.rel (!%p1866_p3) target bundleno = 21 (0x15), region = 20  ;;  %s192_s25 = sand.u32 (%p1866_p3), 1, %s1786_s16  }
   0xf   : > { %s1633_s26 = smul.u32 (%p1866_p3), 24, %s1794_s18  ;;  %s1513_s27 = sshll.u32 (%p1866_p3), %s192_s25, 3 }
  0x10   : > { %s194_s5 = scalar_lea.vmem (%p1866_p3), [#allocation5], %s1513_s27 }
  0x11   : > { %s200_s30 = scalar_lea.vmem (%p1866_p3), %s2225_s0, %s1633_s26 }
  0x12   : > { %v216_v0 = vld [vmem:[%s200_s30] sm:$0xf] (%p1866_p3)  ;;  %v218_v1 = vld [vmem:[%s200_s30 + $0xc] sm:$0xf] (%p1866_p3) }
  0x13   : > { %217 = vst [vmem:[%s194_s5] sm:$0xf] (%p1866_p3), %v216_v0  ;;  %219 = vst [vmem:[%s194_s5 + $0x4] sm:$0xf] (%p1866_p3), %v218_v1 }
  0x15 PF: > { %246 = sbr.rel (!%p1866_p3) target bundleno = 28 (0x1c), region = 61  ;;  %s248_s6 = sand.u32 (%p1866_p3), 1, %s1786_s16  }
  0x16   : > { %s1516_s7 = smul.u32 (%p1866_p3), 24, %s1794_s18  ;;  %s1515_s8 = sshll.u32 (%p1866_p3), %s248_s6, 3 }
  0x17   : > { %s250_s12 = scalar_lea.vmem (%p1866_p3), [#allocation6], %s1515_s8 }
  0x18   : > { %s1403_s11 = scalar_lea.vmem (%p1866_p3), %s2226_s1, %s1516_s7 }
  0x19   : > { %v1517_v2 = vld [vmem:[%s1403_s11 + $0x4] sm:$0xf] (%p1866_p3)  ;;  %v1518_v3 = vld [vmem:[%s1403_s11 + $0x10] sm:$0xf] (%p1866_p3) }
  0x1a   : > { %274 = vst [vmem:[%s250_s12] sm:$0xf] (%p1866_p3), %v1517_v2  ;;  %276 = vst [vmem:[%s250_s12 + $0x4] sm:$0xf] (%p1866_p3), %v1518_v3 }
  0x1c PF: > { %303 = sbr.rel (!%p1866_p3) target bundleno = 35 (0x23), region = 102  ;;  %s305_s13 = sand.u32 (%p1866_p3), 1, %s1786_s16  }
  0x1d   : > { %s1520_s14 = smul.u32 (%p1866_p3), 24, %s1794_s18  ;;  %s1519_s22 = sshll.u32 (%p1866_p3), %s305_s13, 3 }
  0x1e   : > { %s307_s27 = scalar_lea.vmem (%p1866_p3), [#allocation7], %s1519_s22 }
  0x1f   : > { %s1411_s26 = scalar_lea.vmem (%p1866_p3), %s2227_s2, %s1520_s14 }
  0x20   : > { %v1521_v4 = vld [vmem:[%s1411_s26 + $0x8] sm:$0xf] (%p1866_p3)  ;;  %v1522_v5 = vld [vmem:[%s1411_s26 + $0x14] sm:$0xf] (%p1866_p3) }
  0x21   : > { %331 = vst [vmem:[%s307_s27] sm:$0xf] (%p1866_p3), %v1521_v4  ;;  %333 = vst [vmem:[%s307_s27 + $0x4] sm:$0xf] (%p1866_p3), %v1522_v5 }
  0x23 PF: > { %p1523_p6 = scmp.ge.s32.totalorder %s1798_s19, 1  ;;  %p368_p7 = scmp.lt.s32.totalorder %s1798_s19, 3 }
  0x25   : > { %p369_p8 = pnand %p1523_p6, %p368_p7 }
  0x26   : > { %s375_s21 = sand.u32 (!%p369_p8), 1, %s1782_s15   ;;  %v1800_v6 = vmov (!%p369_p8), 0.0   ;;  %vm1801_vm0 = vmmov (!%p369_p8), 0   ;;  %vm486_vm1 = vcmask (!%p369_p8), 261120   ;;  %vm456_vm2 = vcmask (!%p369_p8), 31744   ;;  %p435_p9 = scmp.lt.s32.totalorder (!%p369_p8), %s1790_s17, 1 }
  0x27   : > { %372 = sbr.rel (%p369_p8) target bundleno = 1469 (0x5bd), region = 147  ;;  %1585 = vmatprep.subr.bf16.mxu0 (!%p369_p8), %v1800_v6  ;;  %461 = vst [vmem:[#allocation4] sm:$0xff] (!%p369_p8), %v1800_v6  ;;  %462 = vst [vmem:[#allocation4 + $0x8] sm:$0xff] (!%p369_p8), %v1800_v6  ;;  %s1904_s28 = sshll.u32 (!%p369_p8), %s375_s21, 3  ;;  %1587 = vmatprep.mubr.msk.bf16.mxu0 (!%p369_p8), %vm1801_vm0, %v1800_v6  ;;  %v1802_v10 = vmov (!%p369_p8), -1e+30  }
  0x28   : > { %1591 = vmatprep.subr.bf16.mxu1 (!%p369_p8), %v1800_v6  ;;  %1593 = vmatprep.mubr.msk.bf16.mxu1 (!%p369_p8), %vm1801_vm0, %v1800_v6  ;;  %s1912_s15 = scalar_lea.vmem (!%p369_p8), [#allocation6], %s1904_s28  ;;  %s1916_s29 = scalar_lea.vmem (!%p369_p8), [#allocation5], %s1904_s28  ;;  %457 = vst.msk [vmem:[#allocation2] sm:$0xff] (!%p369_p8), %vm456_vm2, %v1802_v10  ;;  %458 = vst.msk [vmem:[#allocation2 + $0x8] sm:$0xff] (!%p369_p8), %vm456_vm2, %v1802_v10  ;;  %vm536_vm3 = vcmask (!%p369_p8), 130048   ;;  %v1803_v20 = vmov (!%p369_p8), 0  }
  0x29   : > { %v1700_v7 = vld [vmem:[%s1912_s15] sm:$0xff] (!%p369_p8)   ;;  %v1701_v9 = vld [vmem:[%s1916_s29] sm:$0xff] (!%p369_p8)   ;;  %459 = vst.msk [vmem:[#allocation3] sm:$0xff] (!%p369_p8), %vm456_vm2, %v1800_v6  ;;  %460 = vst.msk [vmem:[#allocation3 + $0x8] sm:$0xff] (!%p369_p8), %vm456_vm2, %v1800_v6  ;;  %1684 = vset.pattern.permute.xlu1 (!%p369_p8), %v1803_v20  ;;  %s1804_s7 = smov (!%p369_p8), 96   ;;  %vm579_vm4 = vcmask (!%p369_p8), 7168  }
  0x2a   : > { %v491_v8 = vsel (!%p369_p8), %vm486_vm1, %v1700_v7, 0  ;;  %v1702_v21 = vld [vmem:[%s1912_s15] sm:$0xff] (!%p369_p8)   ;;  %v1703_v30 = vld [vmem:[%s1916_s29] sm:$0xff] (!%p369_p8)   ;;  %s1967_s8 = scalar_lea.vmem (!%p369_p8), [#allocation7], %s1904_s28  ;;  %s1805_s9 = smov (!%p369_p8), 64   ;;  %vm764_vm5 = vcmask (!%p369_p8), 15368  }
  0x2b   : > { %1586 = vmatpush3.bf16.xpose.msra.mxu0 (!%p369_p8), %v491_v8  ;;  %v1704_v31 = vld [vmem:[%s1912_s15] sm:$0xff] (!%p369_p8)   ;;  %v1708_v32 = vld [vmem:[%s1967_s8] sm:$0xff] (!%p369_p8)   ;;  %s1806_s10 = smov (!%p369_p8), 32   ;;  %vm960_vm6 = vcmask (!%p369_p8), 23568   ;;  %vm1156_vm7 = vcmask (!%p369_p8), 31768   ;;  %vm844_vm8 = vcmask (!%p369_p8), 523520  }
  0x2c   : > { %1603 = vmatprep.subr.bf16.mxu0 (!%p369_p8), %v1800_v6  ;;  %1592 = vmatpush3.bf16.msra.mxu1 (!%p369_p8), %v1708_v32  ;;  %v1705_v33 = vld [vmem:[%s1916_s29] sm:$0xff] (!%p369_p8)   ;;  %v1706_v34 = vld [vmem:[%s1912_s15] sm:$0xff] (!%p369_p8)   ;;  %vm1040_vm9 = vcmask (!%p369_p8), 785920   ;;  %vm1236_vm10 = vcmask (!%p369_p8), 1048320   ;;  %vm1270_vm11 = vcmask (!%p369_p8), 257024   ;;  %vm1299_vm12 = vcmask (!%p369_p8), 519424  }
  0x2d   : > { %1597 = vmatprep.subr.bf16.mxu1 (!%p369_p8), %v1800_v6  ;;  %v1707_v35 = vld [vmem:[%s1916_s29] sm:$0xff] (!%p369_p8)   ;;  %vm1328_vm13 = vcmask (!%p369_p8), 781824   ;;  %vm1357_vm14 = vcmask (!%p369_p8), 1044224  }
  0x2e   : > { %s2238_s17 = smov (!%p435_p9, %s1790_s17), 1 }
  0x2f   : > { %s440_s6 = scalar_lea.vmem %s2228_s3, %s2238_s17  ;;  %v1943_v22 = vld [vmem:[#allocation2] sm:$0xff]  ;;  %v1948_v25 = vld [vmem:[#allocation2 + $0x8] sm:$0xff]  ;;  %s1560_s11 = sshll.u32 %s2238_s17, 3 }
  0x30   : > { %v1934_v11 = vld [vmem:[%s440_s6] ss:$0 sm:$0xff]  ;;  %s449_s14 = scalar_lea.vmem %s2229_s4, %s1560_s11 }
  0x32   : > { %1588 = vmatmul.mubr.msk.bf16.vlgmr.msra.gmra.mrb[0].mxu0 %vm486_vm1, %v1701_v9 }
  0x33   : > { %1605 = vmatprep.mubr.msk.bf16.mxu0 %vm1801_vm0, %v1800_v6 }
 0x105   : > { %v527_v12 = vpop.f32.mrb[0].mxu0 }
 0x106   : > { %v528_v13 = vadd.f32 %v1934_v11, %v527_v12  ;;  %v1589_v14 = vpop.f32.mrb[1].mxu0 }
 0x107   : > { %v530_v15 = vpop.f32.mrb[2].mxu0 }
 0x108   : > { %v531_v16 = vadd.f32 %v1934_v11, %v530_v15  ;;  %v1590_v17 = vpop.f32.mrb[3].mxu0  ;;  %v537_v18 = vsel %vm536_vm3, %v528_v13, -inf }
 0x109   : > { %538 = vmax.xlane.f32.xlu0 %v537_v18 }
 0x10a   : > { %v540_v19 = vsel %vm536_vm3, %v531_v16, -inf }
 0x10d   : > { %541 = vmax.xlane.f32.xlu0 %v540_v19  ;;  %v1807_v19 = vmov 1  }
 0x10e   : > { %1685 = vset.pattern.permute.xlu0 %v1807_v19 }
 0x123   : > { %671 = vrot.lane.b32.xlu0 %v1702_v21, %s1804_s7 }
 0x196   : > { %v539_v23 = vpop.xlane.xlu0 %538 }
 0x197   : > { %v1946_v24 = vmax.f32 %v1943_v22, %v539_v23 }
 0x199   : > { %v545_v26 = vsub.f32 %v1943_v22, %v1946_v24  ;;  %651 = vst.msk [vmem:[#allocation2] sm:$0xff] %vm579_vm4, %v1946_v24  ;;  %553 = vperm.xlu1 %1684, %v1946_v24  }
 0x19a   : > { %v542_v27 = vpop.xlane.xlu0 %541 }
 0x19b   : > { %v1956_v28 = vmax.f32 %v1948_v25, %v542_v27 }
 0x19d   : > { %v546_v29 = vsub.f32 %v1948_v25, %v1956_v28  ;;  %652 = vst.msk [vmem:[#allocation2 + $0x8] sm:$0xff] %vm579_vm4, %v1956_v28  ;;  %558 = vperm.xlu1 %1684, %v1956_v28  }
 0x19e   : > { %v672_v42 = vpop.permute.xlu0 %671 }
 0x19f   : > { %v677_v46 = vsel %vm486_vm1, %v672_v42, 0 }
 0x1a0   : > { %v2035_v23 = vld [vmem:[#allocation2] sm:$0xff] }
 0x1a1   : > { %664 = vrot.lane.b32.xlu1 %v1703_v30, %s1804_s7 }
 0x1a2   : > { %1686 = vset.pattern.permute.xlu1 %v1807_v19 }
 0x1a4   : > { %v2040_v30 = vld [vmem:[#allocation2 + $0x8] sm:$0xff] }
 0x1a5   : > { %867 = vrot.lane.b32.xlu1 %v1704_v31, %s1805_s9 }
 0x1a9   : > { %860 = vrot.lane.b32.xlu1 %v1705_v33, %s1805_s9 }
 0x1ad   : > { %1063 = vrot.lane.b32.xlu1 %v1706_v34, %s1806_s10  ;;  %v1709_v34 = vld [vmem:[%s1967_s8] sm:$0xff]  }
 0x1b1   : > { %1056 = vrot.lane.b32.xlu1 %v1707_v35, %s1806_s10 }
 0x218   : > { %v554_v36 = vpop.permute.xlu1 %553 }
 0x219   : > { %v561_v37 = vsub.f32 %v528_v13, %v554_v36 }
 0x21b   : > { %v563_v38 = vmul.f32 1.442695, %v561_v37  ;;  %v1808_v37 = vmov 2  }
 0x21c   : > { %v559_v39 = vpop.permute.xlu1 %558 }
 0x21d   : > { %v562_v40 = vsub.f32 %v531_v16, %v559_v39  ;;  %1712 = vpow2.f32 %v563_v38 }
 0x21f   : > { %v565_v41 = vmul.f32 1.442695, %v562_v40 }
 0x220   : > { %v665_v43 = vpop.permute.xlu1 %664 }
 0x221   : > { %1714 = vpow2.f32 %v565_v41 }
 0x224   : > { %v868_v48 = vpop.permute.xlu1 %867 }
 0x225   : > { %v873_v50 = vsel %vm486_vm1, %v868_v48, 0 }
 0x227   : > { %v1978_v44 = vpop.eup %1712 }
 0x228   : > { %v861_v49 = vpop.permute.xlu1 %860 }
 0x22b   : > { %v1980_v45 = vpop.eup %1714 }
 0x22c   : > { %v596_v47 = vpack.c.bf16 %v1980_v45, %v1978_v44  ;;  %v1064_v51 = vpop.permute.xlu1 %1063 }
 0x22d   : > { %v1069_v52 = vsel %vm486_vm1, %v1064_v51, 0 }
 0x22e   : > { %1594 = vmatmul.mubr.msk.bf16.vlgmr.msra.gmra.mrb[0].mxu1 %vm536_vm3, %v596_v47  ;;  %v1710_v47 = vld [vmem:[%s1967_s8] sm:$0xff]  }
 0x22f   : > { %1598 = vmatpush3.bf16.xpose.msra.mxu1 %v677_v46  ;;  %1599 = vmatprep.mubr.msk.bf16.mxu1 %vm1801_vm0, %v1800_v6 }
 0x230   : > { %1609 = vmatprep.subr.bf16.mxu1 %v1800_v6  ;;  %v1057_v53 = vpop.permute.xlu1 %1056 }
 0x236   : > { %1600 = vmatmul.mubr.msk.bf16.vlgmr.msra.gmra.mrb[4].mxu1 %vm486_vm1, %v665_v43 }
 0x237   : > { %1610 = vmatpush3.bf16.xpose.msra.mxu1 %v873_v50  ;;  %1611 = vmatprep.mubr.msk.bf16.mxu1 %vm1801_vm0, %v1800_v6 }
 0x238   : > { %1621 = vmatprep.subr.bf16.mxu1 %v1800_v6 }
 0x23e   : > { %1612 = vmatmul.mubr.msk.bf16.vlgmr.msra.gmra.mrb[8].mxu1 %vm486_vm1, %v861_v49 }
 0x23f   : > { %1622 = vmatpush3.bf16.xpose.msra.mxu1 %v1069_v52  ;;  %1623 = vmatprep.mubr.msk.bf16.mxu1 %vm1801_vm0, %v1800_v6 }
 0x246   : > { %1624 = vmatmul.mubr.msk.bf16.vlgmr.msra.gmra.mrb[12].mxu1 %vm486_vm1, %v1057_v53  ;;  %v1809_v53 = vmov 3  }
 0x301   : > { %v1999_v54 = vpop.f32.mrb[0].mxu1 }
 0x302   : > { %v1595_v55 = vpop.f32.mrb[1].mxu1 }
 0x303   : > { %v2001_v56 = vpop.f32.mrb[2].mxu1 }
 0x304   : > { %v1596_v57 = vpop.f32.mrb[3].mxu1 }
 0x309   : > { %v713_v58 = vpop.f32.mrb[4].mxu1 }
 0x30a   : > { %v2004_v59 = vadd.f32 %v1934_v11, %v713_v58  ;;  %v1601_v60 = vpop.f32.mrb[5].mxu1 }
 0x30b   : > { %v716_v61 = vpop.f32.mrb[6].mxu1  ;;  %v1711_v60 = vld [vmem:[%s1967_s8] sm:$0xff]  }
 0x30c   : > { %v2007_v62 = vadd.f32 %v1934_v11, %v716_v61  ;;  %v1602_v63 = vpop.f32.mrb[7].mxu1  ;;  %v722_v0 = vsel %vm536_vm3, %v2004_v59, -inf  ;;  %v574_v61 = vsel %vm536_vm3, %v1980_v45, 0.0 }
 0x30d   : > { %723 = vmax.xlane.f32.xlu1 %v722_v0  ;;  %v547_v63 = vmul.f32 1.442695, %v545_v26 }
 0x30e   : > { %v725_v1 = vsel %vm536_vm3, %v2007_v62, -inf }
 0x30f   : > { %726 = vmax.xlane.f32.xlu0 %v725_v1  ;;  %1716 = vpow2.f32 %v547_v63  ;;  %v571_v1 = vsel %vm536_vm3, %v1978_v44, 0.0 }
 0x311   : > { %v909_v2 = vpop.f32.mrb[8].mxu1 }
 0x312   : > { %v2014_v3 = vadd.f32 %v1934_v11, %v909_v2  ;;  %v1613_v4 = vpop.f32.mrb[9].mxu1  ;;  %v549_v2 = vmul.f32 1.442695, %v546_v29 }
 0x313   : > { %v912_v5 = vpop.f32.mrb[10].mxu1 }
 0x314   : > { %v2017_v7 = vadd.f32 %v1934_v11, %v912_v5  ;;  %v918_v8 = vsel %vm536_vm3, %v2014_v3, -inf  ;;  %v1614_v9 = vpop.f32.mrb[11].mxu1  ;;  %1718 = vpow2.f32 %v549_v2 }
 0x315   : > { %919 = vmax.xlane.f32.xlu0 %v918_v8 }
 0x316   : > { %v921_v10 = vsel %vm536_vm3, %v2017_v7, -inf }
 0x317   : > { %922 = vmax.xlane.f32.xlu1 %v921_v10 }
 0x319   : > { %v1105_v12 = vpop.f32.mrb[12].mxu1  ;;  %v2110_v0 = vpop.eup %1716 }
 0x31a   : > { %v2024_v13 = vadd.f32 %v1934_v11, %v1105_v12  ;;  %v1625_v14 = vpop.f32.mrb[13].mxu1 }
 0x31b   : > { %v1108_v15 = vpop.f32.mrb[14].mxu1 }
 0x31c   : > { %v2027_v16 = vadd.f32 %v1934_v11, %v1108_v15  ;;  %v1114_v17 = vsel %vm536_vm3, %v2024_v13, -inf  ;;  %v1626_v18 = vpop.f32.mrb[15].mxu1 }
 0x31d   : > { %1115 = vmax.xlane.f32.xlu0 %v1114_v17 }
 0x31e   : > { %v1117_v21 = vsel %vm536_vm3, %v2027_v16, -inf  ;;  %v2118_v45 = vpop.eup %1718 }
 0x31f   : > { %1118 = vmax.xlane.f32.xlu1 %v1117_v21 }
 0x39a   : > { %v724_v11 = vpop.xlane.xlu1 %723 }
 0x39b   : > { %v2038_v27 = vmax.f32 %v2035_v23, %v724_v11 }
 0x39c   : > { %v727_v31 = vpop.xlane.xlu0 %726 }
 0x39d   : > { %v730_v32 = vsub.f32 %v2035_v23, %v2038_v27  ;;  %847 = vst.msk [vmem:[#allocation2] sm:$0xff] %vm764_vm5, %v2038_v27  ;;  %v2047_v33 = vmax.f32 %v2040_v30, %v727_v31  ;;  %738 = vperm.xlu0 %1685, %v2038_v27  }
 0x39f   : > { %v731_v35 = vsub.f32 %v2040_v30, %v2047_v33  ;;  %848 = vst.msk [vmem:[#allocation2 + $0x8] sm:$0xff] %vm764_vm5, %v2047_v33  ;;  %743 = vperm.xlu1 %1686, %v2047_v33  }
 0x3a1   : > { %1179 = vrot.lane.b32.xlu0 %v1709_v34, %s1806_s10 }
 0x3a2   : > { %v920_v36 = vpop.xlane.xlu0 %919  ;;  %1689 = vset.pattern.permute.xlu0 %v1803_v20 }
 0x3a3   : > { %1687 = vset.pattern.permute.xlu1 %v1808_v37 }
 0x3a4   : > { %v2059_v38 = vld [vmem:[#allocation2] sm:$0xff]  ;;  %v923_v39 = vpop.xlane.xlu1 %922 }
 0x3a5   : > { %v2062_v40 = vmax.f32 %v2059_v38, %v920_v36 }
 0x3a6   : > { %v2064_v41 = vld [vmem:[#allocation2 + $0x8] sm:$0xff] }
 0x3a7   : > { %v926_v42 = vsub.f32 %v2059_v38, %v2062_v40  ;;  %1043 = vst.msk [vmem:[#allocation2] sm:$0xff] %vm960_vm6, %v2062_v40  ;;  %v2071_v43 = vmax.f32 %v2064_v41, %v923_v39  ;;  %934 = vperm.xlu1 %1687, %v2062_v40  }
 0x3a9   : > { %v927_v46 = vsub.f32 %v2064_v41, %v2071_v43  ;;  %1044 = vst.msk [vmem:[#allocation2 + $0x8] sm:$0xff] %vm960_vm6, %v2071_v43 }
 0x3aa   : > { %v1116_v48 = vpop.xlane.xlu0 %1115 }
 0x3ab   : > { %939 = vperm.xlu1 %1687, %v2071_v43  }
 0x3ac   : > { %v1119_v50 = vpop.xlane.xlu1 %1118 }
 0x3ae   : > { %v2080_v49 = vld [vmem:[#allocation2] sm:$0xff] }
 0x3af   : > { %v2083_v51 = vmax.f32 %v2080_v49, %v1116_v48  ;;  %787 = vrot.lane.b32.xlu1 %v1710_v47, %s1804_s7 }
 0x3b0   : > { %v2086_v52 = vld [vmem:[#allocation2 + $0x8] sm:$0xff]  ;;  %1688 = vset.pattern.permute.xlu1 %v1809_v53 }
 0x3b1   : > { %v1122_v55 = vsub.f32 %v2080_v49, %v2083_v51  ;;  %1239 = vst.msk [vmem:[#allocation2] sm:$0xff] %vm1156_vm7, %v2083_v51  ;;  %v2094_v57 = vmax.f32 %v2086_v52, %v1119_v50 }
 0x3b3   : > { %v1123_v58 = vsub.f32 %v2086_v52, %v2094_v57  ;;  %1240 = vst.msk [vmem:[#allocation2 + $0x8] sm:$0xff] %vm1156_vm7, %v2094_v57  ;;  %1130 = vperm.xlu1 %1688, %v2083_v51  }
 0x3b7   : > { %1135 = vperm.xlu1 %1688, %v2094_v57  }
 0x3bb   : > { %983 = vrot.lane.b32.xlu1 %v1711_v60, %s1805_s9 }
 0x3bc   : > { %1690 = vset.pattern.permute.xlu1 %v1803_v20 }
 0x3c0   : > { %575 = vadd.xlane.f32.xlu0 %v574_v61  ;;  %v568_v61 = vld [vmem:[#allocation3 + $0x8] sm:$0xff] }
 0x3c1   : > { %v570_v63 = vmul.f32 %v2118_v45, %v568_v61 }
 0x3d6   : > { %586 = vperm.xlu0 %1689, %v2110_v0  }
 0x3df   : > { %572 = vadd.xlane.f32.xlu1 %v571_v1 }
 0x3f0   : > { %591 = vperm.xlu1 %1690, %v2118_v45  }
 0x3f4   : > { %1691 = vset.pattern.permute.xlu1 %v1807_v19 }
 0x41c   : > { %v739_v22 = vpop.permute.xlu0 %738 }
 0x41d   : > { %v746_v24 = vsub.f32 %v2004_v59, %v739_v22 }
 0x41e   : > { %v744_v26 = vpop.permute.xlu1 %743 }
 0x41f   : > { %v748_v4 = vmul.f32 1.442695, %v746_v24  ;;  %v747_v5 = vsub.f32 %v2007_v62, %v744_v26  ;;  %v732_v62 = vmul.f32 1.442695, %v730_v32 }
 0x421   : > { %1720 = vpow2.f32 %v748_v4  ;;  %v750_v44 = vmul.f32 1.442695, %v747_v5  ;;  %v928_v4 = vmul.f32 1.442695, %v926_v42  ;;  %v567_v5 = vld [vmem:[#allocation3] sm:$0xff] }
 0x422   : > { %v569_v45 = vmul.f32 %v2110_v0, %v567_v5  ;;  %v1126_v42 = vmul.f32 1.442695, %v1123_v58 }
 0x423   : > { %1722 = vpow2.f32 %v750_v44  ;;  %v930_v44 = vmul.f32 1.442695, %v927_v46 }
 0x426   : > { %v935_v8 = vpop.permute.xlu1 %934 }
 0x427   : > { %v942_v25 = vsub.f32 %v2014_v3, %v935_v8 }
 0x429   : > { %v944_v14 = vmul.f32 1.442695, %v942_v25 }
 0x42a   : > { %v940_v28 = vpop.permute.xlu1 %939 }
 0x42b   : > { %v1721_v29 = vpop.eup %1720  ;;  %v943_v9 = vsub.f32 %v2017_v7, %v940_v28  ;;  %v734_v7 = vmul.f32 1.442695, %v731_v35  ;;  %v1124_v28 = vmul.f32 1.442695, %v1122_v55 }
 0x42c   : > { %v756_v10 = vsel %vm536_vm3, %v1721_v29, 0.0 }
 0x42d   : > { %v1723_v12 = vpop.eup %1722  ;;  %v946_v15 = vmul.f32 1.442695, %v943_v9  ;;  %757 = vadd.xlane.f32.xlu1 %v756_v10 }
 0x42e   : > { %v788_v59 = vpop.permute.xlu1 %787  ;;  %v759_v17 = vsel %vm536_vm3, %v1723_v12, 0.0  ;;  %v781_v3 = vpack.c.bf16 %v1723_v12, %v1721_v29 }
 0x42f   : > { %1724 = vpow2.f32 %v946_v15  ;;  %760 = vadd.xlane.f32.xlu0 %v759_v17  ;;  %1604 = vmatpush3.bf16.msra.mxu0 %v788_v59 }
 0x430   : > { %1615 = vmatprep.subr.bf16.mxu0 %v1800_v6  ;;  %1726 = vpow2.f32 %v944_v14 }
 0x431   : > { %1728 = vpow2.f32 %v732_v62 }
 0x432   : > { %1606 = vmatmul.mubr.msk.bf16.vlgmr.msra.gmra.mrb[4].mxu0 %vm536_vm3, %v781_v3  ;;  %v1131_v18 = vpop.permute.xlu1 %1130  ;;  %1730 = vpow2.f32 %v734_v7 }
 0x433   : > { %v1138_v21 = vsub.f32 %v2024_v13, %v1131_v18  ;;  %1617 = vmatprep.mubr.msk.bf16.mxu0 %vm1801_vm0, %v1800_v6  ;;  %v1180_v13 = vpop.permute.xlu0 %1179 }
 0x435   : > { %v1140_v23 = vmul.f32 1.442695, %v1138_v21 }
 0x436   : > { %v1136_v11 = vpop.permute.xlu1 %1135 }
 0x437   : > { %1732 = vpow2.f32 %v1140_v23  ;;  %v1139_v27 = vsub.f32 %v2027_v16, %v1136_v11 }
 0x439   : > { %v1725_v31 = vpop.eup %1724  ;;  %v1142_v32 = vmul.f32 1.442695, %v1139_v27 }
 0x43a   : > { %v984_v34 = vpop.permute.xlu1 %983  ;;  %v955_v30 = vsel %vm536_vm3, %v1725_v31, 0.0  ;;  %v1727_v33 = vpop.eup %1726 }
 0x43b   : > { %1734 = vpow2.f32 %v1142_v32  ;;  %956 = vadd.xlane.f32.xlu0 %v955_v30  ;;  %1616 = vmatpush3.bf16.msra.mxu0 %v984_v34  ;;  %v977_v35 = vpack.c.bf16 %v1725_v31, %v1727_v33  ;;  %v1729_v36 = vpop.eup %1728  ;;  %v952_v26 = vsel %vm536_vm3, %v1727_v33, 0.0 }
 0x43c   : > { %1627 = vmatprep.subr.bf16.mxu0 %v1800_v6  ;;  %v1731_v16 = vpop.eup %1730  ;;  %1736 = vpow2.f32 %v928_v4 }
 0x43d   : > { %1738 = vpow2.f32 %v930_v44 }
 0x43e   : > { %771 = vperm.xlu1 %1691, %v1729_v36   ;;  %1618 = vmatmul.mubr.msk.bf16.vlgmr.msra.gmra.mrb[8].mxu0 %vm536_vm3, %v977_v35  ;;  %1740 = vpow2.f32 %v1124_v28 }
 0x43f   : > { %1628 = vmatpush3.bf16.msra.mxu0 %v1180_v13  ;;  %1629 = vmatprep.mubr.msk.bf16.mxu0 %vm1801_vm0, %v1800_v6  ;;  %1742 = vpow2.f32 %v1126_v42 }
 0x441   : > { %v1733_v39 = vpop.eup %1732 }
 0x442   : > { %776 = vperm.xlu1 %1691, %v1731_v16   ;;  %v1148_v47 = vsel %vm536_vm3, %v1733_v39, 0.0 }
 0x443   : > { %1149 = vadd.xlane.f32.xlu0 %v1148_v47 }
 0x445   : > { %v1735_v48 = vpop.eup %1734 }
 0x446   : > { %v1151_v50 = vsel %vm536_vm3, %v1735_v48, 0.0  ;;  %v1173_v60 = vpack.c.bf16 %v1735_v48, %v1733_v39  ;;  %1692 = vset.pattern.permute.xlu1 %v1808_v37  ;;  %v1737_v41 = vpop.eup %1736 }
 0x447   : > { %1152 = vadd.xlane.f32.xlu0 %v1151_v50  ;;  %v1739_v43 = vpop.eup %1738 }
 0x448   : > { %1630 = vmatmul.mubr.msk.bf16.vlgmr.msra.gmra.mrb[12].mxu0 %vm536_vm3, %v1173_v60  ;;  %v1741_v46 = vpop.eup %1740 }
 0x449   : > { %v1743_v49 = vpop.eup %1742 }
 0x44d   : > { %v576_v1 = vpop.xlane.xlu0 %575 }
 0x44e   : > { %v578_v6 = vadd.f32 %v576_v1, %v570_v63 }
 0x450   : > { %581 = vst.msk [vmem:[#allocation3 + $0x8] sm:$0xff] %vm579_vm4, %v578_v6 }
 0x455   : > { %v587_v2 = vpop.permute.xlu0 %586 }
 0x456   : > { %v594_v22 = vmul.f32 0.0, %v587_v2 }
 0x457   : > { %v753_v51 = vld [vmem:[#allocation3 + $0x8] sm:$0xff] }
 0x458   : > { %v647_v24 = vadd.f32 %v1999_v54, %v594_v22  ;;  %v755_v58 = vmul.f32 %v1731_v16, %v753_v51 }
 0x45a   : > { %649 = vst.msk [vmem:[#allocation4] sm:$0xff] %vm486_vm1, %v647_v24 }
 0x461   : > { %v767_v63 = vld [vmem:[#allocation4] sm:$0xff] }
 0x466   : > { %953 = vadd.xlane.f32.xlu1 %v952_v26 }
 0x46c   : > { %v573_v8 = vpop.xlane.xlu1 %572 }
 0x46d   : > { %v577_v25 = vadd.f32 %v573_v8, %v569_v45 }
 0x46f   : > { %580 = vst.msk [vmem:[#allocation3] sm:$0xff] %vm579_vm4, %v577_v25 }
 0x470   : > { %v592_v54 = vpop.permute.xlu1 %591 }
 0x471   : > { %v595_v38 = vmul.f32 0.0, %v592_v54 }
 0x473   : > { %v648_v40 = vadd.f32 %v2001_v56, %v595_v38 }
 0x475   : > { %650 = vst.msk [vmem:[#allocation4 + $0x8] sm:$0xff] %vm486_vm1, %v648_v40 }
 0x476   : > { %v752_v56 = vld [vmem:[#allocation3] sm:$0xff] }
 0x477   : > { %967 = vperm.xlu1 %1692, %v1737_v41   ;;  %v754_v55 = vmul.f32 %v1729_v36, %v752_v56 }
 0x47b   : > { %972 = vperm.xlu1 %1692, %v1739_v43  }
 0x47c   : > { %v768_v54 = vld [vmem:[#allocation4 + $0x8] sm:$0xff] }
 0x47f   : > { %1693 = vset.pattern.permute.xlu1 %v1809_v53 }
 0x480   : > { %1163 = vperm.xlu1 %1693, %v1741_v46  }
 0x484   : > { %1168 = vperm.xlu1 %1693, %v1743_v49  }
 0x488   : > { %1694 = vset.pattern.permute.xlu1 %v1803_v20 }
 0x4ba   : > { %v758_v52 = vpop.xlane.xlu1 %757 }
 0x4bb   : > { %v762_v57 = vadd.f32 %v758_v52, %v754_v55 }
 0x4bc   : > { %v761_v0 = vpop.xlane.xlu0 %760 }
 0x4bd   : > { %765 = vst.msk [vmem:[#allocation3] sm:$0xff] %vm764_vm5, %v762_v57  ;;  %v763_v29 = vadd.f32 %v761_v0, %v755_v58 }
 0x4be   : > { %v772_v3 = vpop.permute.xlu1 %771 }
 0x4bf   : > { %766 = vst.msk [vmem:[#allocation3 + $0x8] sm:$0xff] %vm764_vm5, %v763_v29  ;;  %v779_v1 = vmul.f32 %v772_v3, %v767_v63 }
 0x4c2   : > { %v2176_v7 = vpop.permute.xlu1 %776 }
 0x4c3   : > { %v780_v28 = vmul.f32 %v2176_v7, %v768_v54 }
 0x4c4   : > { %v948_v18 = vld [vmem:[#allocation3] sm:$0xff] }
 0x4c5   : > { %v950_v21 = vmul.f32 %v1737_v41, %v948_v18 }
 0x4c6   : > { %v949_v9 = vld [vmem:[#allocation3 + $0x8] sm:$0xff] }
 0x4c7   : > { %v951_v10 = vmul.f32 %v1739_v43, %v949_v9 }
 0x4c8   : > { %v957_v12 = vpop.xlane.xlu0 %956 }
 0x4c9   : > { %v959_v14 = vadd.f32 %v957_v12, %v951_v10 }
 0x4cb   : > { %962 = vst.msk [vmem:[#allocation3 + $0x8] sm:$0xff] %vm960_vm6, %v959_v14 }
 0x4d0   : > { %v1150_v15 = vpop.xlane.xlu0 %1149 }
 0x4d2   : > { %v1145_v20 = vld [vmem:[#allocation3 + $0x8] sm:$0xff] }
 0x4d3   : > { %v1147_v59 = vmul.f32 %v1743_v49, %v1145_v20 }
 0x4d4   : > { %v1153_v17 = vpop.xlane.xlu0 %1152 }
 0x4d5   : > { %v1155_v62 = vadd.f32 %v1153_v17, %v1147_v59 }
 0x4d7   : > { %1158 = vst.msk [vmem:[#allocation3 + $0x8] sm:$0xff] %vm1156_vm7, %v1155_v62 }
 0x4de   : > { %v1247_v36 = vld [vmem:[#allocation3 + $0x8] sm:$0xff] }
 0x4f3   : > { %v954_v23 = vpop.xlane.xlu1 %953 }
 0x4f4   : > { %v958_v11 = vadd.f32 %v954_v23, %v950_v21 }
 0x4f6   : > { %961 = vst.msk [vmem:[#allocation3] sm:$0xff] %vm960_vm6, %v958_v11 }
 0x4fd   : > { %v1144_v27 = vld [vmem:[#allocation3] sm:$0xff] }
 0x4fe   : > { %v1146_v31 = vmul.f32 %v1741_v46, %v1144_v27 }
 0x500   : > { %v1154_v32 = vadd.f32 %v1150_v15, %v1146_v31 }
 0x502   : > { %1157 = vst.msk [vmem:[#allocation3] sm:$0xff] %vm1156_vm7, %v1154_v32 }
 0x505   : > { %v827_v34 = vpop.f32.mrb[4].mxu0 }
 0x506   : > { %836 = vrot.lane.b32.xlu0 %v827_v34, %s1806_s10  ;;  %v1607_v30 = vpop.f32.mrb[5].mxu0 }
 0x507   : > { %v830_v33 = vpop.f32.mrb[6].mxu0 }
 0x508   : > { %v1608_v35 = vpop.f32.mrb[7].mxu0 }
 0x509   : > { %v1246_v13 = vld [vmem:[#allocation3] sm:$0xff] }
 0x50a   : > { %1250 = vperm.xlu1 %1694, %v1246_v13   ;;  %1255 = vperm.xlu0 %1689, %v1247_v36  }
 0x50e   : > { %1695 = vset.pattern.permute.xlu1 %v1807_v19  ;;  %1696 = vset.pattern.permute.xlu0 %v1807_v19 }
 0x50f   : > { %1279 = vperm.xlu1 %1695, %v1246_v13  }
 0x511   : > { %v1023_v16 = vpop.f32.mrb[8].mxu0 }
 0x512   : > { %1032 = vrot.lane.b32.xlu0 %v1023_v16, %s1805_s9  ;;  %v1619_v39 = vpop.f32.mrb[9].mxu0 }
 0x513   : > { %838 = vrot.lane.b32.xlu1 %v830_v33, %s1806_s10  ;;  %v1026_v47 = vpop.f32.mrb[10].mxu0 }
 0x514   : > { %v1620_v48 = vpop.f32.mrb[11].mxu0  ;;  %1697 = vset.pattern.permute.xlu1 %v1808_v37  ;;  %v968_v37 = vpop.permute.xlu1 %967 }
 0x516   : > { %1284 = vperm.xlu0 %1696, %v1247_v36  }
 0x517   : > { %1308 = vperm.xlu1 %1697, %v1246_v13  }
 0x518   : > { %v973_v2 = vpop.permute.xlu1 %972 }
 0x51a   : > { %1698 = vset.pattern.permute.xlu0 %v1809_v53 }
 0x51b   : > { %1313 = vperm.xlu1 %1697, %v1247_v36   ;;  %1337 = vperm.xlu0 %1698, %v1246_v13   ;;  %v1219_v50 = vpop.f32.mrb[12].mxu0 }
 0x51c   : > { %v1631_v60 = vpop.f32.mrb[13].mxu0  ;;  %v1164_v24 = vpop.permute.xlu1 %1163 }
 0x51d   : > { %v1222_v19 = vpop.f32.mrb[14].mxu0 }
 0x51e   : > { %v1632_v61 = vpop.f32.mrb[15].mxu0 }
 0x51f   : > { %1034 = vrot.lane.b32.xlu1 %v1026_v47, %s1805_s9 }
 0x520   : > { %1699 = vset.pattern.permute.xlu1 %v1809_v53  ;;  %v1169_v26 = vpop.permute.xlu1 %1168 }
 0x523   : > { %1228 = vrot.lane.b32.xlu1 %v1219_v50, %s1804_s7 }
 0x527   : > { %1230 = vrot.lane.b32.xlu1 %v1222_v19, %s1804_s7 }
 0x52b   : > { %1342 = vperm.xlu1 %1699, %v1247_v36  }
 0x578   : > { %v837_v6 = vpop.permute.xlu0 %836 }
 0x579   : > { %v842_v22 = vadd.f32 %v837_v6, %v779_v1 }
 0x57b   : > { %845 = vst.msk [vmem:[#allocation4] sm:$0xff] %vm844_vm8, %v842_v22 }
 0x582   : > { %v963_v45 = vld [vmem:[#allocation4] sm:$0xff] }
 0x583   : > { %v975_v53 = vmul.f32 %v968_v37, %v963_v45 }
 0x589   : > { %v1251_v4 = vpop.permute.xlu1 %1250  ;;  %v1256_v5 = vpop.permute.xlu0 %1255 }
 0x58a   : > { %1744 = vrcp.f32 %v1251_v4 }
 0x58d   : > { %v1033_v44 = vpop.permute.xlu0 %1032 }
 0x58e   : > { %v1038_v8 = vadd.f32 %v1033_v44, %v975_v53  ;;  %v1280_v25 = vpop.permute.xlu1 %1279 }
 0x58f   : > { %1746 = vrcp.f32 %v1280_v25 }
 0x590   : > { %1041 = vst.msk [vmem:[#allocation4] sm:$0xff] %vm1040_vm9, %v1038_v8 }
 0x592   : > { %v839_v38 = vpop.permute.xlu1 %838 }
 0x593   : > { %v843_v40 = vadd.f32 %v839_v38, %v780_v28 }
 0x594   : > { %v1745_v12 = vpop.eup %1744 }
 0x595   : > { %846 = vst.msk [vmem:[#allocation4 + $0x8] sm:$0xff] %vm844_vm8, %v843_v40  ;;  %v1285_v41 = vpop.permute.xlu0 %1284 }
 0x596   : > { %v1309_v42 = vpop.permute.xlu1 %1308 }
 0x597   : > { %v1159_v51 = vld [vmem:[#allocation4] sm:$0xff]  ;;  %1748 = vrcp.f32 %v1309_v42 }
 0x598   : > { %v1171_v57 = vmul.f32 %v1164_v24, %v1159_v51 }
 0x599   : > { %v1747_v15 = vpop.eup %1746 }
 0x59a   : > { %v1314_v43 = vpop.permute.xlu1 %1313  ;;  %v1338_v52 = vpop.permute.xlu0 %1337 }
 0x59b   : > { %1750 = vrcp.f32 %v1338_v52 }
 0x59c   : > { %v964_v46 = vld [vmem:[#allocation4 + $0x8] sm:$0xff]  ;;  %1752 = vrcp.f32 %v1256_v5 }
 0x59d   : > { %v976_v49 = vmul.f32 %v973_v2, %v964_v46  ;;  %1754 = vrcp.f32 %v1285_v41 }
 0x59e   : > { %v1035_v56 = vpop.permute.xlu1 %1034  ;;  %1756 = vrcp.f32 %v1314_v43 }
 0x59f   : > { %v1039_v55 = vadd.f32 %v1035_v56, %v976_v49 }
 0x5a1   : > { %1042 = vst.msk [vmem:[#allocation4 + $0x8] sm:$0xff] %vm1040_vm9, %v1039_v55  ;;  %v1749_v59 = vpop.eup %1748 }
 0x5a2   : > { %v1229_v58 = vpop.permute.xlu1 %1228 }
 0x5a3   : > { %v1234_v0 = vadd.f32 %v1229_v58, %v1171_v57 }
 0x5a5   : > { %1237 = vst.msk [vmem:[#allocation4] sm:$0xff] %vm1236_vm10, %v1234_v0  ;;  %v1751_v62 = vpop.eup %1750 }
 0x5a6   : > { %v1231_v29 = vpop.permute.xlu1 %1230  ;;  %v1753_v31 = vpop.eup %1752 }
 0x5a7   : > { %v1755_v34 = vpop.eup %1754 }
 0x5a8   : > { %v1160_v9 = vld [vmem:[#allocation4 + $0x8] sm:$0xff]  ;;  %v1757_v30 = vpop.eup %1756 }
 0x5a9   : > { %v1172_v10 = vmul.f32 %v1169_v26, %v1160_v9 }
 0x5aa   : > { %v1343_v14 = vpop.permute.xlu1 %1342 }
 0x5ab   : > { %v1235_v20 = vadd.f32 %v1231_v29, %v1172_v10  ;;  %1758 = vrcp.f32 %v1343_v14 }
 0x5ac   : > { %v1244_v17 = vld [vmem:[#allocation4] sm:$0xff] }
 0x5ad   : > { %v1259_v3 = vmul.f32 %v1745_v12, %v1244_v17  ;;  %v1288_v7 = vmul.f32 %v1747_v15, %v1244_v17  ;;  %1238 = vst.msk [vmem:[#allocation4 + $0x8] sm:$0xff] %vm1236_vm10, %v1235_v20  ;;  %v1317_v18 = vmul.f32 %v1749_v59, %v1244_v17  ;;  %v1346_v21 = vmul.f32 %v1751_v62, %v1244_v17 }
 0x5af   : > { %v1563_v23 = vpack.c.bf16 %v1288_v7, %v1288_v7  ;;  %v1561_v11 = vpack.c.bf16 %v1259_v3, %v1259_v3  ;;  %v1565_v27 = vpack.c.bf16 %v1317_v18, %v1317_v18  ;;  %v1567_v32 = vpack.c.bf16 %v1346_v21, %v1346_v21 }
 0x5b1   : > { %1271 = vst.msk [vmem:[%s449_s14] sm:$0xf] %vm1270_vm11, %v1561_v11 }
 0x5b2   : > { %1300 = vst.msk [vmem:[%s449_s14] sm:$0xf] %vm1299_vm12, %v1563_v23 }
 0x5b3   : > { %1329 = vst.msk [vmem:[%s449_s14] sm:$0xf] %vm1328_vm13, %v1565_v27 }
 0x5b4   : > { %v1245_v33 = vld [vmem:[#allocation4 + $0x8] sm:$0xff]  ;;  %1358 = vst.msk [vmem:[%s449_s14] sm:$0xf] %vm1357_vm14, %v1567_v32 }
 0x5b5   : > { %v1759_v35 = vpop.eup %1758  ;;  %v1261_v13 = vmul.f32 %v1753_v31, %v1245_v33  ;;  %v1290_v36 = vmul.f32 %v1755_v34, %v1245_v33  ;;  %v1319_v16 = vmul.f32 %v1757_v30, %v1245_v33 }
 0x5b6   : > { %v1348_v39 = vmul.f32 %v1759_v35, %v1245_v33 }
 0x5b7   : > { %v1562_v47 = vpack.c.bf16 %v1261_v13, %v1261_v13  ;;  %v1564_v48 = vpack.c.bf16 %v1290_v36, %v1290_v36  ;;  %v1566_v50 = vpack.c.bf16 %v1319_v16, %v1319_v16 }
 0x5b8   : > { %v1568_v60 = vpack.c.bf16 %v1348_v39, %v1348_v39 }
 0x5b9   : > { %1272 = vst.msk [vmem:[%s449_s14 + $0x4] sm:$0xf] %vm1270_vm11, %v1562_v47 }
 0x5ba   : > { %1301 = vst.msk [vmem:[%s449_s14 + $0x4] sm:$0xf] %vm1299_vm12, %v1564_v48 }
 0x5bb   : > { %1330 = vst.msk [vmem:[%s449_s14 + $0x4] sm:$0xf] %vm1328_vm13, %v1566_v50 }
 0x5bc   : > { %1359 = vst.msk [vmem:[%s449_s14 + $0x4] sm:$0xf] %vm1357_vm14, %v1568_v60 }
 0x5bd PF: > { %s14_s19 = sadd.s32 1, %s1798_s19   ;;  %s2231_s15 = smov %s1786_s16 }
 0x5be   : > { %p11_p10 = scmp.ge.s32.totalorder %s14_s19, 4   ;;  %s2232_s16 = smov %s1874_s24 }
 0x5bf   : > { %s2233_s17 = smov %s1794_s18  ;;  %s2234_s18 = smov %s2236_s20 }
 0x5c0   :  { %13 = sbr.rel (!%p11_p10) target bundleno = 3 (0x3), region = 221 }

// kernel: transformer_core_forward.24
= control target key start
LH: loop header
LB: loop body
LE: loop exit
PB: predicated region body
PF: predicated region fallthrough
CT: control target
= control target key end

     0   :  { %v334_v1 = vmov 0   ;;  %v219_v23 = vlaneseq  ;;  %s430_s1 = inlined_call_operand.vmem [shape: bf16[128,256], index: 1, kind: input, shape index: {}]   ;;  %s431_s0 = inlined_call_operand.vmem [shape: f32[32,128], index: 0, kind: input, shape index: {}]   ;;  %s432_s2 = inlined_call_operand.vmem [shape: f32[1,256], index: 2, kind: input, shape index: {}]   ;;  %s433_s3 = inlined_call_operand.vmem [shape: bf16[32,256], index: 3, kind: output, shape index: {}]  }
   0x1   :  { %v310_v0 = vld [vmem:[%s430_s1 + $0x4] ss:$8 sps:$4 sm:$0xff]   ;;  %169 = vmatprep.mubr.bf16.mxu0 %v334_v1  ;;  %179 = vmatprep.mubr.bf16.mxu1 %v334_v1  ;;  %v312_v2 = vld [vmem:[%s430_s1] ss:$8 sps:$4 sm:$0xff]   ;;  %v313_v3 = vld [vmem:[%s430_s1 + $0x14] ss:$8 sps:$4 sm:$0xff]  }
   0x2   :  { %137 = vmatprep.subr.bf16.mxu0 %v310_v0  ;;  %293 = vmatprep.subr.bf16.mxu1 %v310_v0  ;;  %v315_v4 = vld [vmem:[%s430_s1 + $0x10] ss:$8 sps:$4 sm:$0xff]   ;;  %v316_v5 = vld [vmem:[%s430_s1 + $0x24] ss:$8 sps:$4 sm:$0xff]   ;;  %v318_v6 = vld [vmem:[%s430_s1 + $0x20] ss:$8 sps:$4 sm:$0xff]  }
   0x3   :  { %138 = vmatpush1.bf16.msra.mxu0 %v312_v2  ;;  %301 = vmatpush1.bf16.msra.mxu1 %v312_v2  ;;  %v319_v7 = vld [vmem:[%s430_s1 + $0x34] ss:$8 sps:$4 sm:$0xff]   ;;  %v321_v8 = vld [vmem:[%s430_s1 + $0x30] ss:$8 sps:$4 sm:$0xff]   ;;  %v322_v9 = vld [vmem:[%s430_s1 + $0x44] ss:$8 sps:$4 sm:$0xff]  }
   0x4   :  { %139 = vmatprep.subr.bf16.mxu0 %v313_v3  ;;  %294 = vmatprep.subr.bf16.mxu1 %v313_v3  ;;  %v324_v10 = vld [vmem:[%s430_s1 + $0x40] ss:$8 sps:$4 sm:$0xff]   ;;  %v325_v11 = vld [vmem:[%s430_s1 + $0x54] ss:$8 sps:$4 sm:$0xff]   ;;  %v327_v12 = vld [vmem:[%s430_s1 + $0x50] ss:$8 sps:$4 sm:$0xff]  }
   0x5   :  { %v328_v13 = vld [vmem:[%s430_s1 + $0x64] ss:$8 sps:$4 sm:$0xff]   ;;  %v330_v14 = vld [vmem:[%s430_s1 + $0x60] ss:$8 sps:$4 sm:$0xff]   ;;  %v331_v15 = vld [vmem:[%s430_s1 + $0x74] ss:$8 sps:$4 sm:$0xff]  }
   0x6   :  { %v333_v16 = vld [vmem:[%s430_s1 + $0x70] ss:$8 sps:$4 sm:$0xff]   ;;  %v35_v17 = vld [vmem:[%s431_s0] sm:$0xff]  ;;  %v36_v18 = vld [vmem:[%s431_s0 + $0x8] sm:$0xff]  ;;  %v220_v24 = vshrl.u32 %v219_v23, 7 }
   0x7   :  { %140 = vmatpush1.bf16.msra.mxu0 %v315_v4  ;;  %302 = vmatpush1.bf16.msra.mxu1 %v315_v4  ;;  %v37_v19 = vld [vmem:[%s431_s0 + $0x10] sm:$0xff]  ;;  %v38_v20 = vld [vmem:[%s431_s0 + $0x18] sm:$0xff]  ;;  %v39_v21 = vpack.c.bf16 %v36_v18, %v35_v17  ;;  %v217_v26 = vld [vmem:[%s432_s2] sm:$0x3] }
   0x8   :  { %141 = vmatprep.subr.bf16.mxu0 %v316_v5  ;;  %295 = vmatprep.subr.bf16.mxu1 %v316_v5  ;;  %v40_v22 = vpack.c.bf16 %v38_v20, %v37_v19  ;;  %v221_v25 = vsub.s32 0, %v220_v24  ;;  %v225_v27 = vsub.s32 1, %v220_v24 }
   0xa   :  { %v222_v28 = vrot.slane %v217_v26, %v221_v25  ;;  %v226_v29 = vrot.slane %v217_v26, %v225_v27 }
   0xb   :  { %142 = vmatpush1.bf16.msra.mxu0 %v318_v6  ;;  %303 = vmatpush1.bf16.msra.mxu1 %v318_v6 }
   0xc   :  { %143 = vmatprep.subr.bf16.mxu0 %v319_v7  ;;  %296 = vmatprep.subr.bf16.mxu1 %v319_v7 }
   0xf   :  { %144 = vmatpush1.bf16.msra.mxu0 %v321_v8  ;;  %304 = vmatpush1.bf16.msra.mxu1 %v321_v8 }
  0x10   :  { %145 = vmatprep.subr.bf16.mxu0 %v322_v9  ;;  %297 = vmatprep.subr.bf16.mxu1 %v322_v9 }
  0x13   :  { %146 = vmatpush1.bf16.msra.mxu0 %v324_v10  ;;  %305 = vmatpush1.bf16.msra.mxu1 %v324_v10 }
  0x14   :  { %147 = vmatprep.subr.bf16.mxu0 %v325_v11  ;;  %298 = vmatprep.subr.bf16.mxu1 %v325_v11 }
  0x17   :  { %148 = vmatpush1.bf16.msra.mxu0 %v327_v12  ;;  %306 = vmatpush1.bf16.msra.mxu1 %v327_v12 }
  0x18   :  { %149 = vmatprep.subr.bf16.mxu0 %v328_v13  ;;  %299 = vmatprep.subr.bf16.mxu1 %v328_v13 }
  0x1b   :  { %150 = vmatpush1.bf16.msra.mxu0 %v330_v14  ;;  %307 = vmatpush1.bf16.msra.mxu1 %v330_v14 }
  0x1c   :  { %151 = vmatprep.subr.bf16.mxu0 %v331_v15  ;;  %300 = vmatprep.subr.bf16.mxu1 %v331_v15 }
  0x1f   :  { %152 = vmatpush1.bf16.msra.mxu0 %v333_v16  ;;  %308 = vmatpush1.bf16.msra.mxu1 %v333_v16 }
  0x22   :  { %170 = vmatmul.mubr.bf16.vlgmr.msra.gmra.mrb[0].mxu0 %v39_v21  ;;  %180 = vmatmul.mubr.bf16.vlgmr.msra.gmra.mrb[0].mxu1 %v40_v22 }
  0xf5   :  { %v171_v30 = vpop.f32.mrb[0].mxu0  ;;  %v181_v31 = vpop.f32.mrb[0].mxu1 }
  0xf6   :  { %v229_v32 = vadd.f32 %v222_v28, %v171_v30  ;;  %v233_v33 = vadd.f32 %v222_v28, %v181_v31  ;;  %v173_v34 = vpop.f32.mrb[1].mxu0  ;;  %v183_v35 = vpop.f32.mrb[1].mxu1 }
  0xf7   :  { %v230_v36 = vadd.f32 %v226_v29, %v173_v34  ;;  %v234_v37 = vadd.f32 %v226_v29, %v183_v35  ;;  %v175_v38 = vpop.f32.mrb[2].mxu0  ;;  %v185_v39 = vpop.f32.mrb[2].mxu1 }
  0xf8   :  { %v231_v40 = vadd.f32 %v222_v28, %v175_v38  ;;  %v235_v41 = vadd.f32 %v222_v28, %v185_v39  ;;  %v177_v42 = vpop.f32.mrb[3].mxu0  ;;  %v187_v43 = vpop.f32.mrb[3].mxu1 }
  0xf9   :  { %v289_v44 = vpack.c.bf16 %v230_v36, %v229_v32  ;;  %v291_v45 = vpack.c.bf16 %v234_v37, %v233_v33  ;;  %v232_v46 = vadd.f32 %v226_v29, %v177_v42  ;;  %v236_v47 = vadd.f32 %v226_v29, %v187_v43 }
  0xfb   :  { %261 = vst [vmem:[%s433_s3] sm:$0xff] %v289_v44  ;;  %263 = vst [vmem:[%s433_s3 + $0x10] sm:$0xff] %v291_v45  ;;  %v290_v48 = vpack.c.bf16 %v232_v46, %v231_v40  ;;  %v292_v49 = vpack.c.bf16 %v236_v47, %v235_v41 }
  0xfd   :  { %262 = vst [vmem:[%s433_s3 + $0x8] sm:$0xff] %v290_v48  ;;  %264 = vst [vmem:[%s433_s3 + $0x18] sm:$0xff] %v292_v49 }

// kernel: transformer_core_forward.27
= control target key start
LH: loop header
LB: loop body
LE: loop exit
PB: predicated region body
PF: predicated region fallthrough
CT: control target
= control target key end

     0   :  { %v342_v1 = vmov 0   ;;  %v219_v23 = vlaneseq  ;;  %s438_s1 = inlined_call_operand.vmem [shape: bf16[128,256], index: 1, kind: input, shape index: {}]   ;;  %s439_s0 = inlined_call_operand.vmem [shape: f32[32,128], index: 0, kind: input, shape index: {}]   ;;  %s440_s2 = inlined_call_operand.vmem [shape: f32[1,256], index: 2, kind: input, shape index: {}]   ;;  %s441_s3 = inlined_call_operand.vmem [shape: bf16[32,256], index: 3, kind: output, shape index: {}]  }
   0x1   :  { %v318_v0 = vld [vmem:[%s438_s1 + $0x4] ss:$8 sps:$4 sm:$0xff]   ;;  %169 = vmatprep.mubr.bf16.mxu0 %v342_v1  ;;  %179 = vmatprep.mubr.bf16.mxu1 %v342_v1  ;;  %v320_v2 = vld [vmem:[%s438_s1] ss:$8 sps:$4 sm:$0xff]   ;;  %v321_v3 = vld [vmem:[%s438_s1 + $0x14] ss:$8 sps:$4 sm:$0xff]  }
   0x2   :  { %137 = vmatprep.subr.bf16.mxu0 %v318_v0  ;;  %301 = vmatprep.subr.bf16.mxu1 %v318_v0  ;;  %v323_v4 = vld [vmem:[%s438_s1 + $0x10] ss:$8 sps:$4 sm:$0xff]   ;;  %v324_v5 = vld [vmem:[%s438_s1 + $0x24] ss:$8 sps:$4 sm:$0xff]   ;;  %v326_v6 = vld [vmem:[%s438_s1 + $0x20] ss:$8 sps:$4 sm:$0xff]  }
   0x3   :  { %138 = vmatpush1.bf16.msra.mxu0 %v320_v2  ;;  %309 = vmatpush1.bf16.msra.mxu1 %v320_v2  ;;  %v327_v7 = vld [vmem:[%s438_s1 + $0x34] ss:$8 sps:$4 sm:$0xff]   ;;  %v329_v8 = vld [vmem:[%s438_s1 + $0x30] ss:$8 sps:$4 sm:$0xff]   ;;  %v330_v9 = vld [vmem:[%s438_s1 + $0x44] ss:$8 sps:$4 sm:$0xff]  }
   0x4   :  { %139 = vmatprep.subr.bf16.mxu0 %v321_v3  ;;  %302 = vmatprep.subr.bf16.mxu1 %v321_v3  ;;  %v332_v10 = vld [vmem:[%s438_s1 + $0x40] ss:$8 sps:$4 sm:$0xff]   ;;  %v333_v11 = vld [vmem:[%s438_s1 + $0x54] ss:$8 sps:$4 sm:$0xff]   ;;  %v335_v12 = vld [vmem:[%s438_s1 + $0x50] ss:$8 sps:$4 sm:$0xff]  }
   0x5   :  { %v336_v13 = vld [vmem:[%s438_s1 + $0x64] ss:$8 sps:$4 sm:$0xff]   ;;  %v338_v14 = vld [vmem:[%s438_s1 + $0x60] ss:$8 sps:$4 sm:$0xff]   ;;  %v339_v15 = vld [vmem:[%s438_s1 + $0x74] ss:$8 sps:$4 sm:$0xff]  }
   0x6   :  { %v341_v16 = vld [vmem:[%s438_s1 + $0x70] ss:$8 sps:$4 sm:$0xff]   ;;  %v35_v17 = vld [vmem:[%s439_s0] sm:$0xff]  ;;  %v36_v18 = vld [vmem:[%s439_s0 + $0x8] sm:$0xff]  ;;  %v220_v24 = vshrl.u32 %v219_v23, 7 }
   0x7   :  { %140 = vmatpush1.bf16.msra.mxu0 %v323_v4  ;;  %310 = vmatpush1.bf16.msra.mxu1 %v323_v4  ;;  %v37_v19 = vld [vmem:[%s439_s0 + $0x10] sm:$0xff]  ;;  %v38_v20 = vld [vmem:[%s439_s0 + $0x18] sm:$0xff]  ;;  %v39_v21 = vpack.c.bf16 %v36_v18, %v35_v17  ;;  %v217_v26 = vld [vmem:[%s440_s2] sm:$0x3] }
   0x8   :  { %141 = vmatprep.subr.bf16.mxu0 %v324_v5  ;;  %303 = vmatprep.subr.bf16.mxu1 %v324_v5  ;;  %v40_v22 = vpack.c.bf16 %v38_v20, %v37_v19  ;;  %v221_v25 = vsub.s32 0, %v220_v24  ;;  %v225_v27 = vsub.s32 1, %v220_v24 }
   0xa   :  { %v222_v28 = vrot.slane %v217_v26, %v221_v25  ;;  %v226_v29 = vrot.slane %v217_v26, %v225_v27 }
   0xb   :  { %142 = vmatpush1.bf16.msra.mxu0 %v326_v6  ;;  %311 = vmatpush1.bf16.msra.mxu1 %v326_v6 }
   0xc   :  { %143 = vmatprep.subr.bf16.mxu0 %v327_v7  ;;  %304 = vmatprep.subr.bf16.mxu1 %v327_v7 }
   0xf   :  { %144 = vmatpush1.bf16.msra.mxu0 %v329_v8  ;;  %312 = vmatpush1.bf16.msra.mxu1 %v329_v8 }
  0x10   :  { %145 = vmatprep.subr.bf16.mxu0 %v330_v9  ;;  %305 = vmatprep.subr.bf16.mxu1 %v330_v9 }
  0x13   :  { %146 = vmatpush1.bf16.msra.mxu0 %v332_v10  ;;  %313 = vmatpush1.bf16.msra.mxu1 %v332_v10 }
  0x14   :  { %147 = vmatprep.subr.bf16.mxu0 %v333_v11  ;;  %306 = vmatprep.subr.bf16.mxu1 %v333_v11 }
  0x17   :  { %148 = vmatpush1.bf16.msra.mxu0 %v335_v12  ;;  %314 = vmatpush1.bf16.msra.mxu1 %v335_v12 }
  0x18   :  { %149 = vmatprep.subr.bf16.mxu0 %v336_v13  ;;  %307 = vmatprep.subr.bf16.mxu1 %v336_v13 }
  0x1b   :  { %150 = vmatpush1.bf16.msra.mxu0 %v338_v14  ;;  %315 = vmatpush1.bf16.msra.mxu1 %v338_v14 }
  0x1c   :  { %151 = vmatprep.subr.bf16.mxu0 %v339_v15  ;;  %308 = vmatprep.subr.bf16.mxu1 %v339_v15 }
  0x1f   :  { %152 = vmatpush1.bf16.msra.mxu0 %v341_v16  ;;  %316 = vmatpush1.bf16.msra.mxu1 %v341_v16 }
  0x22   :  { %170 = vmatmul.mubr.bf16.vlgmr.msra.gmra.mrb[0].mxu0 %v39_v21  ;;  %180 = vmatmul.mubr.bf16.vlgmr.msra.gmra.mrb[0].mxu1 %v40_v22 }
  0xf5   :  { %v171_v30 = vpop.f32.mrb[0].mxu0  ;;  %v181_v31 = vpop.f32.mrb[0].mxu1 }
  0xf6   :  { %v229_v32 = vadd.f32 %v222_v28, %v171_v30  ;;  %v233_v33 = vadd.f32 %v222_v28, %v181_v31  ;;  %v173_v34 = vpop.f32.mrb[1].mxu0  ;;  %v183_v35 = vpop.f32.mrb[1].mxu1 }
  0xf7   :  { %v230_v36 = vadd.f32 %v226_v29, %v173_v34  ;;  %v234_v37 = vadd.f32 %v226_v29, %v183_v35  ;;  %v175_v38 = vpop.f32.mrb[2].mxu0  ;;  %v185_v39 = vpop.f32.mrb[2].mxu1 }
  0xf8   :  { %v237_v40 = vmax.f32 %v229_v32, 0.0  ;;  %v241_v41 = vmax.f32 %v233_v33, 0.0  ;;  %v231_v42 = vadd.f32 %v222_v28, %v175_v38  ;;  %v235_v43 = vadd.f32 %v222_v28, %v185_v39  ;;  %v177_v44 = vpop.f32.mrb[3].mxu0  ;;  %v187_v45 = vpop.f32.mrb[3].mxu1 }
  0xf9   :  { %v238_v46 = vmax.f32 %v230_v36, 0.0  ;;  %v242_v47 = vmax.f32 %v234_v37, 0.0  ;;  %v232_v48 = vadd.f32 %v226_v29, %v177_v44  ;;  %v236_v49 = vadd.f32 %v226_v29, %v187_v45 }
  0xfa   :  { %v239_v50 = vmax.f32 %v231_v42, 0.0  ;;  %v243_v51 = vmax.f32 %v235_v43, 0.0 }
  0xfb   :  { %v297_v52 = vpack.c.bf16 %v238_v46, %v237_v40  ;;  %v299_v53 = vpack.c.bf16 %v242_v47, %v241_v41  ;;  %v240_v54 = vmax.f32 %v232_v48, 0.0  ;;  %v244_v55 = vmax.f32 %v236_v49, 0.0 }
  0xfd   :  { %269 = vst [vmem:[%s441_s3] sm:$0xff] %v297_v52  ;;  %271 = vst [vmem:[%s441_s3 + $0x10] sm:$0xff] %v299_v53  ;;  %v298_v56 = vpack.c.bf16 %v240_v54, %v239_v50  ;;  %v300_v57 = vpack.c.bf16 %v244_v55, %v243_v51 }
  0xff   :  { %270 = vst [vmem:[%s441_s3 + $0x8] sm:$0xff] %v298_v56  ;;  %272 = vst [vmem:[%s441_s3 + $0x18] sm:$0xff] %v300_v57 }

// kernel: transformer_core_forward.25
= control target key start
LH: loop header
LB: loop body
LE: loop exit
PB: predicated region body
PF: predicated region fallthrough
CT: control target
= control target key end

     0   :  { %s1795_s15 = smov 0   ;;  %s1797_s16 = smov 0   ;;  %s2184_s0 = inlined_call_operand.vmem [shape: bf16[2,16,128], index: 0, kind: input, shape index: {}]   ;;  %s2185_s1 = inlined_call_operand.vmem [shape: bf16[2,16,256], index: 1, kind: input, shape index: {}, may-alias: {1,2}]   ;;  %s2186_s2 = inlined_call_operand.vmem [shape: bf16[2,16,256], index: 2, kind: input, shape index: {}, may-alias: {1,2}]   ;;  %s2187_s3 = inlined_call_operand.vmem [shape: f32[2,1,16], index: 3, kind: input, shape index: {}]   ;;  %s2188_s4 = inlined_call_operand.vmem [shape: bf16[2,16,128], index: 4, kind: output, shape index: {}]  }
   0x1   :  { %s1799_s17 = smov 0   ;;  %s1801_s18 = smov 0  }
   0x2   :  { %s1803_s19 = smov 0  }
   0x3 LB: > { %s33_s20 = sadd.s32 1, %s1754_s18  ;;  %p77_p1 = scmp.ne.s32.totalorder %s1746_s16, %s1742_s15  ;;  %s1758_s19 = sphi %s1803_s19, %s14_s19   ;;  %s1754_s18 = sphi %s1801_s18, %s2193_s18   ;;  %s1750_s17 = sphi %s1799_s17, %s2192_s17   ;;  %s1746_s16 = sphi %s1797_s16, %s2191_s16   ;;  %s1742_s15 = sphi %s1795_s15, %s2190_s15  }
   0x4   : > { %p35_p0 = scmp.ge.s32.totalorder %s33_s20, 2  ;;  %p78_p2 = scmp.eq.s32.totalorder %s1758_s19, 0 }
   0x5   : > { %s70_s23 = sadd.s32 1, %s1746_s16  ;;  %p1471_p5 = scmp.ge.s32.totalorder %s1758_s19, 2 }
   0x6   : > { %s2195_s20 = smov (%p35_p0, %s33_s20), 0  ;;  %p1826_p3 = por %p78_p2, %p77_p1 }
   0x7   : > { %s65_s22 = ssub.s32 %s1754_s18, %s2195_s20  ;;  %187 = sbr.rel (%p1471_p5) target bundleno = 28 (0x1c), region = 16 }
   0x8   : > { %p68_p4 = scmp.eq.s32.totalorder %s65_s22, 0 }
   0xa   : > { %s1834_s24 = scalar_select %p68_p4, %s1746_s16, %s70_s23  }
   0xe   : > { %203 = sbr.rel (!%p1826_p3) target bundleno = 21 (0x15), region = 24  ;;  %s205_s25 = sand.u32 (%p1826_p3), 1, %s1746_s16  }
   0xf   : > { %s1518_s26 = sshll.u32 (%p1826_p3), %s1754_s18, 4  ;;  %s1472_s27 = sshll.u32 (%p1826_p3), %s205_s25, 3 }
  0x10   : > { %s213_s30 = scalar_lea.vmem (%p1826_p3), %s2185_s1, %s1518_s26  ;;  %s207_s5 = scalar_lea.vmem (%p1826_p3), [#allocation5], %s1472_s27 }
  0x11   : > { %v229_v0 = vld [vmem:[%s213_s30] sm:$0xf] (%p1826_p3)  ;;  %v231_v1 = vld [vmem:[%s213_s30 + $0x8] sm:$0xf] (%p1826_p3) }
  0x12   : > { %230 = vst [vmem:[%s207_s5] sm:$0xf] (%p1826_p3), %v229_v0  ;;  %232 = vst [vmem:[%s207_s5 + $0x4] sm:$0xf] (%p1826_p3), %v231_v1 }
  0x15 PF: > { %259 = sbr.rel (!%p1826_p3) target bundleno = 28 (0x1c), region = 65  ;;  %s261_s6 = sand.u32 (%p1826_p3), 1, %s1746_s16  }
  0x16   : > { %s1519_s7 = sshll.u32 (%p1826_p3), %s1754_s18, 4  ;;  %s1475_s8 = sshll.u32 (%p1826_p3), %s261_s6, 3 }
  0x17   : > { %s1370_s11 = scalar_lea.vmem (%p1826_p3), %s2186_s2, %s1519_s7  ;;  %s263_s12 = scalar_lea.vmem (%p1826_p3), [#allocation6], %s1475_s8 }
  0x18   : > { %v1478_v2 = vld [vmem:[%s1370_s11 + $0x4] sm:$0xf] (%p1826_p3)  ;;  %v1479_v3 = vld [vmem:[%s1370_s11 + $0xc] sm:$0xf] (%p1826_p3) }
  0x19   : > { %287 = vst [vmem:[%s263_s12] sm:$0xf] (%p1826_p3), %v1478_v2  ;;  %289 = vst [vmem:[%s263_s12 + $0x4] sm:$0xf] (%p1826_p3), %v1479_v3 }
  0x1c PF: > { %p1480_p6 = scmp.ge.s32.totalorder %s1758_s19, 1  ;;  %p324_p7 = scmp.lt.s32.totalorder %s1758_s19, 3 }
  0x1e   : > { %p325_p8 = pnand %p1480_p6, %p324_p7 }
  0x1f   : > { %s331_s13 = sand.u32 (!%p325_p8), 1, %s1742_s15   ;;  %p387_p9 = scmp.lt.s32.totalorder (!%p325_p8), %s1750_s17, 1  ;;  %v1760_v4 = vmov (!%p325_p8), 0.0   ;;  %vm1761_vm0 = vmmov (!%p325_p8), 0   ;;  %vm449_vm1 = vcmask (!%p325_p8), 261120   ;;  %vm419_vm2 = vcmask (!%p325_p8), 31744  }
  0x20   : > { %328 = sbr.rel (%p325_p8) target bundleno = 1462 (0x5b6), region = 110  ;;  %1546 = vmatprep.subr.bf16.mxu0 (!%p325_p8), %v1760_v4  ;;  %424 = vst [vmem:[#allocation4] sm:$0xff] (!%p325_p8), %v1760_v4  ;;  %425 = vst [vmem:[#allocation4 + $0x8] sm:$0xff] (!%p325_p8), %v1760_v4  ;;  %s1858_s14 = sshll.u32 (!%p325_p8), %s331_s13, 3  ;;  %1548 = vmatprep.mubr.msk.bf16.mxu0 (!%p325_p8), %vm1761_vm0, %v1760_v4  ;;  %v1762_v8 = vmov (!%p325_p8), -1e+30  }
  0x21   : > { %1552 = vmatprep.subr.bf16.mxu1 (!%p325_p8), %v1760_v4  ;;  %1554 = vmatprep.mubr.msk.bf16.mxu1 (!%p325_p8), %vm1761_vm0, %v1760_v4  ;;  %s1866_s15 = scalar_lea.vmem (!%p325_p8), [#allocation5], %s1858_s14  ;;  %420 = vst.msk [vmem:[#allocation2] sm:$0xff] (!%p325_p8), %vm419_vm2, %v1762_v8  ;;  %421 = vst.msk [vmem:[#allocation2 + $0x8] sm:$0xff] (!%p325_p8), %vm419_vm2, %v1762_v8  ;;  %vm499_vm3 = vcmask (!%p325_p8), 130048   ;;  %v1763_v18 = vmov (!%p325_p8), 0   ;;  %s1764_s29 = smov (!%p325_p8), 96  }
  0x22   : > { %v1660_v5 = vld [vmem:[%s1866_s15] sm:$0xff] (!%p325_p8)   ;;  %422 = vst.msk [vmem:[#allocation3] sm:$0xff] (!%p325_p8), %vm419_vm2, %v1760_v4  ;;  %423 = vst.msk [vmem:[#allocation3 + $0x8] sm:$0xff] (!%p325_p8), %vm419_vm2, %v1760_v4  ;;  %1644 = vset.pattern.permute.xlu1 (!%p325_p8), %v1763_v18  ;;  %vm542_vm4 = vcmask (!%p325_p8), 7168   ;;  %s1925_s30 = scalar_lea.vmem (!%p325_p8), [#allocation6], %s1858_s14  ;;  %s1765_s5 = smov (!%p325_p8), 64  }
  0x23   : > { %v454_v6 = vsel (!%p325_p8), %vm449_vm1, %v1660_v5, 0  ;;  %v1662_v19 = vld [vmem:[%s1866_s15] sm:$0xff] (!%p325_p8)   ;;  %v1668_v30 = vld [vmem:[%s1925_s30] sm:$0xff] (!%p325_p8)   ;;  %s1766_s6 = smov (!%p325_p8), 32   ;;  %vm727_vm5 = vcmask (!%p325_p8), 15368   ;;  %vm923_vm6 = vcmask (!%p325_p8), 23568  }
  0x24   : > { %1547 = vmatpush3.bf16.xpose.msra.mxu0 (!%p325_p8), %v454_v6  ;;  %v1664_v29 = vld [vmem:[%s1866_s15] sm:$0xff] (!%p325_p8)   ;;  %1553 = vmatpush3.bf16.msra.mxu1 (!%p325_p8), %v1668_v30  ;;  %vm1119_vm7 = vcmask (!%p325_p8), 31768   ;;  %vm807_vm8 = vcmask (!%p325_p8), 523520   ;;  %vm1003_vm9 = vcmask (!%p325_p8), 785920   ;;  %vm1199_vm10 = vcmask (!%p325_p8), 1048320  }
  0x25   : > { %1564 = vmatprep.subr.bf16.mxu0 (!%p325_p8), %v1760_v4  ;;  %1558 = vmatprep.subr.bf16.mxu1 (!%p325_p8), %v1760_v4  ;;  %v1666_v32 = vld [vmem:[%s1866_s15] sm:$0xff] (!%p325_p8)   ;;  %vm1233_vm11 = vcmask (!%p325_p8), 257024   ;;  %vm1262_vm12 = vcmask (!%p325_p8), 519424   ;;  %vm1291_vm13 = vcmask (!%p325_p8), 781824   ;;  %vm1320_vm14 = vcmask (!%p325_p8), 1044224  }
  0x27   : > { %s2197_s17 = smov (!%p387_p9, %s1750_s17), 1 }
  0x28   : > { %s1520_s21 = sshll.u32 %s2197_s17, 3  ;;  %s403_s28 = scalar_lea.vmem %s2187_s3, %s2197_s17  ;;  %v1901_v20 = vld [vmem:[#allocation2] sm:$0xff]  ;;  %v1906_v23 = vld [vmem:[#allocation2 + $0x8] sm:$0xff] }
  0x29   : > { %s1879_s25 = scalar_lea.vmem %s2184_s0, %s1520_s21  ;;  %v1892_v9 = vld [vmem:[%s403_s28] ss:$0 sm:$0xff]  ;;  %s412_s9 = scalar_lea.vmem %s2188_s4, %s1520_s21 }
  0x2a   : > { %v1661_v7 = vld [vmem:[%s1879_s25] sm:$0xff]  }
  0x2b   : > { %1549 = vmatmul.mubr.msk.bf16.vlgmr.msra.gmra.mrb[0].mxu0 %vm449_vm1, %v1661_v7  ;;  %v1663_v28 = vld [vmem:[%s1879_s25] sm:$0xff]  }
  0x2c   : > { %1566 = vmatprep.mubr.msk.bf16.mxu0 %vm1761_vm0, %v1760_v4  ;;  %v1665_v31 = vld [vmem:[%s1879_s25] sm:$0xff]  }
  0x2d   : > { %v1667_v33 = vld [vmem:[%s1879_s25] sm:$0xff]  }
  0xfe   : > { %v490_v10 = vpop.f32.mrb[0].mxu0 }
  0xff   : > { %v491_v11 = vadd.f32 %v1892_v9, %v490_v10  ;;  %v1550_v12 = vpop.f32.mrb[1].mxu0 }
 0x100   : > { %v493_v13 = vpop.f32.mrb[2].mxu0 }
 0x101   : > { %v494_v14 = vadd.f32 %v1892_v9, %v493_v13  ;;  %v1551_v15 = vpop.f32.mrb[3].mxu0  ;;  %v500_v16 = vsel %vm499_vm3, %v491_v11, -inf }
 0x102   : > { %501 = vmax.xlane.f32.xlu0 %v500_v16 }
 0x103   : > { %v503_v17 = vsel %vm499_vm3, %v494_v14, -inf }
 0x106   : > { %504 = vmax.xlane.f32.xlu0 %v503_v17  ;;  %v1767_v17 = vmov 1  }
 0x107   : > { %1645 = vset.pattern.permute.xlu0 %v1767_v17 }
 0x11c   : > { %634 = vrot.lane.b32.xlu0 %v1662_v19, %s1764_s29 }
 0x18f   : > { %v502_v21 = vpop.xlane.xlu0 %501 }
 0x190   : > { %v1904_v22 = vmax.f32 %v1901_v20, %v502_v21 }
 0x192   : > { %v508_v24 = vsub.f32 %v1901_v20, %v1904_v22  ;;  %614 = vst.msk [vmem:[#allocation2] sm:$0xff] %vm542_vm4, %v1904_v22  ;;  %516 = vperm.xlu1 %1644, %v1904_v22  }
 0x193   : > { %v505_v25 = vpop.xlane.xlu0 %504 }
 0x194   : > { %v1914_v26 = vmax.f32 %v1906_v23, %v505_v25 }
 0x196   : > { %v509_v27 = vsub.f32 %v1906_v23, %v1914_v26  ;;  %615 = vst.msk [vmem:[#allocation2 + $0x8] sm:$0xff] %vm542_vm4, %v1914_v26  ;;  %521 = vperm.xlu1 %1644, %v1914_v26  }
 0x197   : > { %v635_v40 = vpop.permute.xlu0 %634 }
 0x198   : > { %v640_v44 = vsel %vm449_vm1, %v635_v40, 0 }
 0x199   : > { %v1993_v21 = vld [vmem:[#allocation2] sm:$0xff] }
 0x19a   : > { %627 = vrot.lane.b32.xlu1 %v1663_v28, %s1764_s29 }
 0x19b   : > { %1646 = vset.pattern.permute.xlu1 %v1767_v17 }
 0x19d   : > { %v1998_v28 = vld [vmem:[#allocation2 + $0x8] sm:$0xff] }
 0x19e   : > { %830 = vrot.lane.b32.xlu1 %v1664_v29, %s1765_s5 }
 0x1a2   : > { %823 = vrot.lane.b32.xlu1 %v1665_v31, %s1765_s5 }
 0x1a6   : > { %1026 = vrot.lane.b32.xlu1 %v1666_v32, %s1766_s6  ;;  %v1669_v32 = vld [vmem:[%s1925_s30] sm:$0xff]  }
 0x1aa   : > { %1019 = vrot.lane.b32.xlu1 %v1667_v33, %s1766_s6 }
 0x211   : > { %v517_v34 = vpop.permute.xlu1 %516 }
 0x212   : > { %v524_v35 = vsub.f32 %v491_v11, %v517_v34 }
 0x214   : > { %v526_v36 = vmul.f32 1.442695, %v524_v35  ;;  %v1768_v35 = vmov 2  }
 0x215   : > { %v522_v37 = vpop.permute.xlu1 %521 }
 0x216   : > { %v525_v38 = vsub.f32 %v494_v14, %v522_v37  ;;  %1672 = vpow2.f32 %v526_v36 }
 0x218   : > { %v528_v39 = vmul.f32 1.442695, %v525_v38 }
 0x219   : > { %v628_v41 = vpop.permute.xlu1 %627 }
 0x21a   : > { %1674 = vpow2.f32 %v528_v39 }
 0x21d   : > { %v831_v46 = vpop.permute.xlu1 %830 }
 0x21e   : > { %v836_v48 = vsel %vm449_vm1, %v831_v46, 0 }
 0x220   : > { %v1936_v42 = vpop.eup %1672 }
 0x221   : > { %v824_v47 = vpop.permute.xlu1 %823 }
 0x224   : > { %v1938_v43 = vpop.eup %1674 }
 0x225   : > { %v559_v45 = vpack.c.bf16 %v1938_v43, %v1936_v42  ;;  %v1027_v49 = vpop.permute.xlu1 %1026 }
 0x226   : > { %v1032_v50 = vsel %vm449_vm1, %v1027_v49, 0 }
 0x227   : > { %1555 = vmatmul.mubr.msk.bf16.vlgmr.msra.gmra.mrb[0].mxu1 %vm499_vm3, %v559_v45  ;;  %v1670_v45 = vld [vmem:[%s1925_s30] sm:$0xff]  }
 0x228   : > { %1559 = vmatpush3.bf16.xpose.msra.mxu1 %v640_v44  ;;  %1560 = vmatprep.mubr.msk.bf16.mxu1 %vm1761_vm0, %v1760_v4 }
 0x229   : > { %1570 = vmatprep.subr.bf16.mxu1 %v1760_v4  ;;  %v1020_v51 = vpop.permute.xlu1 %1019 }
 0x22f   : > { %1561 = vmatmul.mubr.msk.bf16.vlgmr.msra.gmra.mrb[4].mxu1 %vm449_vm1, %v628_v41 }
 0x230   : > { %1571 = vmatpush3.bf16.xpose.msra.mxu1 %v836_v48  ;;  %1572 = vmatprep.mubr.msk.bf16.mxu1 %vm1761_vm0, %v1760_v4 }
 0x231   : > { %1582 = vmatprep.subr.bf16.mxu1 %v1760_v4 }
 0x237   : > { %1573 = vmatmul.mubr.msk.bf16.vlgmr.msra.gmra.mrb[8].mxu1 %vm449_vm1, %v824_v47 }
 0x238   : > { %1583 = vmatpush3.bf16.xpose.msra.mxu1 %v1032_v50  ;;  %1584 = vmatprep.mubr.msk.bf16.mxu1 %vm1761_vm0, %v1760_v4 }
 0x23f   : > { %1585 = vmatmul.mubr.msk.bf16.vlgmr.msra.gmra.mrb[12].mxu1 %vm449_vm1, %v1020_v51  ;;  %v1769_v51 = vmov 3  }
 0x2fa   : > { %v1957_v52 = vpop.f32.mrb[0].mxu1 }
 0x2fb   : > { %v1556_v53 = vpop.f32.mrb[1].mxu1 }
 0x2fc   : > { %v1959_v54 = vpop.f32.mrb[2].mxu1 }
 0x2fd   : > { %v1557_v55 = vpop.f32.mrb[3].mxu1 }
 0x302   : > { %v676_v56 = vpop.f32.mrb[4].mxu1 }
 0x303   : > { %v1962_v57 = vadd.f32 %v1892_v9, %v676_v56  ;;  %v1562_v58 = vpop.f32.mrb[5].mxu1 }
 0x304   : > { %v679_v59 = vpop.f32.mrb[6].mxu1  ;;  %v1671_v58 = vld [vmem:[%s1925_s30] sm:$0xff]  }
 0x305   : > { %v1965_v60 = vadd.f32 %v1892_v9, %v679_v59  ;;  %v1563_v61 = vpop.f32.mrb[7].mxu1  ;;  %v685_v62 = vsel %vm499_vm3, %v1962_v57, -inf  ;;  %v537_v59 = vsel %vm499_vm3, %v1938_v43, 0.0 }
 0x306   : > { %686 = vmax.xlane.f32.xlu1 %v685_v62  ;;  %v510_v61 = vmul.f32 1.442695, %v508_v24 }
 0x307   : > { %v688_v63 = vsel %vm499_vm3, %v1965_v60, -inf }
 0x308   : > { %689 = vmax.xlane.f32.xlu0 %v688_v63  ;;  %1676 = vpow2.f32 %v510_v61  ;;  %v534_v63 = vsel %vm499_vm3, %v1936_v42, 0.0 }
 0x30a   : > { %v872_v0 = vpop.f32.mrb[8].mxu1 }
 0x30b   : > { %v1972_v1 = vadd.f32 %v1892_v9, %v872_v0  ;;  %v1574_v2 = vpop.f32.mrb[9].mxu1  ;;  %v512_v0 = vmul.f32 1.442695, %v509_v27 }
 0x30c   : > { %v875_v3 = vpop.f32.mrb[10].mxu1 }
 0x30d   : > { %v1975_v5 = vadd.f32 %v1892_v9, %v875_v3  ;;  %v881_v6 = vsel %vm499_vm3, %v1972_v1, -inf  ;;  %v1575_v7 = vpop.f32.mrb[11].mxu1  ;;  %1678 = vpow2.f32 %v512_v0 }
 0x30e   : > { %882 = vmax.xlane.f32.xlu0 %v881_v6 }
 0x30f   : > { %v884_v8 = vsel %vm499_vm3, %v1975_v5, -inf }
 0x310   : > { %885 = vmax.xlane.f32.xlu1 %v884_v8 }
 0x312   : > { %v1068_v10 = vpop.f32.mrb[12].mxu1  ;;  %v2068_v62 = vpop.eup %1676 }
 0x313   : > { %v1982_v11 = vadd.f32 %v1892_v9, %v1068_v10  ;;  %v1586_v12 = vpop.f32.mrb[13].mxu1 }
 0x314   : > { %v1071_v13 = vpop.f32.mrb[14].mxu1 }
 0x315   : > { %v1985_v14 = vadd.f32 %v1892_v9, %v1071_v13  ;;  %v1077_v15 = vsel %vm499_vm3, %v1982_v11, -inf  ;;  %v1587_v16 = vpop.f32.mrb[15].mxu1 }
 0x316   : > { %1078 = vmax.xlane.f32.xlu0 %v1077_v15 }
 0x317   : > { %v1080_v19 = vsel %vm499_vm3, %v1985_v14, -inf  ;;  %v2076_v43 = vpop.eup %1678 }
 0x318   : > { %1081 = vmax.xlane.f32.xlu1 %v1080_v19 }
 0x393   : > { %v687_v9 = vpop.xlane.xlu1 %686 }
 0x394   : > { %v1996_v25 = vmax.f32 %v1993_v21, %v687_v9 }
 0x395   : > { %v690_v29 = vpop.xlane.xlu0 %689 }
 0x396   : > { %v693_v30 = vsub.f32 %v1993_v21, %v1996_v25  ;;  %810 = vst.msk [vmem:[#allocation2] sm:$0xff] %vm727_vm5, %v1996_v25  ;;  %v2005_v31 = vmax.f32 %v1998_v28, %v690_v29  ;;  %701 = vperm.xlu0 %1645, %v1996_v25  }
 0x398   : > { %v694_v33 = vsub.f32 %v1998_v28, %v2005_v31  ;;  %811 = vst.msk [vmem:[#allocation2 + $0x8] sm:$0xff] %vm727_vm5, %v2005_v31  ;;  %706 = vperm.xlu1 %1646, %v2005_v31  }
 0x39a   : > { %1142 = vrot.lane.b32.xlu0 %v1669_v32, %s1766_s6 }
 0x39b   : > { %v883_v34 = vpop.xlane.xlu0 %882  ;;  %1649 = vset.pattern.permute.xlu0 %v1763_v18 }
 0x39c   : > { %1647 = vset.pattern.permute.xlu1 %v1768_v35 }
 0x39d   : > { %v2017_v36 = vld [vmem:[#allocation2] sm:$0xff]  ;;  %v886_v37 = vpop.xlane.xlu1 %885 }
 0x39e   : > { %v2020_v38 = vmax.f32 %v2017_v36, %v883_v34 }
 0x39f   : > { %v2022_v39 = vld [vmem:[#allocation2 + $0x8] sm:$0xff] }
 0x3a0   : > { %v889_v40 = vsub.f32 %v2017_v36, %v2020_v38  ;;  %1006 = vst.msk [vmem:[#allocation2] sm:$0xff] %vm923_vm6, %v2020_v38  ;;  %v2029_v41 = vmax.f32 %v2022_v39, %v886_v37  ;;  %897 = vperm.xlu1 %1647, %v2020_v38  }
 0x3a2   : > { %v890_v44 = vsub.f32 %v2022_v39, %v2029_v41  ;;  %1007 = vst.msk [vmem:[#allocation2 + $0x8] sm:$0xff] %vm923_vm6, %v2029_v41 }
 0x3a3   : > { %v1079_v46 = vpop.xlane.xlu0 %1078 }
 0x3a4   : > { %902 = vperm.xlu1 %1647, %v2029_v41  }
 0x3a5   : > { %v1082_v48 = vpop.xlane.xlu1 %1081 }
 0x3a7   : > { %v2038_v47 = vld [vmem:[#allocation2] sm:$0xff] }
 0x3a8   : > { %v2041_v49 = vmax.f32 %v2038_v47, %v1079_v46  ;;  %750 = vrot.lane.b32.xlu1 %v1670_v45, %s1764_s29 }
 0x3a9   : > { %v2044_v50 = vld [vmem:[#allocation2 + $0x8] sm:$0xff]  ;;  %1648 = vset.pattern.permute.xlu1 %v1769_v51 }
 0x3aa   : > { %v1085_v53 = vsub.f32 %v2038_v47, %v2041_v49  ;;  %1202 = vst.msk [vmem:[#allocation2] sm:$0xff] %vm1119_vm7, %v2041_v49  ;;  %v2052_v55 = vmax.f32 %v2044_v50, %v1082_v48 }
 0x3ac   : > { %v1086_v56 = vsub.f32 %v2044_v50, %v2052_v55  ;;  %1203 = vst.msk [vmem:[#allocation2 + $0x8] sm:$0xff] %vm1119_vm7, %v2052_v55  ;;  %1093 = vperm.xlu1 %1648, %v2041_v49  }
 0x3b0   : > { %1098 = vperm.xlu1 %1648, %v2052_v55  }
 0x3b4   : > { %946 = vrot.lane.b32.xlu1 %v1671_v58, %s1765_s5 }
 0x3b5   : > { %1650 = vset.pattern.permute.xlu1 %v1763_v18 }
 0x3b9   : > { %538 = vadd.xlane.f32.xlu0 %v537_v59  ;;  %v531_v59 = vld [vmem:[#allocation3 + $0x8] sm:$0xff] }
 0x3ba   : > { %v533_v61 = vmul.f32 %v2076_v43, %v531_v59 }
 0x3cf   : > { %549 = vperm.xlu0 %1649, %v2068_v62  }
 0x3d8   : > { %535 = vadd.xlane.f32.xlu1 %v534_v63 }
 0x3e9   : > { %554 = vperm.xlu1 %1650, %v2076_v43  }
 0x3ed   : > { %1651 = vset.pattern.permute.xlu1 %v1767_v17 }
 0x415   : > { %v702_v20 = vpop.permute.xlu0 %701 }
 0x416   : > { %v709_v22 = vsub.f32 %v1962_v57, %v702_v20 }
 0x417   : > { %v707_v24 = vpop.permute.xlu1 %706 }
 0x418   : > { %v711_v2 = vmul.f32 1.442695, %v709_v22  ;;  %v710_v3 = vsub.f32 %v1965_v60, %v707_v24  ;;  %v695_v60 = vmul.f32 1.442695, %v693_v30 }
 0x41a   : > { %1680 = vpow2.f32 %v711_v2  ;;  %v713_v42 = vmul.f32 1.442695, %v710_v3  ;;  %v891_v2 = vmul.f32 1.442695, %v889_v40  ;;  %v530_v3 = vld [vmem:[#allocation3] sm:$0xff] }
 0x41b   : > { %v532_v43 = vmul.f32 %v2068_v62, %v530_v3  ;;  %v1089_v40 = vmul.f32 1.442695, %v1086_v56 }
 0x41c   : > { %1682 = vpow2.f32 %v713_v42  ;;  %v893_v42 = vmul.f32 1.442695, %v890_v44 }
 0x41f   : > { %v898_v6 = vpop.permute.xlu1 %897 }
 0x420   : > { %v905_v23 = vsub.f32 %v1972_v1, %v898_v6 }
 0x422   : > { %v907_v12 = vmul.f32 1.442695, %v905_v23 }
 0x423   : > { %v903_v26 = vpop.permute.xlu1 %902 }
 0x424   : > { %v1681_v27 = vpop.eup %1680  ;;  %v906_v7 = vsub.f32 %v1975_v5, %v903_v26  ;;  %v697_v5 = vmul.f32 1.442695, %v694_v33  ;;  %v1087_v26 = vmul.f32 1.442695, %v1085_v53 }
 0x425   : > { %v719_v8 = vsel %vm499_vm3, %v1681_v27, 0.0 }
 0x426   : > { %v1683_v10 = vpop.eup %1682  ;;  %v909_v13 = vmul.f32 1.442695, %v906_v7  ;;  %720 = vadd.xlane.f32.xlu1 %v719_v8 }
 0x427   : > { %v751_v57 = vpop.permute.xlu1 %750  ;;  %v722_v15 = vsel %vm499_vm3, %v1683_v10, 0.0  ;;  %v744_v1 = vpack.c.bf16 %v1683_v10, %v1681_v27 }
 0x428   : > { %1684 = vpow2.f32 %v909_v13  ;;  %723 = vadd.xlane.f32.xlu0 %v722_v15  ;;  %1565 = vmatpush3.bf16.msra.mxu0 %v751_v57 }
 0x429   : > { %1576 = vmatprep.subr.bf16.mxu0 %v1760_v4  ;;  %1686 = vpow2.f32 %v907_v12 }
 0x42a   : > { %1688 = vpow2.f32 %v695_v60 }
 0x42b   : > { %1567 = vmatmul.mubr.msk.bf16.vlgmr.msra.gmra.mrb[4].mxu0 %vm499_vm3, %v744_v1  ;;  %v1094_v16 = vpop.permute.xlu1 %1093  ;;  %1690 = vpow2.f32 %v697_v5 }
 0x42c   : > { %v1101_v19 = vsub.f32 %v1982_v11, %v1094_v16  ;;  %1578 = vmatprep.mubr.msk.bf16.mxu0 %vm1761_vm0, %v1760_v4  ;;  %v1143_v11 = vpop.permute.xlu0 %1142 }
 0x42e   : > { %v1103_v21 = vmul.f32 1.442695, %v1101_v19 }
 0x42f   : > { %v1099_v9 = vpop.permute.xlu1 %1098 }
 0x430   : > { %1692 = vpow2.f32 %v1103_v21  ;;  %v1102_v25 = vsub.f32 %v1985_v14, %v1099_v9 }
 0x432   : > { %v1685_v29 = vpop.eup %1684  ;;  %v1105_v30 = vmul.f32 1.442695, %v1102_v25 }
 0x433   : > { %v947_v32 = vpop.permute.xlu1 %946  ;;  %v918_v28 = vsel %vm499_vm3, %v1685_v29, 0.0  ;;  %v1687_v31 = vpop.eup %1686 }
 0x434   : > { %1694 = vpow2.f32 %v1105_v30  ;;  %919 = vadd.xlane.f32.xlu0 %v918_v28  ;;  %1577 = vmatpush3.bf16.msra.mxu0 %v947_v32  ;;  %v940_v33 = vpack.c.bf16 %v1685_v29, %v1687_v31  ;;  %v1689_v34 = vpop.eup %1688  ;;  %v915_v24 = vsel %vm499_vm3, %v1687_v31, 0.0 }
 0x435   : > { %1588 = vmatprep.subr.bf16.mxu0 %v1760_v4  ;;  %v1691_v14 = vpop.eup %1690  ;;  %1696 = vpow2.f32 %v891_v2 }
 0x436   : > { %1698 = vpow2.f32 %v893_v42 }
 0x437   : > { %734 = vperm.xlu1 %1651, %v1689_v34   ;;  %1579 = vmatmul.mubr.msk.bf16.vlgmr.msra.gmra.mrb[8].mxu0 %vm499_vm3, %v940_v33  ;;  %1700 = vpow2.f32 %v1087_v26 }
 0x438   : > { %1589 = vmatpush3.bf16.msra.mxu0 %v1143_v11  ;;  %1590 = vmatprep.mubr.msk.bf16.mxu0 %vm1761_vm0, %v1760_v4  ;;  %1702 = vpow2.f32 %v1089_v40 }
 0x43a   : > { %v1693_v37 = vpop.eup %1692 }
 0x43b   : > { %739 = vperm.xlu1 %1651, %v1691_v14   ;;  %v1111_v45 = vsel %vm499_vm3, %v1693_v37, 0.0 }
 0x43c   : > { %1112 = vadd.xlane.f32.xlu0 %v1111_v45 }
 0x43e   : > { %v1695_v46 = vpop.eup %1694 }
 0x43f   : > { %v1114_v48 = vsel %vm499_vm3, %v1695_v46, 0.0  ;;  %v1136_v58 = vpack.c.bf16 %v1695_v46, %v1693_v37  ;;  %1652 = vset.pattern.permute.xlu1 %v1768_v35  ;;  %v1697_v39 = vpop.eup %1696 }
 0x440   : > { %1115 = vadd.xlane.f32.xlu0 %v1114_v48  ;;  %v1699_v41 = vpop.eup %1698 }
 0x441   : > { %1591 = vmatmul.mubr.msk.bf16.vlgmr.msra.gmra.mrb[12].mxu0 %vm499_vm3, %v1136_v58  ;;  %v1701_v44 = vpop.eup %1700 }
 0x442   : > { %v1703_v47 = vpop.eup %1702 }
 0x446   : > { %v539_v63 = vpop.xlane.xlu0 %538 }
 0x447   : > { %v541_v4 = vadd.f32 %v539_v63, %v533_v61 }
 0x449   : > { %544 = vst.msk [vmem:[#allocation3 + $0x8] sm:$0xff] %vm542_vm4, %v541_v4 }
 0x44e   : > { %v550_v0 = vpop.permute.xlu0 %549 }
 0x44f   : > { %v557_v20 = vmul.f32 0.0, %v550_v0 }
 0x450   : > { %v716_v49 = vld [vmem:[#allocation3 + $0x8] sm:$0xff] }
 0x451   : > { %v610_v22 = vadd.f32 %v1957_v52, %v557_v20  ;;  %v718_v56 = vmul.f32 %v1691_v14, %v716_v49 }
 0x453   : > { %612 = vst.msk [vmem:[#allocation4] sm:$0xff] %vm449_vm1, %v610_v22 }
 0x45a   : > { %v730_v61 = vld [vmem:[#allocation4] sm:$0xff] }
 0x45f   : > { %916 = vadd.xlane.f32.xlu1 %v915_v24 }
 0x465   : > { %v536_v6 = vpop.xlane.xlu1 %535 }
 0x466   : > { %v540_v23 = vadd.f32 %v536_v6, %v532_v43 }
 0x468   : > { %543 = vst.msk [vmem:[#allocation3] sm:$0xff] %vm542_vm4, %v540_v23 }
 0x469   : > { %v555_v52 = vpop.permute.xlu1 %554 }
 0x46a   : > { %v558_v36 = vmul.f32 0.0, %v555_v52 }
 0x46c   : > { %v611_v38 = vadd.f32 %v1959_v54, %v558_v36 }
 0x46e   : > { %613 = vst.msk [vmem:[#allocation4 + $0x8] sm:$0xff] %vm449_vm1, %v611_v38 }
 0x46f   : > { %v715_v54 = vld [vmem:[#allocation3] sm:$0xff] }
 0x470   : > { %930 = vperm.xlu1 %1652, %v1697_v39   ;;  %v717_v53 = vmul.f32 %v1689_v34, %v715_v54 }
 0x474   : > { %935 = vperm.xlu1 %1652, %v1699_v41  }
 0x475   : > { %v731_v52 = vld [vmem:[#allocation4 + $0x8] sm:$0xff] }
 0x478   : > { %1653 = vset.pattern.permute.xlu1 %v1769_v51 }
 0x479   : > { %1126 = vperm.xlu1 %1653, %v1701_v44  }
 0x47d   : > { %1131 = vperm.xlu1 %1653, %v1703_v47  }
 0x481   : > { %1654 = vset.pattern.permute.xlu1 %v1763_v18 }
 0x4b3   : > { %v721_v50 = vpop.xlane.xlu1 %720 }
 0x4b4   : > { %v725_v55 = vadd.f32 %v721_v50, %v717_v53 }
 0x4b5   : > { %v724_v62 = vpop.xlane.xlu0 %723 }
 0x4b6   : > { %728 = vst.msk [vmem:[#allocation3] sm:$0xff] %vm727_vm5, %v725_v55  ;;  %v726_v27 = vadd.f32 %v724_v62, %v718_v56 }
 0x4b7   : > { %v735_v1 = vpop.permute.xlu1 %734 }
 0x4b8   : > { %729 = vst.msk [vmem:[#allocation3 + $0x8] sm:$0xff] %vm727_vm5, %v726_v27  ;;  %v742_v63 = vmul.f32 %v735_v1, %v730_v61 }
 0x4bb   : > { %v2134_v5 = vpop.permute.xlu1 %739 }
 0x4bc   : > { %v743_v26 = vmul.f32 %v2134_v5, %v731_v52 }
 0x4bd   : > { %v911_v16 = vld [vmem:[#allocation3] sm:$0xff] }
 0x4be   : > { %v913_v19 = vmul.f32 %v1697_v39, %v911_v16 }
 0x4bf   : > { %v912_v7 = vld [vmem:[#allocation3 + $0x8] sm:$0xff] }
 0x4c0   : > { %v914_v8 = vmul.f32 %v1699_v41, %v912_v7 }
 0x4c1   : > { %v920_v10 = vpop.xlane.xlu0 %919 }
 0x4c2   : > { %v922_v12 = vadd.f32 %v920_v10, %v914_v8 }
 0x4c4   : > { %925 = vst.msk [vmem:[#allocation3 + $0x8] sm:$0xff] %vm923_vm6, %v922_v12 }
 0x4c9   : > { %v1113_v13 = vpop.xlane.xlu0 %1112 }
 0x4cb   : > { %v1108_v18 = vld [vmem:[#allocation3 + $0x8] sm:$0xff] }
 0x4cc   : > { %v1110_v57 = vmul.f32 %v1703_v47, %v1108_v18 }
 0x4cd   : > { %v1116_v15 = vpop.xlane.xlu0 %1115 }
 0x4ce   : > { %v1118_v60 = vadd.f32 %v1116_v15, %v1110_v57 }
 0x4d0   : > { %1121 = vst.msk [vmem:[#allocation3 + $0x8] sm:$0xff] %vm1119_vm7, %v1118_v60 }
 0x4d7   : > { %v1210_v34 = vld [vmem:[#allocation3 + $0x8] sm:$0xff] }
 0x4ec   : > { %v917_v21 = vpop.xlane.xlu1 %916 }
 0x4ed   : > { %v921_v9 = vadd.f32 %v917_v21, %v913_v19 }
 0x4ef   : > { %924 = vst.msk [vmem:[#allocation3] sm:$0xff] %vm923_vm6, %v921_v9 }
 0x4f6   : > { %v1107_v25 = vld [vmem:[#allocation3] sm:$0xff] }
 0x4f7   : > { %v1109_v29 = vmul.f32 %v1701_v44, %v1107_v25 }
 0x4f9   : > { %v1117_v30 = vadd.f32 %v1113_v13, %v1109_v29 }
 0x4fb   : > { %1120 = vst.msk [vmem:[#allocation3] sm:$0xff] %vm1119_vm7, %v1117_v30 }
 0x4fe   : > { %v790_v32 = vpop.f32.mrb[4].mxu0 }
 0x4ff   : > { %799 = vrot.lane.b32.xlu0 %v790_v32, %s1766_s6  ;;  %v1568_v28 = vpop.f32.mrb[5].mxu0 }
 0x500   : > { %v793_v31 = vpop.f32.mrb[6].mxu0 }
 0x501   : > { %v1569_v33 = vpop.f32.mrb[7].mxu0 }
 0x502   : > { %v1209_v11 = vld [vmem:[#allocation3] sm:$0xff] }
 0x503   : > { %1213 = vperm.xlu1 %1654, %v1209_v11   ;;  %1218 = vperm.xlu0 %1649, %v1210_v34  }
 0x507   : > { %1655 = vset.pattern.permute.xlu1 %v1767_v17  ;;  %1656 = vset.pattern.permute.xlu0 %v1767_v17 }
 0x508   : > { %1242 = vperm.xlu1 %1655, %v1209_v11  }
 0x50a   : > { %v986_v14 = vpop.f32.mrb[8].mxu0 }
 0x50b   : > { %995 = vrot.lane.b32.xlu0 %v986_v14, %s1765_s5  ;;  %v1580_v37 = vpop.f32.mrb[9].mxu0 }
 0x50c   : > { %801 = vrot.lane.b32.xlu1 %v793_v31, %s1766_s6  ;;  %v989_v45 = vpop.f32.mrb[10].mxu0 }
 0x50d   : > { %v1581_v46 = vpop.f32.mrb[11].mxu0  ;;  %1657 = vset.pattern.permute.xlu1 %v1768_v35  ;;  %v931_v35 = vpop.permute.xlu1 %930 }
 0x50f   : > { %1247 = vperm.xlu0 %1656, %v1210_v34  }
 0x510   : > { %1271 = vperm.xlu1 %1657, %v1209_v11  }
 0x511   : > { %v936_v0 = vpop.permute.xlu1 %935 }
 0x513   : > { %1658 = vset.pattern.permute.xlu0 %v1769_v51 }
 0x514   : > { %1276 = vperm.xlu1 %1657, %v1210_v34   ;;  %1300 = vperm.xlu0 %1658, %v1209_v11   ;;  %v1182_v48 = vpop.f32.mrb[12].mxu0 }
 0x515   : > { %v1592_v58 = vpop.f32.mrb[13].mxu0  ;;  %v1127_v22 = vpop.permute.xlu1 %1126 }
 0x516   : > { %v1185_v17 = vpop.f32.mrb[14].mxu0 }
 0x517   : > { %v1593_v59 = vpop.f32.mrb[15].mxu0 }
 0x518   : > { %997 = vrot.lane.b32.xlu1 %v989_v45, %s1765_s5 }
 0x519   : > { %1659 = vset.pattern.permute.xlu1 %v1769_v51  ;;  %v1132_v24 = vpop.permute.xlu1 %1131 }
 0x51c   : > { %1191 = vrot.lane.b32.xlu1 %v1182_v48, %s1764_s29 }
 0x520   : > { %1193 = vrot.lane.b32.xlu1 %v1185_v17, %s1764_s29 }
 0x524   : > { %1305 = vperm.xlu1 %1659, %v1210_v34  }
 0x571   : > { %v800_v4 = vpop.permute.xlu0 %799 }
 0x572   : > { %v805_v20 = vadd.f32 %v800_v4, %v742_v63 }
 0x574   : > { %808 = vst.msk [vmem:[#allocation4] sm:$0xff] %vm807_vm8, %v805_v20 }
 0x57b   : > { %v926_v43 = vld [vmem:[#allocation4] sm:$0xff] }
 0x57c   : > { %v938_v51 = vmul.f32 %v931_v35, %v926_v43 }
 0x582   : > { %v1214_v2 = vpop.permute.xlu1 %1213  ;;  %v1219_v3 = vpop.permute.xlu0 %1218 }
 0x583   : > { %1704 = vrcp.f32 %v1214_v2 }
 0x586   : > { %v996_v42 = vpop.permute.xlu0 %995 }
 0x587   : > { %v1001_v6 = vadd.f32 %v996_v42, %v938_v51  ;;  %v1243_v23 = vpop.permute.xlu1 %1242 }
 0x588   : > { %1706 = vrcp.f32 %v1243_v23 }
 0x589   : > { %1004 = vst.msk [vmem:[#allocation4] sm:$0xff] %vm1003_vm9, %v1001_v6 }
 0x58b   : > { %v802_v36 = vpop.permute.xlu1 %801 }
 0x58c   : > { %v806_v38 = vadd.f32 %v802_v36, %v743_v26 }
 0x58d   : > { %v1705_v10 = vpop.eup %1704 }
 0x58e   : > { %809 = vst.msk [vmem:[#allocation4 + $0x8] sm:$0xff] %vm807_vm8, %v806_v38  ;;  %v1248_v39 = vpop.permute.xlu0 %1247 }
 0x58f   : > { %v1272_v40 = vpop.permute.xlu1 %1271 }
 0x590   : > { %v1122_v49 = vld [vmem:[#allocation4] sm:$0xff]  ;;  %1708 = vrcp.f32 %v1272_v40 }
 0x591   : > { %v1134_v55 = vmul.f32 %v1127_v22, %v1122_v49 }
 0x592   : > { %v1707_v13 = vpop.eup %1706 }
 0x593   : > { %v1277_v41 = vpop.permute.xlu1 %1276  ;;  %v1301_v50 = vpop.permute.xlu0 %1300 }
 0x594   : > { %1710 = vrcp.f32 %v1301_v50 }
 0x595   : > { %v927_v44 = vld [vmem:[#allocation4 + $0x8] sm:$0xff]  ;;  %1712 = vrcp.f32 %v1219_v3 }
 0x596   : > { %v939_v47 = vmul.f32 %v936_v0, %v927_v44  ;;  %1714 = vrcp.f32 %v1248_v39 }
 0x597   : > { %v998_v54 = vpop.permute.xlu1 %997  ;;  %1716 = vrcp.f32 %v1277_v41 }
 0x598   : > { %v1002_v53 = vadd.f32 %v998_v54, %v939_v47 }
 0x59a   : > { %1005 = vst.msk [vmem:[#allocation4 + $0x8] sm:$0xff] %vm1003_vm9, %v1002_v53  ;;  %v1709_v57 = vpop.eup %1708 }
 0x59b   : > { %v1192_v56 = vpop.permute.xlu1 %1191 }
 0x59c   : > { %v1197_v62 = vadd.f32 %v1192_v56, %v1134_v55 }
 0x59e   : > { %1200 = vst.msk [vmem:[#allocation4] sm:$0xff] %vm1199_vm10, %v1197_v62  ;;  %v1711_v60 = vpop.eup %1710 }
 0x59f   : > { %v1194_v27 = vpop.permute.xlu1 %1193  ;;  %v1713_v29 = vpop.eup %1712 }
 0x5a0   : > { %v1715_v32 = vpop.eup %1714 }
 0x5a1   : > { %v1123_v7 = vld [vmem:[#allocation4 + $0x8] sm:$0xff]  ;;  %v1717_v28 = vpop.eup %1716 }
 0x5a2   : > { %v1135_v8 = vmul.f32 %v1132_v24, %v1123_v7 }
 0x5a3   : > { %v1306_v12 = vpop.permute.xlu1 %1305 }
 0x5a4   : > { %v1198_v18 = vadd.f32 %v1194_v27, %v1135_v8  ;;  %1718 = vrcp.f32 %v1306_v12 }
 0x5a5   : > { %v1207_v15 = vld [vmem:[#allocation4] sm:$0xff] }
 0x5a6   : > { %v1222_v1 = vmul.f32 %v1705_v10, %v1207_v15  ;;  %v1251_v5 = vmul.f32 %v1707_v13, %v1207_v15  ;;  %1201 = vst.msk [vmem:[#allocation4 + $0x8] sm:$0xff] %vm1199_vm10, %v1198_v18  ;;  %v1280_v16 = vmul.f32 %v1709_v57, %v1207_v15  ;;  %v1309_v19 = vmul.f32 %v1711_v60, %v1207_v15 }
 0x5a8   : > { %v1524_v21 = vpack.c.bf16 %v1251_v5, %v1251_v5  ;;  %v1522_v9 = vpack.c.bf16 %v1222_v1, %v1222_v1  ;;  %v1526_v25 = vpack.c.bf16 %v1280_v16, %v1280_v16  ;;  %v1528_v30 = vpack.c.bf16 %v1309_v19, %v1309_v19 }
 0x5aa   : > { %1234 = vst.msk [vmem:[%s412_s9] sm:$0xf] %vm1233_vm11, %v1522_v9 }
 0x5ab   : > { %1263 = vst.msk [vmem:[%s412_s9] sm:$0xf] %vm1262_vm12, %v1524_v21 }
 0x5ac   : > { %1292 = vst.msk [vmem:[%s412_s9] sm:$0xf] %vm1291_vm13, %v1526_v25 }
 0x5ad   : > { %v1208_v31 = vld [vmem:[#allocation4 + $0x8] sm:$0xff]  ;;  %1321 = vst.msk [vmem:[%s412_s9] sm:$0xf] %vm1320_vm14, %v1528_v30 }
 0x5ae   : > { %v1719_v33 = vpop.eup %1718  ;;  %v1224_v11 = vmul.f32 %v1713_v29, %v1208_v31  ;;  %v1253_v34 = vmul.f32 %v1715_v32, %v1208_v31  ;;  %v1282_v14 = vmul.f32 %v1717_v28, %v1208_v31 }
 0x5af   : > { %v1311_v37 = vmul.f32 %v1719_v33, %v1208_v31 }
 0x5b0   : > { %v1523_v45 = vpack.c.bf16 %v1224_v11, %v1224_v11  ;;  %v1525_v46 = vpack.c.bf16 %v1253_v34, %v1253_v34  ;;  %v1527_v48 = vpack.c.bf16 %v1282_v14, %v1282_v14 }
 0x5b1   : > { %v1529_v58 = vpack.c.bf16 %v1311_v37, %v1311_v37 }
 0x5b2   : > { %1235 = vst.msk [vmem:[%s412_s9 + $0x4] sm:$0xf] %vm1233_vm11, %v1523_v45 }
 0x5b3   : > { %1264 = vst.msk [vmem:[%s412_s9 + $0x4] sm:$0xf] %vm1262_vm12, %v1525_v46 }
 0x5b4   : > { %1293 = vst.msk [vmem:[%s412_s9 + $0x4] sm:$0xf] %vm1291_vm13, %v1527_v48 }
 0x5b5   : > { %1322 = vst.msk [vmem:[%s412_s9 + $0x4] sm:$0xf] %vm1320_vm14, %v1529_v58 }
 0x5b6 PF: > { %s14_s19 = sadd.s32 1, %s1758_s19   ;;  %s2190_s15 = smov %s1746_s16 }
 0x5b7   : > { %p11_p10 = scmp.ge.s32.totalorder %s14_s19, 4   ;;  %s2191_s16 = smov %s1834_s24 }
 0x5b8   : > { %s2192_s17 = smov %s1754_s18  ;;  %s2193_s18 = smov %s2195_s20 }
 0x5b9   :  { %13 = sbr.rel (!%p11_p10) target bundleno = 3 (0x3), region = 175 }

// kernel: transformer_core_forward.38
= control target key start
LH: loop header
LB: loop body
LE: loop exit
PB: predicated region body
PF: predicated region fallthrough
CT: control target
= control target key end

     0   :  { %s298_s1 = inlined_call_operand.vmem [shape: bf16[128,128], index: 1, kind: input, shape index: {}]   ;;  %s299_s0 = inlined_call_operand.vmem [shape: f32[32,128], index: 0, kind: input, shape index: {}]   ;;  %s300_s2 = inlined_call_operand.vmem [shape: f32[1,128], index: 2, kind: input, shape index: {}]   ;;  %s301_s3 = inlined_call_operand.vmem [shape: f32[32,128], index: 3, kind: output, shape index: {}]  }
   0x1   :  { %v219_v0 = vld [vmem:[%s298_s1] sm:$0xff]   ;;  %v220_v1 = vld [vmem:[%s298_s1 + $0x8] sm:$0xff]   ;;  %v221_v2 = vld [vmem:[%s298_s1 + $0x10] sm:$0xff]  }
   0x2   :  { %199 = vmatprep.subr.bf16.mxu0 %v219_v0  ;;  %v222_v3 = vld [vmem:[%s298_s1 + $0x18] sm:$0xff]   ;;  %v27_v4 = vld [vmem:[%s299_s0] sm:$0xff]  ;;  %v28_v5 = vld [vmem:[%s299_s0 + $0x8] sm:$0xff] }
   0x3   :  { %200 = vmatpush3.bf16.msra.mxu0 %v219_v0  ;;  %v31_v6 = vpack.c.bf16 %v28_v5, %v27_v4  ;;  %v223_v7 = vld [vmem:[%s298_s1 + $0x20] sm:$0xff]   ;;  %v224_v8 = vld [vmem:[%s298_s1 + $0x28] sm:$0xff]   ;;  %v225_v9 = vld [vmem:[%s298_s1 + $0x30] sm:$0xff]  }
   0x4   :  { %201 = vmatprep.subr.bf16.mxu0 %v220_v1  ;;  %v226_v10 = vld [vmem:[%s298_s1 + $0x38] sm:$0xff]   ;;  %v29_v11 = vld [vmem:[%s299_s0 + $0x10] sm:$0xff]  ;;  %v188_v14 = vld [vmem:[%s300_s2] ss:$0 sm:$0xff] }
   0x5   :  { %215 = vmatprep.mubr.bf16.mxu0 %v31_v6  ;;  %v30_v12 = vld [vmem:[%s299_s0 + $0x18] sm:$0xff] }
   0x6   :  { %v32_v13 = vpack.c.bf16 %v30_v12, %v29_v11 }
   0x7   :  { %202 = vmatpush3.bf16.msra.mxu0 %v220_v1 }
   0x8   :  { %203 = vmatprep.subr.bf16.mxu0 %v221_v2 }
   0xb   :  { %204 = vmatpush3.bf16.msra.mxu0 %v221_v2 }
   0xc   :  { %205 = vmatprep.subr.bf16.mxu0 %v222_v3 }
   0xf   :  { %206 = vmatpush3.bf16.msra.mxu0 %v222_v3 }
  0x10   :  { %207 = vmatprep.subr.bf16.mxu0 %v223_v7 }
  0x13   :  { %208 = vmatpush3.bf16.msra.mxu0 %v223_v7 }
  0x14   :  { %209 = vmatprep.subr.bf16.mxu0 %v224_v8 }
  0x17   :  { %210 = vmatpush3.bf16.msra.mxu0 %v224_v8 }
  0x18   :  { %211 = vmatprep.subr.bf16.mxu0 %v225_v9 }
  0x1b   :  { %212 = vmatpush3.bf16.msra.mxu0 %v225_v9 }
  0x1c   :  { %213 = vmatprep.subr.bf16.mxu0 %v226_v10 }
  0x1f   :  { %214 = vmatpush3.bf16.msra.mxu0 %v226_v10 }
  0x22   :  { %216 = vmatmul.mubr.bf16.vlgmr.msra.gmra.mrb[0].mxu0 %v32_v13 }
  0xf5   :  { %v217_v15 = vpop.f32.mrb[0].mxu0 }
  0xf6   :  { %v170_v16 = vadd.f32 %v217_v15, %v188_v14  ;;  %v131_v17 = vpop.f32.mrb[1].mxu0 }
  0xf7   :  { %v168_v18 = vadd.f32 %v188_v14, %v131_v17  ;;  %v218_v19 = vpop.f32.mrb[2].mxu0 }
  0xf8   :  { %174 = vst [vmem:[%s301_s3 + $0x10] sm:$0xff] %v170_v16  ;;  %v171_v20 = vadd.f32 %v218_v19, %v188_v14  ;;  %v134_v21 = vpop.f32.mrb[3].mxu0 }
  0xf9   :  { %172 = vst [vmem:[%s301_s3] sm:$0xff] %v168_v18  ;;  %v169_v22 = vadd.f32 %v188_v14, %v134_v21 }
  0xfa   :  { %175 = vst [vmem:[%s301_s3 + $0x18] sm:$0xff] %v171_v20 }
  0xfb   :  { %173 = vst [vmem:[%s301_s3 + $0x8] sm:$0xff] %v169_v22 }

// kernel: transformer_core_forward.28
= control target key start
LH: loop header
LB: loop body
LE: loop exit
PB: predicated region body
PF: predicated region fallthrough
CT: control target
= control target key end

     0   :  { %s571_s1 = inlined_call_operand.vmem [shape: bf16[256,128], index: 1, kind: input, shape index: {}]   ;;  %s572_s0 = inlined_call_operand.vmem [shape: bf16[32,256], index: 0, kind: input, shape index: {}]   ;;  %s573_s2 = inlined_call_operand.vmem [shape: f32[1,128], index: 2, kind: input, shape index: {}]   ;;  %s574_s3 = inlined_call_operand.vmem [shape: f32[32,128], index: 3, kind: input, shape index: {}]   ;;  %s575_s4 = inlined_call_operand.vmem [shape: f32[1,128], index: 4, kind: input, shape index: {}]   ;;  %s576_s5 = inlined_call_operand.vmem [shape: f32[1,128], index: 5, kind: input, shape index: {}]   ;;  %s577_s6 = inlined_call_operand.vmem [shape: f32[32,128], index: 6, kind: output, shape index: {}]  }
   0x1   :  { %v413_v0 = vld [vmem:[%s571_s1 + $0x40] sm:$0xff]   ;;  %v415_v2 = vld [vmem:[%s571_s1 + $0x48] sm:$0xff]   ;;  %v417_v4 = vld [vmem:[%s571_s1 + $0x50] sm:$0xff]  }
   0x2   :  { %v414_v1 = vld [vmem:[%s571_s1] sm:$0xff]   ;;  %369 = vmatprep.subr.bf16.mxu0 %v413_v0  ;;  %397 = vmatprep.subr.bf16.mxu1 %v413_v0  ;;  %v416_v3 = vld [vmem:[%s571_s1 + $0x8] sm:$0xff]   ;;  %v418_v5 = vld [vmem:[%s571_s1 + $0x10] sm:$0xff]  }
   0x3   :  { %370 = vmatpush3.bf16.msra.mxu0 %v414_v1  ;;  %405 = vmatpush3.bf16.msra.mxu1 %v414_v1  ;;  %v419_v6 = vld [vmem:[%s571_s1 + $0x58] sm:$0xff]   ;;  %v421_v8 = vld [vmem:[%s571_s1 + $0x60] sm:$0xff]   ;;  %v423_v10 = vld [vmem:[%s571_s1 + $0x68] sm:$0xff]  }
   0x4   :  { %371 = vmatprep.subr.bf16.mxu0 %v415_v2  ;;  %398 = vmatprep.subr.bf16.mxu1 %v415_v2  ;;  %v420_v7 = vld [vmem:[%s571_s1 + $0x18] sm:$0xff]   ;;  %v422_v9 = vld [vmem:[%s571_s1 + $0x20] sm:$0xff]   ;;  %v424_v13 = vld [vmem:[%s571_s1 + $0x28] sm:$0xff]  }
   0x5   :  { %v431_v11 = vld [vmem:[%s572_s0 + $0x4] ss:$8 sps:$4 sm:$0xff]   ;;  %v434_v12 = vld [vmem:[%s572_s0 + $0x14] ss:$8 sps:$4 sm:$0xff]   ;;  %v429_v18 = vld [vmem:[%s572_s0] ss:$8 sps:$4 sm:$0xff]  }
   0x6   :  { %v425_v14 = vld [vmem:[%s571_s1 + $0x70] sm:$0xff]   ;;  %220 = vmatprep.mubr.bf16.mxu0 %v431_v11  ;;  %228 = vmatprep.mubr.bf16.mxu1 %v434_v12  ;;  %v427_v16 = vld [vmem:[%s571_s1 + $0x78] sm:$0xff]   ;;  %v366_v23 = vld [vmem:[%s573_s2] ss:$0 sm:$0xff] }
   0x7   :  { %372 = vmatpush3.bf16.msra.mxu0 %v416_v3  ;;  %406 = vmatpush3.bf16.msra.mxu1 %v416_v3  ;;  %v426_v15 = vld [vmem:[%s571_s1 + $0x30] sm:$0xff]   ;;  %v428_v17 = vld [vmem:[%s571_s1 + $0x38] sm:$0xff]   ;;  %v263_v32 = vld [vmem:[%s574_s3] sm:$0xff] }
   0x8   :  { %373 = vmatprep.subr.bf16.mxu0 %v417_v4  ;;  %399 = vmatprep.subr.bf16.mxu1 %v417_v4  ;;  %v432_v19 = vld [vmem:[%s572_s0 + $0x10] ss:$8 sps:$4 sm:$0xff]   ;;  %v264_v42 = vld [vmem:[%s574_s3 + $0x8] sm:$0xff]  ;;  %v368_v12 = vld [vmem:[%s576_s5] ss:$0 sm:$0xff] }
   0x9   :  { %v265_v31 = vld [vmem:[%s574_s3 + $0x10] sm:$0xff]  ;;  %v266_v37 = vld [vmem:[%s574_s3 + $0x18] sm:$0xff] }
   0xb   :  { %374 = vmatpush3.bf16.msra.mxu0 %v418_v5  ;;  %407 = vmatpush3.bf16.msra.mxu1 %v418_v5 }
   0xc   :  { %375 = vmatprep.subr.bf16.mxu0 %v419_v6  ;;  %400 = vmatprep.subr.bf16.mxu1 %v419_v6 }
   0xf   :  { %376 = vmatpush3.bf16.msra.mxu0 %v420_v7  ;;  %408 = vmatpush3.bf16.msra.mxu1 %v420_v7 }
  0x10   :  { %377 = vmatprep.subr.bf16.mxu0 %v421_v8  ;;  %401 = vmatprep.subr.bf16.mxu1 %v421_v8 }
  0x13   :  { %378 = vmatpush3.bf16.msra.mxu0 %v422_v9  ;;  %409 = vmatpush3.bf16.msra.mxu1 %v422_v9 }
  0x14   :  { %379 = vmatprep.subr.bf16.mxu0 %v423_v10  ;;  %402 = vmatprep.subr.bf16.mxu1 %v423_v10  ;;  %v367_v10 = vld [vmem:[%s575_s4] ss:$0 sm:$0xff] }
  0x17   :  { %380 = vmatpush3.bf16.msra.mxu0 %v424_v13  ;;  %410 = vmatpush3.bf16.msra.mxu1 %v424_v13 }
  0x18   :  { %381 = vmatprep.subr.bf16.mxu0 %v425_v14  ;;  %403 = vmatprep.subr.bf16.mxu1 %v425_v14 }
  0x1b   :  { %382 = vmatpush3.bf16.msra.mxu0 %v426_v15  ;;  %411 = vmatpush3.bf16.msra.mxu1 %v426_v15 }
  0x1c   :  { %383 = vmatprep.subr.bf16.mxu0 %v427_v16  ;;  %404 = vmatprep.subr.bf16.mxu1 %v427_v16 }
  0x1f   :  { %384 = vmatpush3.bf16.msra.mxu0 %v428_v17  ;;  %412 = vmatpush3.bf16.msra.mxu1 %v428_v17 }
  0x22   :  { %221 = vmatmul.mubr.bf16.vlgmr.msra.gmra.mrb[0].mxu0 %v429_v18  ;;  %229 = vmatmul.mubr.bf16.vlgmr.msra.gmra.mrb[0].mxu1 %v432_v19 }
  0xf5   :  { %v385_v20 = vpop.f32.mrb[0].mxu0  ;;  %v391_v21 = vpop.f32.mrb[0].mxu1 }
  0xf6   :  { %v386_v22 = vpop.f32.mrb[1].mxu0  ;;  %v392_v24 = vpop.f32.mrb[1].mxu1 }
  0xf7   :  { %v387_v25 = vadd.f32 %v386_v22, %v385_v20  ;;  %v393_v26 = vadd.f32 %v392_v24, %v391_v21  ;;  %v388_v27 = vpop.f32.mrb[2].mxu0  ;;  %v394_v28 = vpop.f32.mrb[2].mxu1 }
  0xf8   :  { %v389_v29 = vpop.f32.mrb[3].mxu0  ;;  %v395_v30 = vpop.f32.mrb[3].mxu1 }
  0xf9   :  { %v259_v33 = vadd.f32 %v387_v25, %v366_v23  ;;  %v261_v34 = vadd.f32 %v393_v26, %v366_v23  ;;  %v390_v35 = vadd.f32 %v389_v29, %v388_v27  ;;  %v396_v36 = vadd.f32 %v395_v30, %v394_v28 }
  0xfb   :  { %v260_v38 = vadd.f32 %v390_v35, %v366_v23  ;;  %v262_v39 = vadd.f32 %v396_v36, %v366_v23  ;;  %v269_v40 = vadd.f32 %v265_v31, %v261_v34  ;;  %v267_v41 = vadd.f32 %v263_v32, %v259_v33 }
  0xfd   :  { %275 = vadd.xlane.f32.xlu1 %v269_v40  ;;  %271 = vadd.xlane.f32.xlu0 %v267_v41  ;;  %v270_v43 = vadd.f32 %v266_v37, %v262_v39  ;;  %v268_v44 = vadd.f32 %v264_v42, %v260_v38 }
 0x101   :  { %277 = vadd.xlane.f32.xlu1 %v270_v43  ;;  %273 = vadd.xlane.f32.xlu0 %v268_v44 }
 0x18a   :  { %v276_v45 = vpop.xlane.xlu1 %275  ;;  %v272_v46 = vpop.xlane.xlu0 %271 }
 0x18b   :  { %v282_v47 = vmul.f32 0.0078125, %v276_v45  ;;  %v280_v48 = vmul.f32 0.0078125, %v272_v46 }
 0x18d   :  { %v284_v49 = vsub.f32 %v267_v41, %v280_v48  ;;  %v286_v52 = vsub.f32 %v269_v40, %v282_v47 }
 0x18e   :  { %v278_v50 = vpop.xlane.xlu1 %277  ;;  %v274_v51 = vpop.xlane.xlu0 %273 }
 0x18f   :  { %v283_v53 = vmul.f32 0.0078125, %v278_v50  ;;  %v281_v54 = vmul.f32 0.0078125, %v274_v51  ;;  %v288_v55 = vmul.f32 %v284_v49, %v284_v49  ;;  %v290_v58 = vmul.f32 %v286_v52, %v286_v52 }
 0x191   :  { %v285_v56 = vsub.f32 %v268_v44, %v281_v54  ;;  %292 = vadd.xlane.f32.xlu0 %v288_v55  ;;  %v287_v57 = vsub.f32 %v270_v43, %v283_v53 }
 0x193   :  { %v289_v59 = vmul.f32 %v285_v56, %v285_v56  ;;  %v291_v60 = vmul.f32 %v287_v57, %v287_v57 }
 0x195   :  { %296 = vadd.xlane.f32.xlu0 %v290_v58  ;;  %294 = vadd.xlane.f32.xlu1 %v289_v59 }
 0x199   :  { %298 = vadd.xlane.f32.xlu1 %v291_v60 }
 0x21e   :  { %v293_v61 = vpop.xlane.xlu0 %292 }
 0x21f   :  { %v300_v62 = vmul.f32 0.0078125, %v293_v61 }
 0x221   :  { %v304_v63 = vadd.f32 1e-05, %v300_v62 }
 0x222   :  { %v295_v0 = vpop.xlane.xlu1 %294  ;;  %v297_v1 = vpop.xlane.xlu0 %296 }
 0x223   :  { %435 = vrsqrt.f32 %v304_v63  ;;  %v301_v2 = vmul.f32 0.0078125, %v295_v0  ;;  %v302_v3 = vmul.f32 0.0078125, %v297_v1 }
 0x225   :  { %v305_v4 = vadd.f32 1e-05, %v301_v2  ;;  %v306_v5 = vadd.f32 1e-05, %v302_v3 }
 0x226   :  { %v299_v6 = vpop.xlane.xlu1 %298 }
 0x227   :  { %437 = vrsqrt.f32 %v305_v4  ;;  %v303_v7 = vmul.f32 0.0078125, %v299_v6 }
 0x228   :  { %439 = vrsqrt.f32 %v306_v5 }
 0x229   :  { %v307_v8 = vadd.f32 1e-05, %v303_v7 }
 0x22b   :  { %441 = vrsqrt.f32 %v307_v8 }
 0x22d   :  { %v436_v9 = vpop.eup %435 }
 0x22e   :  { %v312_v11 = vmul.f32 %v436_v9, %v284_v49 }
 0x230   :  { %v323_v13 = vmul.f32 %v367_v10, %v312_v11 }
 0x231   :  { %v438_v14 = vpop.eup %437 }
 0x232   :  { %v440_v15 = vpop.eup %439  ;;  %v334_v16 = vadd.f32 %v368_v12, %v323_v13  ;;  %v313_v17 = vmul.f32 %v438_v14, %v285_v56 }
 0x233   :  { %v314_v18 = vmul.f32 %v440_v15, %v286_v52 }
 0x234   :  { %338 = vst [vmem:[%s577_s6] sm:$0xff] %v334_v16  ;;  %v324_v19 = vmul.f32 %v367_v10, %v313_v17 }
 0x235   :  { %v442_v20 = vpop.eup %441  ;;  %v325_v21 = vmul.f32 %v367_v10, %v314_v18 }
 0x236   :  { %v335_v22 = vadd.f32 %v368_v12, %v324_v19  ;;  %v315_v23 = vmul.f32 %v442_v20, %v287_v57 }
 0x237   :  { %v336_v24 = vadd.f32 %v368_v12, %v325_v21 }
 0x238   :  { %339 = vst [vmem:[%s577_s6 + $0x8] sm:$0xff] %v335_v22  ;;  %v326_v25 = vmul.f32 %v367_v10, %v315_v23 }
 0x239   :  { %340 = vst [vmem:[%s577_s6 + $0x10] sm:$0xff] %v336_v24 }
 0x23a   :  { %v337_v26 = vadd.f32 %v368_v12, %v326_v25 }
 0x23c   :  { %341 = vst [vmem:[%s577_s6 + $0x18] sm:$0xff] %v337_v26 }

</bundles_post_ra>
